<compile_context>
chip_gen: v7x
topology: tpu7x:2x2x1
jax: 0.10.0
libtpu: 0.0.40
codegen_flags: <defaults>
</compile_context>

<pallas_src>
import functools
import math

import jax
import jax.numpy as jnp
from jax.experimental import pallas as pl
from jax.experimental.pallas import tpu as pltpu


# ---------------------------------------------------------------------------
# Pallas kernels
# ---------------------------------------------------------------------------
def _matmul_kernel(*refs, relu, has_res):
    """Tiled matmul, f32 accumulator, fused bias (+residual) (+ReLU) epilogue."""
    if has_res:
        a_ref, b_ref, bias_ref, res_ref, o_ref, acc_ref = refs
    else:
        a_ref, b_ref, bias_ref, o_ref, acc_ref = refs
        res_ref = None
    k = pl.program_id(2)

    @pl.when(k == 0)
    def _():
        acc_ref[...] = jnp.zeros_like(acc_ref)

    # MXU operands in bf16 (A cast on the fly if it arrives as f32), f32 acc.
    acc_ref[...] += jnp.dot(a_ref[...].astype(jnp.bfloat16), b_ref[...],
                            preferred_element_type=jnp.float32)

    @pl.when(k == pl.num_programs(2) - 1)
    def _():
        y = acc_ref[...] + bias_ref[...]          # BN scale pre-folded into B
        if res_ref is not None:
            y = y + res_ref[...]                  # fused residual add
        if relu:
            y = jnp.maximum(y, 0.0)
        o_ref[...] = y.astype(o_ref.dtype)


def _mean_pool_kernel(x_ref, o_ref):
    # x: (H*W, C) -> (1, C)   (adaptive avg pool to 1x1); tiny at real sizes.
    o_ref[...] = jnp.mean(x_ref[...], axis=0, keepdims=True)


def _normalize_kernel(x_ref, mean_ref, inv_std_ref, o_ref):
    o_ref[...] = (x_ref[...] - mean_ref[...]) * inv_std_ref[...]


# ---------------------------------------------------------------------------
# Helpers
# ---------------------------------------------------------------------------
def _round_up(x, m):
    return ((x + m - 1) // m) * m


_VMEM_SPEC = pl.BlockSpec(memory_space=pltpu.MemorySpace.VMEM)


def _pad2(x, rp, cp, cast_to=None):
    """Pad a 2-D array up to (rp, cp); optionally cast when a copy is made."""
    r, c = x.shape
    if (rp, cp) != (r, c):
        x = jnp.pad(x, ((0, rp - r), (0, cp - c)))
        if cast_to is not None:
            x = x.astype(cast_to)
    return x


# ---------------------------------------------------------------------------
# Pallas wrappers
# ---------------------------------------------------------------------------
def matmul_bn(a, w_p, bias_p, n_out, *, relu, residual=None):
    """y = act(a @ w_p + bias_p [+ residual]).

    a:        (M, K)  f32 (or bf16) activation / im2col patches (K un-padded)
    w_p:      (Kp, Np) bf16, BN scale pre-folded, pre-padded at init
    bias_p:   (1, Np)  f32, pre-padded at init
    residual: optional (M, n_out) f32, fused into the epilogue with ReLU
    """
    M, K = a.shape
    Kp, Np = w_p.shape

    # Tile selection: big K tiles (few / single k-steps), bf16-friendly tm.
    tm = min(_round_up(M, 16), 256)
    Mp = _round_up(M, tm)
    tn = 256 if (Np % 256 == 0 and Np >= 512) else 128
    if Kp <= 2048:
        tk = Kp
    elif Kp % 512 == 0:
        tk = 512
    elif Kp % 256 == 0:
        tk = 256
    else:
        tk = 128

    a_p = _pad2(a, Mp, Kp, cast_to=jnp.bfloat16)   # cast only if a copy is made

    inputs = [a_p, w_p, bias_p]
    in_specs = [
        pl.BlockSpec((tm, tk), lambda i, j, k: (i, k)),
        pl.BlockSpec((tk, tn), lambda i, j, k: (k, j)),
        pl.BlockSpec((1, tn), lambda i, j, k: (0, j)),
    ]
    has_res = residual is not None
    if has_res:
        r_p = _pad2(residual, Mp, Np)
        inputs.append(r_p)
        in_specs.append(pl.BlockSpec((tm, tn), lambda i, j, k: (i, j)))

    bytes_accessed = (a_p.size * a_p.dtype.itemsize + w_p.size * 2
                      + bias_p.size * 4 + Mp * Np * 4
                      + (Mp * Np * 4 if has_res else 0))

    out = pl.pallas_call(
        functools.partial(_matmul_kernel, relu=relu, has_res=has_res),
        out_shape=jax.ShapeDtypeStruct((Mp, Np), jnp.float32),
        grid_spec=pltpu.PrefetchScalarGridSpec(
            num_scalar_prefetch=0,
            grid=(Mp // tm, Np // tn, Kp // tk),
            in_specs=in_specs,
            out_specs=pl.BlockSpec((tm, tn), lambda i, j, k: (i, j)),
            scratch_shapes=[pltpu.VMEM((tm, tn), jnp.float32)],
        ),
        compiler_params=pltpu.CompilerParams(
            dimension_semantics=("parallel", "parallel", "arbitrary")),
        cost_estimate=pl.CostEstimate(
            flops=2 * Mp * Np * Kp, transcendentals=0,
            bytes_accessed=bytes_accessed),
    )(*inputs)
    return out[:M, :n_out]


def global_avg_pool(x):
    N, H, W, C = x.shape
    assert N == 1  # PyTorch forward unsqueezes to batch 1
    out = pl.pallas_call(
        _mean_pool_kernel,
        out_shape=jax.ShapeDtypeStruct((1, C), x.dtype),
        in_specs=[_VMEM_SPEC],
        out_specs=_VMEM_SPEC,
    )(x.reshape(N * H * W, C))
    return out  # (1, C)  == res_pool5.view(res_pool5.size(0), -1)


IMAGENET_MEAN = jnp.array([0.485, 0.456, 0.406], jnp.float32)
IMAGENET_INV_STD = 1.0 / jnp.array([0.229, 0.224, 0.225], jnp.float32)


def normalize_image(img_hwc):
    """transforms.ToTensor()+Normalize + unsqueeze(0) -> (1, H, W, C)."""
    H, W, C = img_hwc.shape
    rows = H * W
    rblk = min(_round_up(rows, 8), 1024)
    rows_p = _round_up(rows, rblk)
    x = img_hwc.reshape(rows, C)
    if rows_p != rows:
        x = jnp.pad(x, ((0, rows_p - rows), (0, 0)))
    out = pl.pallas_call(
        _normalize_kernel,
        out_shape=jax.ShapeDtypeStruct((rows_p, C), jnp.float32),
        grid_spec=pltpu.PrefetchScalarGridSpec(
            num_scalar_prefetch=0,
            grid=(rows_p // rblk,),
            in_specs=[pl.BlockSpec((rblk, C), lambda i: (i, 0)),
                      pl.BlockSpec((1, C), lambda i: (0, 0)),
                      pl.BlockSpec((1, C), lambda i: (0, 0))],
            out_specs=pl.BlockSpec((rblk, C), lambda i: (i, 0)),
        ),
        compiler_params=pltpu.CompilerParams(
            dimension_semantics=("parallel",)),
    )(x, IMAGENET_MEAN.reshape(1, C), IMAGENET_INV_STD.reshape(1, C))
    return out[:rows].reshape(1, H, W, C)


# ---------------------------------------------------------------------------
# Conv / pool building blocks (minimal glue + Pallas matmul)
# ---------------------------------------------------------------------------
def im2col(x, k, stride, pad):
    N, H, W, C = x.shape
    xp = jnp.pad(x, ((0, 0), (pad, pad), (pad, pad), (0, 0)))
    Ho = (H + 2 * pad - k) // stride + 1
    Wo = (W + 2 * pad - k) // stride + 1
    taps = [xp[:, kh:kh + stride * Ho:stride, kw:kw + stride * Wo:stride, :]
            for kh in range(k) for kw in range(k)]
    patches = jnp.stack(taps, axis=3)               # (N, Ho, Wo, k*k, C)
    return patches.reshape(N * Ho * Wo, k * k * C), Ho, Wo


def conv_bn(x, p, *, stride, pad, relu, residual=None):
    """Conv + folded-BN (+ fused residual add) (+ ReLU) via the matmul kernel."""
    k = p['k']
    N, H, W, C = x.shape
    if k == 1:
        # 1x1 conv fast path: no im2col (pad is always 0 for 1x1 in ResNet).
        xs = x if stride == 1 else x[:, ::stride, ::stride, :]
        _, Ho, Wo, _ = xs.shape
        a = xs.reshape(N * Ho * Wo, C)
    else:
        a, Ho, Wo = im2col(x, k, stride, pad)
    res2d = None
    if residual is not None:
        res2d = residual.reshape(N * Ho * Wo, residual.shape[-1])
    y = matmul_bn(a, p['w'], p['bias'], p['cout'], relu=relu, residual=res2d)
    return y.reshape(N, Ho, Wo, p['cout'])


def maxpool_3x3_s2(x):
    # Taps folded pairwise with jnp.maximum in glue; XLA fuses this under jit
    # without materializing a 9x stacked array in HBM (per perf review).
    N, H, W, C = x.shape
    k, stride, pad = 3, 2, 1
    xp = jnp.pad(x, ((0, 0), (pad, pad), (pad, pad), (0, 0)),
                 constant_values=-jnp.inf)
    Ho = (H + 2 * pad - k) // stride + 1
    Wo = (W + 2 * pad - k) // stride + 1
    out = None
    for kh in range(k):
        for kw in range(k):
            tap = xp[:, kh:kh + stride * Ho:stride, kw:kw + stride * Wo:stride, :]
            out = tap if out is None else jnp.maximum(out, tap)
    return out


def bottleneck(x, p):
    s = p['stride']
    out = conv_bn(x, p['conv1'], stride=1, pad=0, relu=True)
    out = conv_bn(out, p['conv2'], stride=s, pad=1, relu=True)
    if 'down' in p:
        identity = conv_bn(x, p['down'], stride=s, pad=0, relu=False)
    else:
        identity = x
    # conv3 with residual add + ReLU fused into the matmul epilogue.
    return conv_bn(out, p['conv3'], stride=1, pad=0, relu=True, residual=identity)


# ---------------------------------------------------------------------------
# Deterministic parameter init (BatchNorm folded into weights/bias, eval mode)
# ---------------------------------------------------------------------------
def _fold_bn(key, cout, eps=1e-5):
    kg, kb, km = jax.random.split(key, 3)
    gamma = 1.0 + 0.1 * jax.random.normal(kg, (cout,), jnp.float32)
    beta = 0.1 * jax.random.normal(kb, (cout,), jnp.float32)
    running_mean = 0.1 * jax.random.normal(km, (cout,), jnp.float32)
    running_var = jnp.ones((cout,), jnp.float32)
    scale = gamma / jnp.sqrt(running_var + eps)
    bias = beta - running_mean * scale
    return scale, bias


def init_conv_bn(key, k, cin, cout):
    kw_, kbn = jax.random.split(key)
    fan_in = k * k * cin
    w = jax.random.normal(kw_, (k, k, cin, cout), jnp.float32) * math.sqrt(2.0 / fan_in)
    scale, bias = _fold_bn(kbn, cout)
    # Pre-fold BN scale into weight columns; pre-reshape, pre-pad, cast to bf16.
    wmat = w.reshape(fan_in, cout) * scale[None, :]
    Kp, Np = _round_up(fan_in, 128), _round_up(cout, 128)
    w_p = jnp.pad(wmat, ((0, Kp - fan_in), (0, Np - cout))).astype(jnp.bfloat16)
    bias_p = jnp.pad(bias.reshape(1, cout), ((0, 0), (0, Np - cout)))
    return {'w': w_p, 'bias': bias_p, 'k': k, 'cin': cin, 'cout': cout}


def init_resnet_params(key, base_width=8, blocks_per_stage=(1, 1, 1, 1)):
    # TODO(synk): torchvision resnet152 uses pretrained ImageNet weights,
    # base_width=64 and block counts [3, 8, 36, 3]; scaled down here to random
    # weights, base_width=8 and [1,1,1,1] blocks for a runnable synthetic kernel.
    expansion = 4
    keys = iter(jax.random.split(key, 128))
    params = {'stem': init_conv_bn(next(keys), 7, 3, base_width)}
    in_ch = base_width
    layers = []
    for stage, (nblocks, stride) in enumerate(zip(blocks_per_stage, (1, 2, 2, 2))):
        planes = base_width * (2 ** stage)
        stage_blocks = []
        for b in range(nblocks):
            s = stride if b == 0 else 1
            blk = {
                'conv1': init_conv_bn(next(keys), 1, in_ch, planes),
                'conv2': init_conv_bn(next(keys), 3, planes, planes),
                'conv3': init_conv_bn(next(keys), 1, planes, planes * expansion),
                'stride': s,
            }
            if s != 1 or in_ch != planes * expansion:
                blk['down'] = init_conv_bn(next(keys), 1, in_ch, planes * expansion)
            in_ch = planes * expansion
            stage_blocks.append(blk)
        layers.append(stage_blocks)
    params['layers'] = layers
    params['feat_dim'] = in_ch
    return params


# ---------------------------------------------------------------------------
# Forward (mirrors ResNet.forward: transform -> unsqueeze -> conv5 -> pool5 -> view)
# ---------------------------------------------------------------------------
def resnet_forward(img_hwc, params):
    x = normalize_image(img_hwc)                               # transform + unsqueeze(0)
    x = conv_bn(x, params['stem'], stride=2, pad=3, relu=True)  # conv1+bn1+relu
    x = maxpool_3x3_s2(x)                                       # maxpool
    for stage in params['layers']:                              # layer1..layer4 (conv5)
        for blk in stage:
            x = bottleneck(x, blk)
    return global_avg_pool(x)                                   # pool5 + view(1, -1)


if __name__ == "__main__":
    key = jax.random.PRNGKey(0)
    k_img, k_par = jax.random.split(key)
    # HWC image in [0, 1] (stands in for the PIL image fed to transforms.ToTensor)
    img = jax.random.uniform(k_img, (64, 64, 3), dtype=jnp.float32)
    params = init_resnet_params(k_par, base_width=8)

    # jit the whole forward (params captured as constants) so the remaining
    # glue ops (im2col stacking, maxpool tap maxima, pads/reshapes) fuse in XLA.
    forward = jax.jit(lambda im: resnet_forward(im, params))

    feats = forward(img)
    feats = jax.block_until_ready(feats)

    assert feats.shape == (1, params['feat_dim']), feats.shape
    assert bool(jnp.all(jnp.isfinite(feats)))
    print("KERNEL_OK")
</pallas_src>

<mosaic_0001>
module attributes {stable_mosaic.version = 11 : i64} {
  func.func @_normalize_kernel(%arg0: i32, %arg1: memref<1024x3xf32, #tpu.memory_space<vmem>>, %arg2: memref<1x3xf32, #tpu.memory_space<vmem>>, %arg3: memref<1x3xf32, #tpu.memory_space<vmem>>, %arg4: memref<1024x3xf32, #tpu.memory_space<vmem>>) attributes {dimension_semantics = [#tpu.dimension_semantics<parallel>], iteration_bounds = array<i64: 4>, scalar_prefetch = 0 : i64, scratch_operands = 0 : i64, tpu.core_type = #tpu.core_type<tc>, window_params = [{transform_indices = @transform_0, window_bounds = array<i64: 1024, 3>}, {pipeline_mode = #tpu.pipeline_mode<synchronous>, transform_indices = @transform_1, window_bounds = array<i64: 1, 3>}, {pipeline_mode = #tpu.pipeline_mode<synchronous>, transform_indices = @transform_2, window_bounds = array<i64: 1, 3>}, {transform_indices = @transform_3, window_bounds = array<i64: 1024, 3>}]} {
    %c0 = arith.constant 0 : index
    %c0_0 = arith.constant 0 : index
    %0 = vector.load %arg1[%c0, %c0_0] : memref<1024x3xf32, #tpu.memory_space<vmem>>, vector<1024x3xf32>
    %c0_1 = arith.constant 0 : index
    %c0_2 = arith.constant 0 : index
    %1 = vector.load %arg2[%c0_1, %c0_2] : memref<1x3xf32, #tpu.memory_space<vmem>>, vector<1x3xf32>
    %2 = vector.broadcast %1 : vector<1x3xf32> to vector<1024x3xf32>
    %3 = arith.subf %0, %2 : vector<1024x3xf32>
    %c0_3 = arith.constant 0 : index
    %c0_4 = arith.constant 0 : index
    %4 = vector.load %arg3[%c0_3, %c0_4] : memref<1x3xf32, #tpu.memory_space<vmem>>, vector<1x3xf32>
    %5 = vector.broadcast %4 : vector<1x3xf32> to vector<1024x3xf32>
    %6 = arith.mulf %3, %5 : vector<1024x3xf32>
    %c0_5 = arith.constant 0 : index
    %c0_6 = arith.constant 0 : index
    %7 = vector.load %arg4[%c0_5, %c0_6] : memref<1024x3xf32, #tpu.memory_space<vmem>>, vector<1024x3xf32>
    tpu.vector_store %arg4[%c0_5, %c0_6], %6 {strides = array<i32>} : memref<1024x3xf32, #tpu.memory_space<vmem>>, vector<1024x3xf32>,
    return
  }
  func.func @transform_0(%arg0: i32) -> (i32, i32) {
    %c0_i32 = arith.constant 0 : i32
    %c0_i32_0 = arith.constant 0 : i32
    return %arg0, %c0_i32 : i32, i32
  }
  func.func @transform_1(%arg0: i32) -> (i32, i32) {
    %c0_i32 = arith.constant 0 : i32
    %c0_i32_0 = arith.constant 0 : i32
    %c0_i32_1 = arith.constant 0 : i32
    return %c0_i32, %c0_i32_0 : i32, i32
  }
  func.func @transform_2(%arg0: i32) -> (i32, i32) {
    %c0_i32 = arith.constant 0 : i32
    %c0_i32_0 = arith.constant 0 : i32
    %c0_i32_1 = arith.constant 0 : i32
    return %c0_i32, %c0_i32_0 : i32, i32
  }
  func.func @transform_3(%arg0: i32) -> (i32, i32) {
    %c0_i32 = arith.constant 0 : i32
    %c0_i32_0 = arith.constant 0 : i32
    return %arg0, %c0_i32 : i32, i32
  }
}

module attributes {stable_mosaic.version = 11 : i64} {
  func.func @_matmul_kernel(%arg0: i32, %arg1: i32, %arg2: i32, %arg3: memref<256x256xbf16, #tpu.memory_space<vmem>>, %arg4: memref<256x128xbf16, #tpu.memory_space<vmem>>, %arg5: memref<1x128xf32, #tpu.memory_space<vmem>>, %arg6: memref<256x128xf32, #tpu.memory_space<vmem>>, %arg7: memref<256x128xf32, #tpu.memory_space<vmem>>) attributes {dimension_semantics = [#tpu.dimension_semantics<parallel>, #tpu.dimension_semantics<parallel>, #tpu.dimension_semantics<arbitrary>], iteration_bounds = array<i64: 4, 1, 1>, scalar_prefetch = 0 : i64, scratch_operands = 1 : i64, tpu.core_type = #tpu.core_type<tc>, window_params = [{transform_indices = @transform_0, window_bounds = array<i64: 256, 256>}, {transform_indices = @transform_1, window_bounds = array<i64: 256, 128>}, {transform_indices = @transform_2, window_bounds = array<i64: 1, 128>}, {transform_indices = @transform_3, window_bounds = array<i64: 256, 128>}]} {
    %c0_i32 = arith.constant 0 : i32
    %0 = arith.cmpi eq, %arg2, %c0_i32 : i32
    %1 = arith.extui %0 : i1 to i32
    %c0_i32_0 = arith.constant 0 : i32
    %2 = arith.cmpi ne, %1, %c0_i32_0 : i32
    scf.if %2 {
      %cst_10 = arith.constant 0.000000e+00 : f32
      %12 = vector.broadcast %cst_10 : f32 to vector<256x128xf32>
      %c0_11 = arith.constant 0 : index
      %c0_12 = arith.constant 0 : index
      %13 = vector.load %arg7[%c0_11, %c0_12] : memref<256x128xf32, #tpu.memory_space<vmem>>, vector<256x128xf32>
      tpu.vector_store %arg7[%c0_11, %c0_12], %12 {strides = array<i32>} : memref<256x128xf32, #tpu.memory_space<vmem>>, vector<256x128xf32>,
    } else {
    }
    %c0 = arith.constant 0 : index
    %c0_1 = arith.constant 0 : index
    %3 = vector.load %arg7[%c0, %c0_1] : memref<256x128xf32, #tpu.memory_space<vmem>>, vector<256x128xf32>
    %c0_2 = arith.constant 0 : index
    %c0_3 = arith.constant 0 : index
    %4 = vector.load %arg3[%c0_2, %c0_3] : memref<256x256xbf16, #tpu.memory_space<vmem>>, vector<256x256xbf16>
    %c0_4 = arith.constant 0 : index
    %c0_5 = arith.constant 0 : index
    %5 = vector.load %arg4[%c0_4, %c0_5] : memref<256x128xbf16, #tpu.memory_space<vmem>>, vector<256x128xbf16>
    %cst = arith.constant dense<0.000000e+00> : vector<256x128xf32>
    %6 = tpu.matmul %4, %5, %cst {dimension_numbers = #tpu.dot_dimension_numbers<[1], [0], [0], [1], [0, 0, 1, 1], [], []>} : vector<256x256xbf16>, vector<256x128xbf16>, vector<256x128xf32> -> vector<256x128xf32>
    %7 = arith.addf %3, %6 : vector<256x128xf32>
    %c0_6 = arith.constant 0 : index
    %c0_7 = arith.constant 0 : index
    %8 = vector.load %arg7[%c0_6, %c0_7] : memref<256x128xf32, #tpu.memory_space<vmem>>, vector<256x128xf32>
    tpu.vector_store %arg7[%c0_6, %c0_7], %7 {strides = array<i32>} : memref<256x128xf32, #tpu.memory_space<vmem>>, vector<256x128xf32>,
    %c0_i32_8 = arith.constant 0 : i32
    %9 = arith.cmpi eq, %arg2, %c0_i32_8 : i32
    %10 = arith.extui %9 : i1 to i32
    %c0_i32_9 = arith.constant 0 : i32
    %11 = arith.cmpi ne, %10, %c0_i32_9 : i32
    scf.if %11 {
      %c0_10 = arith.constant 0 : index
      %c0_11 = arith.constant 0 : index
      %12 = vector.load %arg7[%c0_10, %c0_11] : memref<256x128xf32, #tpu.memory_space<vmem>>, vector<256x128xf32>
      %c0_12 = arith.constant 0 : index
      %c0_13 = arith.constant 0 : index
      %13 = vector.load %arg5[%c0_12, %c0_13] : memref<1x128xf32, #tpu.memory_space<vmem>>, vector<1x128xf32>
      %14 = vector.broadcast %13 : vector<1x128xf32> to vector<256x128xf32>
      %15 = arith.addf %12, %14 : vector<256x128xf32>
      %cst_14 = arith.constant 0.000000e+00 : f32
      %16 = vector.broadcast %cst_14 : f32 to vector<256x128xf32>
      %17 = arith.maximumf %15, %16 : vector<256x128xf32>
      %c0_15 = arith.constant 0 : index
      %c0_16 = arith.constant 0 : index
      %18 = vector.load %arg6[%c0_15, %c0_16] : memref<256x128xf32, #tpu.memory_space<vmem>>, vector<256x128xf32>
      tpu.vector_store %arg6[%c0_15, %c0_16], %17 {strides = array<i32>} : memref<256x128xf32, #tpu.memory_space<vmem>>, vector<256x128xf32>,
    } else {
    }
    return
  }
  func.func @transform_0(%arg0: i32, %arg1: i32, %arg2: i32) -> (i32, i32) {
    %c0_i32 = arith.constant 0 : i32
    return %arg0, %arg2 : i32, i32
  }
  func.func @transform_1(%arg0: i32, %arg1: i32, %arg2: i32) -> (i32, i32) {
    %c0_i32 = arith.constant 0 : i32
    return %arg2, %arg1 : i32, i32
  }
  func.func @transform_2(%arg0: i32, %arg1: i32, %arg2: i32) -> (i32, i32) {
    %c0_i32 = arith.constant 0 : i32
    %c0_i32_0 = arith.constant 0 : i32
    return %c0_i32, %arg1 : i32, i32
  }
  func.func @transform_3(%arg0: i32, %arg1: i32, %arg2: i32) -> (i32, i32) {
    %c0_i32 = arith.constant 0 : i32
    return %arg0, %arg1 : i32, i32
  }
}

module attributes {stable_mosaic.version = 11 : i64} {
  func.func @_matmul_kernel(%arg0: i32, %arg1: i32, %arg2: i32, %arg3: memref<256x128xbf16, #tpu.memory_space<vmem>>, %arg4: memref<128x128xbf16, #tpu.memory_space<vmem>>, %arg5: memref<1x128xf32, #tpu.memory_space<vmem>>, %arg6: memref<256x128xf32, #tpu.memory_space<vmem>>, %arg7: memref<256x128xf32, #tpu.memory_space<vmem>>) attributes {dimension_semantics = [#tpu.dimension_semantics<parallel>, #tpu.dimension_semantics<parallel>, #tpu.dimension_semantics<arbitrary>], iteration_bounds = array<i64: 1, 1, 1>, scalar_prefetch = 0 : i64, scratch_operands = 1 : i64, tpu.core_type = #tpu.core_type<tc>, window_params = [{transform_indices = @transform_0, window_bounds = array<i64: 256, 128>}, {transform_indices = @transform_1, window_bounds = array<i64: 128, 128>}, {transform_indices = @transform_2, window_bounds = array<i64: 1, 128>}, {transform_indices = @transform_3, window_bounds = array<i64: 256, 128>}]} {
    %c0_i32 = arith.constant 0 : i32
    %0 = arith.cmpi eq, %arg2, %c0_i32 : i32
    %1 = arith.extui %0 : i1 to i32
    %c0_i32_0 = arith.constant 0 : i32
    %2 = arith.cmpi ne, %1, %c0_i32_0 : i32
    scf.if %2 {
      %cst_10 = arith.constant 0.000000e+00 : f32
      %12 = vector.broadcast %cst_10 : f32 to vector<256x128xf32>
      %c0_11 = arith.constant 0 : index
      %c0_12 = arith.constant 0 : index
      %13 = vector.load %arg7[%c0_11, %c0_12] : memref<256x128xf32, #tpu.memory_space<vmem>>, vector<256x128xf32>
      tpu.vector_store %arg7[%c0_11, %c0_12], %12 {strides = array<i32>} : memref<256x128xf32, #tpu.memory_space<vmem>>, vector<256x128xf32>,
    } else {
    }
    %c0 = arith.constant 0 : index
    %c0_1 = arith.constant 0 : index
    %3 = vector.load %arg7[%c0, %c0_1] : memref<256x128xf32, #tpu.memory_space<vmem>>, vector<256x128xf32>
    %c0_2 = arith.constant 0 : index
    %c0_3 = arith.constant 0 : index
    %4 = vector.load %arg3[%c0_2, %c0_3] : memref<256x128xbf16, #tpu.memory_space<vmem>>, vector<256x128xbf16>
    %c0_4 = arith.constant 0 : index
    %c0_5 = arith.constant 0 : index
    %5 = vector.load %arg4[%c0_4, %c0_5] : memref<128x128xbf16, #tpu.memory_space<vmem>>, vector<128x128xbf16>
    %cst = arith.constant dense<0.000000e+00> : vector<256x128xf32>
    %6 = tpu.matmul %4, %5, %cst {dimension_numbers = #tpu.dot_dimension_numbers<[1], [0], [0], [1], [0, 0, 1, 1], [], []>} : vector<256x128xbf16>, vector<128x128xbf16>, vector<256x128xf32> -> vector<256x128xf32>
    %7 = arith.addf %3, %6 : vector<256x128xf32>
    %c0_6 = arith.constant 0 : index
    %c0_7 = arith.constant 0 : index
    %8 = vector.load %arg7[%c0_6, %c0_7] : memref<256x128xf32, #tpu.memory_space<vmem>>, vector<256x128xf32>
    tpu.vector_store %arg7[%c0_6, %c0_7], %7 {strides = array<i32>} : memref<256x128xf32, #tpu.memory_space<vmem>>, vector<256x128xf32>,
    %c0_i32_8 = arith.constant 0 : i32
    %9 = arith.cmpi eq, %arg2, %c0_i32_8 : i32
    %10 = arith.extui %9 : i1 to i32
    %c0_i32_9 = arith.constant 0 : i32
    %11 = arith.cmpi ne, %10, %c0_i32_9 : i32
    scf.if %11 {
      %c0_10 = arith.constant 0 : index
      %c0_11 = arith.constant 0 : index
      %12 = vector.load %arg7[%c0_10, %c0_11] : memref<256x128xf32, #tpu.memory_space<vmem>>, vector<256x128xf32>
      %c0_12 = arith.constant 0 : index
      %c0_13 = arith.constant 0 : index
      %13 = vector.load %arg5[%c0_12, %c0_13] : memref<1x128xf32, #tpu.memory_space<vmem>>, vector<1x128xf32>
      %14 = vector.broadcast %13 : vector<1x128xf32> to vector<256x128xf32>
      %15 = arith.addf %12, %14 : vector<256x128xf32>
      %cst_14 = arith.constant 0.000000e+00 : f32
      %16 = vector.broadcast %cst_14 : f32 to vector<256x128xf32>
      %17 = arith.maximumf %15, %16 : vector<256x128xf32>
      %c0_15 = arith.constant 0 : index
      %c0_16 = arith.constant 0 : index
      %18 = vector.load %arg6[%c0_15, %c0_16] : memref<256x128xf32, #tpu.memory_space<vmem>>, vector<256x128xf32>
      tpu.vector_store %arg6[%c0_15, %c0_16], %17 {strides = array<i32>} : memref<256x128xf32, #tpu.memory_space<vmem>>, vector<256x128xf32>,
    } else {
    }
    return
  }
  func.func @transform_0(%arg0: i32, %arg1: i32, %arg2: i32) -> (i32, i32) {
    %c0_i32 = arith.constant 0 : i32
    return %arg0, %arg2 : i32, i32
  }
  func.func @transform_1(%arg0: i32, %arg1: i32, %arg2: i32) -> (i32, i32) {
    %c0_i32 = arith.constant 0 : i32
    return %arg2, %arg1 : i32, i32
  }
  func.func @transform_2(%arg0: i32, %arg1: i32, %arg2: i32) -> (i32, i32) {
    %c0_i32 = arith.constant 0 : i32
    %c0_i32_0 = arith.constant 0 : i32
    return %c0_i32, %arg1 : i32, i32
  }
  func.func @transform_3(%arg0: i32, %arg1: i32, %arg2: i32) -> (i32, i32) {
    %c0_i32 = arith.constant 0 : i32
    return %arg0, %arg1 : i32, i32
  }
}

module attributes {stable_mosaic.version = 11 : i64} {
  func.func @_matmul_kernel(%arg0: i32, %arg1: i32, %arg2: i32, %arg3: memref<256x128xbf16, #tpu.memory_space<vmem>>, %arg4: memref<128x128xbf16, #tpu.memory_space<vmem>>, %arg5: memref<1x128xf32, #tpu.memory_space<vmem>>, %arg6: memref<256x128xf32, #tpu.memory_space<vmem>>, %arg7: memref<256x128xf32, #tpu.memory_space<vmem>>) attributes {dimension_semantics = [#tpu.dimension_semantics<parallel>, #tpu.dimension_semantics<parallel>, #tpu.dimension_semantics<arbitrary>], iteration_bounds = array<i64: 1, 1, 1>, scalar_prefetch = 0 : i64, scratch_operands = 1 : i64, tpu.core_type = #tpu.core_type<tc>, window_params = [{transform_indices = @transform_0, window_bounds = array<i64: 256, 128>}, {transform_indices = @transform_1, window_bounds = array<i64: 128, 128>}, {transform_indices = @transform_2, window_bounds = array<i64: 1, 128>}, {transform_indices = @transform_3, window_bounds = array<i64: 256, 128>}]} {
    %c0_i32 = arith.constant 0 : i32
    %0 = arith.cmpi eq, %arg2, %c0_i32 : i32
    %1 = arith.extui %0 : i1 to i32
    %c0_i32_0 = arith.constant 0 : i32
    %2 = arith.cmpi ne, %1, %c0_i32_0 : i32
    scf.if %2 {
      %cst_10 = arith.constant 0.000000e+00 : f32
      %12 = vector.broadcast %cst_10 : f32 to vector<256x128xf32>
      %c0_11 = arith.constant 0 : index
      %c0_12 = arith.constant 0 : index
      %13 = vector.load %arg7[%c0_11, %c0_12] : memref<256x128xf32, #tpu.memory_space<vmem>>, vector<256x128xf32>
      tpu.vector_store %arg7[%c0_11, %c0_12], %12 {strides = array<i32>} : memref<256x128xf32, #tpu.memory_space<vmem>>, vector<256x128xf32>,
    } else {
    }
    %c0 = arith.constant 0 : index
    %c0_1 = arith.constant 0 : index
    %3 = vector.load %arg7[%c0, %c0_1] : memref<256x128xf32, #tpu.memory_space<vmem>>, vector<256x128xf32>
    %c0_2 = arith.constant 0 : index
    %c0_3 = arith.constant 0 : index
    %4 = vector.load %arg3[%c0_2, %c0_3] : memref<256x128xbf16, #tpu.memory_space<vmem>>, vector<256x128xbf16>
    %c0_4 = arith.constant 0 : index
    %c0_5 = arith.constant 0 : index
    %5 = vector.load %arg4[%c0_4, %c0_5] : memref<128x128xbf16, #tpu.memory_space<vmem>>, vector<128x128xbf16>
    %cst = arith.constant dense<0.000000e+00> : vector<256x128xf32>
    %6 = tpu.matmul %4, %5, %cst {dimension_numbers = #tpu.dot_dimension_numbers<[1], [0], [0], [1], [0, 0, 1, 1], [], []>} : vector<256x128xbf16>, vector<128x128xbf16>, vector<256x128xf32> -> vector<256x128xf32>
    %7 = arith.addf %3, %6 : vector<256x128xf32>
    %c0_6 = arith.constant 0 : index
    %c0_7 = arith.constant 0 : index
    %8 = vector.load %arg7[%c0_6, %c0_7] : memref<256x128xf32, #tpu.memory_space<vmem>>, vector<256x128xf32>
    tpu.vector_store %arg7[%c0_6, %c0_7], %7 {strides = array<i32>} : memref<256x128xf32, #tpu.memory_space<vmem>>, vector<256x128xf32>,
    %c0_i32_8 = arith.constant 0 : i32
    %9 = arith.cmpi eq, %arg2, %c0_i32_8 : i32
    %10 = arith.extui %9 : i1 to i32
    %c0_i32_9 = arith.constant 0 : i32
    %11 = arith.cmpi ne, %10, %c0_i32_9 : i32
    scf.if %11 {
      %c0_10 = arith.constant 0 : index
      %c0_11 = arith.constant 0 : index
      %12 = vector.load %arg7[%c0_10, %c0_11] : memref<256x128xf32, #tpu.memory_space<vmem>>, vector<256x128xf32>
      %c0_12 = arith.constant 0 : index
      %c0_13 = arith.constant 0 : index
      %13 = vector.load %arg5[%c0_12, %c0_13] : memref<1x128xf32, #tpu.memory_space<vmem>>, vector<1x128xf32>
      %14 = vector.broadcast %13 : vector<1x128xf32> to vector<256x128xf32>
      %15 = arith.addf %12, %14 : vector<256x128xf32>
      %c0_14 = arith.constant 0 : index
      %c0_15 = arith.constant 0 : index
      %16 = vector.load %arg6[%c0_14, %c0_15] : memref<256x128xf32, #tpu.memory_space<vmem>>, vector<256x128xf32>
      tpu.vector_store %arg6[%c0_14, %c0_15], %15 {strides = array<i32>} : memref<256x128xf32, #tpu.memory_space<vmem>>, vector<256x128xf32>,
    } else {
    }
    return
  }
  func.func @transform_0(%arg0: i32, %arg1: i32, %arg2: i32) -> (i32, i32) {
    %c0_i32 = arith.constant 0 : i32
    return %arg0, %arg2 : i32, i32
  }
  func.func @transform_1(%arg0: i32, %arg1: i32, %arg2: i32) -> (i32, i32) {
    %c0_i32 = arith.constant 0 : i32
    return %arg2, %arg1 : i32, i32
  }
  func.func @transform_2(%arg0: i32, %arg1: i32, %arg2: i32) -> (i32, i32) {
    %c0_i32 = arith.constant 0 : i32
    %c0_i32_0 = arith.constant 0 : i32
    return %c0_i32, %arg1 : i32, i32
  }
  func.func @transform_3(%arg0: i32, %arg1: i32, %arg2: i32) -> (i32, i32) {
    %c0_i32 = arith.constant 0 : i32
    return %arg0, %arg1 : i32, i32
  }
}

module attributes {stable_mosaic.version = 11 : i64} {
  func.func @_matmul_kernel(%arg0: i32, %arg1: i32, %arg2: i32, %arg3: memref<256x128xbf16, #tpu.memory_space<vmem>>, %arg4: memref<128x128xbf16, #tpu.memory_space<vmem>>, %arg5: memref<1x128xf32, #tpu.memory_space<vmem>>, %arg6: memref<256x128xf32, #tpu.memory_space<vmem>>, %arg7: memref<256x128xf32, #tpu.memory_space<vmem>>, %arg8: memref<256x128xf32, #tpu.memory_space<vmem>>) attributes {dimension_semantics = [#tpu.dimension_semantics<parallel>, #tpu.dimension_semantics<parallel>, #tpu.dimension_semantics<arbitrary>], iteration_bounds = array<i64: 1, 1, 1>, scalar_prefetch = 0 : i64, scratch_operands = 1 : i64, tpu.core_type = #tpu.core_type<tc>, window_params = [{transform_indices = @transform_0, window_bounds = array<i64: 256, 128>}, {transform_indices = @transform_1, window_bounds = array<i64: 128, 128>}, {transform_indices = @transform_2, window_bounds = array<i64: 1, 128>}, {transform_indices = @transform_3, window_bounds = array<i64: 256, 128>}, {transform_indices = @transform_4, window_bounds = array<i64: 256, 128>}]} {
    %c0_i32 = arith.constant 0 : i32
    %0 = arith.cmpi eq, %arg2, %c0_i32 : i32
    %1 = arith.extui %0 : i1 to i32
    %c0_i32_0 = arith.constant 0 : i32
    %2 = arith.cmpi ne, %1, %c0_i32_0 : i32
    scf.if %2 {
      %cst_10 = arith.constant 0.000000e+00 : f32
      %12 = vector.broadcast %cst_10 : f32 to vector<256x128xf32>
      %c0_11 = arith.constant 0 : index
      %c0_12 = arith.constant 0 : index
      %13 = vector.load %arg8[%c0_11, %c0_12] : memref<256x128xf32, #tpu.memory_space<vmem>>, vector<256x128xf32>
      tpu.vector_store %arg8[%c0_11, %c0_12], %12 {strides = array<i32>} : memref<256x128xf32, #tpu.memory_space<vmem>>, vector<256x128xf32>,
    } else {
    }
    %c0 = arith.constant 0 : index
    %c0_1 = arith.constant 0 : index
    %3 = vector.load %arg8[%c0, %c0_1] : memref<256x128xf32, #tpu.memory_space<vmem>>, vector<256x128xf32>
    %c0_2 = arith.constant 0 : index
    %c0_3 = arith.constant 0 : index
    %4 = vector.load %arg3[%c0_2, %c0_3] : memref<256x128xbf16, #tpu.memory_space<vmem>>, vector<256x128xbf16>
    %c0_4 = arith.constant 0 : index
    %c0_5 = arith.constant 0 : index
    %5 = vector.load %arg4[%c0_4, %c0_5] : memref<128x128xbf16, #tpu.memory_space<vmem>>, vector<128x128xbf16>
    %cst = arith.constant dense<0.000000e+00> : vector<256x128xf32>
    %6 = tpu.matmul %4, %5, %cst {dimension_numbers = #tpu.dot_dimension_numbers<[1], [0], [0], [1], [0, 0, 1, 1], [], []>} : vector<256x128xbf16>, vector<128x128xbf16>, vector<256x128xf32> -> vector<256x128xf32>
    %7 = arith.addf %3, %6 : vector<256x128xf32>
    %c0_6 = arith.constant 0 : index
    %c0_7 = arith.constant 0 : index
    %8 = vector.load %arg8[%c0_6, %c0_7] : memref<256x128xf32, #tpu.memory_space<vmem>>, vector<256x128xf32>
    tpu.vector_store %arg8[%c0_6, %c0_7], %7 {strides = array<i32>} : memref<256x128xf32, #tpu.memory_space<vmem>>, vector<256x128xf32>,
    %c0_i32_8 = arith.constant 0 : i32
    %9 = arith.cmpi eq, %arg2, %c0_i32_8 : i32
    %10 = arith.extui %9 : i1 to i32
    %c0_i32_9 = arith.constant 0 : i32
    %11 = arith.cmpi ne, %10, %c0_i32_9 : i32
    scf.if %11 {
      %c0_10 = arith.constant 0 : index
      %c0_11 = arith.constant 0 : index
      %12 = vector.load %arg8[%c0_10, %c0_11] : memref<256x128xf32, #tpu.memory_space<vmem>>, vector<256x128xf32>
      %c0_12 = arith.constant 0 : index
      %c0_13 = arith.constant 0 : index
      %13 = vector.load %arg5[%c0_12, %c0_13] : memref<1x128xf32, #tpu.memory_space<vmem>>, vector<1x128xf32>
      %14 = vector.broadcast %13 : vector<1x128xf32> to vector<256x128xf32>
      %15 = arith.addf %12, %14 : vector<256x128xf32>
      %c0_14 = arith.constant 0 : index
      %c0_15 = arith.constant 0 : index
      %16 = vector.load %arg6[%c0_14, %c0_15] : memref<256x128xf32, #tpu.memory_space<vmem>>, vector<256x128xf32>
      %17 = arith.addf %15, %16 : vector<256x128xf32>
      %cst_16 = arith.constant 0.000000e+00 : f32
      %18 = vector.broadcast %cst_16 : f32 to vector<256x128xf32>
      %19 = arith.maximumf %17, %18 : vector<256x128xf32>
      %c0_17 = arith.constant 0 : index
      %c0_18 = arith.constant 0 : index
      %20 = vector.load %arg7[%c0_17, %c0_18] : memref<256x128xf32, #tpu.memory_space<vmem>>, vector<256x128xf32>
      tpu.vector_store %arg7[%c0_17, %c0_18], %19 {strides = array<i32>} : memref<256x128xf32, #tpu.memory_space<vmem>>, vector<256x128xf32>,
    } else {
    }
    return
  }
  func.func @transform_0(%arg0: i32, %arg1: i32, %arg2: i32) -> (i32, i32) {
    %c0_i32 = arith.constant 0 : i32
    return %arg0, %arg2 : i32, i32
  }
  func.func @transform_1(%arg0: i32, %arg1: i32, %arg2: i32) -> (i32, i32) {
    %c0_i32 = arith.constant 0 : i32
    return %arg2, %arg1 : i32, i32
  }
  func.func @transform_2(%arg0: i32, %arg1: i32, %arg2: i32) -> (i32, i32) {
    %c0_i32 = arith.constant 0 : i32
    %c0_i32_0 = arith.constant 0 : i32
    return %c0_i32, %arg1 : i32, i32
  }
  func.func @transform_3(%arg0: i32, %arg1: i32, %arg2: i32) -> (i32, i32) {
    %c0_i32 = arith.constant 0 : i32
    return %arg0, %arg1 : i32, i32
  }
  func.func @transform_4(%arg0: i32, %arg1: i32, %arg2: i32) -> (i32, i32) {
    %c0_i32 = arith.constant 0 : i32
    return %arg0, %arg1 : i32, i32
  }
}

module attributes {stable_mosaic.version = 11 : i64} {
  func.func @_matmul_kernel(%arg0: i32, %arg1: i32, %arg2: i32, %arg3: memref<64x256xbf16, #tpu.memory_space<vmem>>, %arg4: memref<256x128xbf16, #tpu.memory_space<vmem>>, %arg5: memref<1x128xf32, #tpu.memory_space<vmem>>, %arg6: memref<64x128xf32, #tpu.memory_space<vmem>>, %arg7: memref<64x128xf32, #tpu.memory_space<vmem>>) attributes {dimension_semantics = [#tpu.dimension_semantics<parallel>, #tpu.dimension_semantics<parallel>, #tpu.dimension_semantics<arbitrary>], iteration_bounds = array<i64: 1, 1, 1>, scalar_prefetch = 0 : i64, scratch_operands = 1 : i64, tpu.core_type = #tpu.core_type<tc>, window_params = [{transform_indices = @transform_0, window_bounds = array<i64: 64, 256>}, {transform_indices = @transform_1, window_bounds = array<i64: 256, 128>}, {transform_indices = @transform_2, window_bounds = array<i64: 1, 128>}, {transform_indices = @transform_3, window_bounds = array<i64: 64, 128>}]} {
    %c0_i32 = arith.constant 0 : i32
    %0 = arith.cmpi eq, %arg2, %c0_i32 : i32
    %1 = arith.extui %0 : i1 to i32
    %c0_i32_0 = arith.constant 0 : i32
    %2 = arith.cmpi ne, %1, %c0_i32_0 : i32
    scf.if %2 {
      %cst_10 = arith.constant 0.000000e+00 : f32
      %12 = vector.broadcast %cst_10 : f32 to vector<64x128xf32>
      %c0_11 = arith.constant 0 : index
      %c0_12 = arith.constant 0 : index
      %13 = vector.load %arg7[%c0_11, %c0_12] : memref<64x128xf32, #tpu.memory_space<vmem>>, vector<64x128xf32>
      tpu.vector_store %arg7[%c0_11, %c0_12], %12 {strides = array<i32>} : memref<64x128xf32, #tpu.memory_space<vmem>>, vector<64x128xf32>,
    } else {
    }
    %c0 = arith.constant 0 : index
    %c0_1 = arith.constant 0 : index
    %3 = vector.load %arg7[%c0, %c0_1] : memref<64x128xf32, #tpu.memory_space<vmem>>, vector<64x128xf32>
    %c0_2 = arith.constant 0 : index
    %c0_3 = arith.constant 0 : index
    %4 = vector.load %arg3[%c0_2, %c0_3] : memref<64x256xbf16, #tpu.memory_space<vmem>>, vector<64x256xbf16>
    %c0_4 = arith.constant 0 : index
    %c0_5 = arith.constant 0 : index
    %5 = vector.load %arg4[%c0_4, %c0_5] : memref<256x128xbf16, #tpu.memory_space<vmem>>, vector<256x128xbf16>
    %cst = arith.constant dense<0.000000e+00> : vector<64x128xf32>
    %6 = tpu.matmul %4, %5, %cst {dimension_numbers = #tpu.dot_dimension_numbers<[1], [0], [0], [1], [0, 0, 1, 1], [], []>} : vector<64x256xbf16>, vector<256x128xbf16>, vector<64x128xf32> -> vector<64x128xf32>
    %7 = arith.addf %3, %6 : vector<64x128xf32>
    %c0_6 = arith.constant 0 : index
    %c0_7 = arith.constant 0 : index
    %8 = vector.load %arg7[%c0_6, %c0_7] : memref<64x128xf32, #tpu.memory_space<vmem>>, vector<64x128xf32>
    tpu.vector_store %arg7[%c0_6, %c0_7], %7 {strides = array<i32>} : memref<64x128xf32, #tpu.memory_space<vmem>>, vector<64x128xf32>,
    %c0_i32_8 = arith.constant 0 : i32
    %9 = arith.cmpi eq, %arg2, %c0_i32_8 : i32
    %10 = arith.extui %9 : i1 to i32
    %c0_i32_9 = arith.constant 0 : i32
    %11 = arith.cmpi ne, %10, %c0_i32_9 : i32
    scf.if %11 {
      %c0_10 = arith.constant 0 : index
      %c0_11 = arith.constant 0 : index
      %12 = vector.load %arg7[%c0_10, %c0_11] : memref<64x128xf32, #tpu.memory_space<vmem>>, vector<64x128xf32>
      %c0_12 = arith.constant 0 : index
      %c0_13 = arith.constant 0 : index
      %13 = vector.load %arg5[%c0_12, %c0_13] : memref<1x128xf32, #tpu.memory_space<vmem>>, vector<1x128xf32>
      %14 = vector.broadcast %13 : vector<1x128xf32> to vector<64x128xf32>
      %15 = arith.addf %12, %14 : vector<64x128xf32>
      %cst_14 = arith.constant 0.000000e+00 : f32
      %16 = vector.broadcast %cst_14 : f32 to vector<64x128xf32>
      %17 = arith.maximumf %15, %16 : vector<64x128xf32>
      %c0_15 = arith.constant 0 : index
      %c0_16 = arith.constant 0 : index
      %18 = vector.load %arg6[%c0_15, %c0_16] : memref<64x128xf32, #tpu.memory_space<vmem>>, vector<64x128xf32>
      tpu.vector_store %arg6[%c0_15, %c0_16], %17 {strides = array<i32>} : memref<64x128xf32, #tpu.memory_space<vmem>>, vector<64x128xf32>,
    } else {
    }
    return
  }
  func.func @transform_0(%arg0: i32, %arg1: i32, %arg2: i32) -> (i32, i32) {
    %c0_i32 = arith.constant 0 : i32
    return %arg0, %arg2 : i32, i32
  }
  func.func @transform_1(%arg0: i32, %arg1: i32, %arg2: i32) -> (i32, i32) {
    %c0_i32 = arith.constant 0 : i32
    return %arg2, %arg1 : i32, i32
  }
  func.func @transform_2(%arg0: i32, %arg1: i32, %arg2: i32) -> (i32, i32) {
    %c0_i32 = arith.constant 0 : i32
    %c0_i32_0 = arith.constant 0 : i32
    return %c0_i32, %arg1 : i32, i32
  }
  func.func @transform_3(%arg0: i32, %arg1: i32, %arg2: i32) -> (i32, i32) {
    %c0_i32 = arith.constant 0 : i32
    return %arg0, %arg1 : i32, i32
  }
}

module attributes {stable_mosaic.version = 11 : i64} {
  func.func @_matmul_kernel(%arg0: i32, %arg1: i32, %arg2: i32, %arg3: memref<64x128xbf16, #tpu.memory_space<vmem>>, %arg4: memref<128x128xbf16, #tpu.memory_space<vmem>>, %arg5: memref<1x128xf32, #tpu.memory_space<vmem>>, %arg6: memref<64x128xf32, #tpu.memory_space<vmem>>, %arg7: memref<64x128xf32, #tpu.memory_space<vmem>>) attributes {dimension_semantics = [#tpu.dimension_semantics<parallel>, #tpu.dimension_semantics<parallel>, #tpu.dimension_semantics<arbitrary>], iteration_bounds = array<i64: 1, 1, 1>, scalar_prefetch = 0 : i64, scratch_operands = 1 : i64, tpu.core_type = #tpu.core_type<tc>, window_params = [{transform_indices = @transform_0, window_bounds = array<i64: 64, 128>}, {transform_indices = @transform_1, window_bounds = array<i64: 128, 128>}, {transform_indices = @transform_2, window_bounds = array<i64: 1, 128>}, {transform_indices = @transform_3, window_bounds = array<i64: 64, 128>}]} {
    %c0_i32 = arith.constant 0 : i32
    %0 = arith.cmpi eq, %arg2, %c0_i32 : i32
    %1 = arith.extui %0 : i1 to i32
    %c0_i32_0 = arith.constant 0 : i32
    %2 = arith.cmpi ne, %1, %c0_i32_0 : i32
    scf.if %2 {
      %cst_10 = arith.constant 0.000000e+00 : f32
      %12 = vector.broadcast %cst_10 : f32 to vector<64x128xf32>
      %c0_11 = arith.constant 0 : index
      %c0_12 = arith.constant 0 : index
      %13 = vector.load %arg7[%c0_11, %c0_12] : memref<64x128xf32, #tpu.memory_space<vmem>>, vector<64x128xf32>
      tpu.vector_store %arg7[%c0_11, %c0_12], %12 {strides = array<i32>} : memref<64x128xf32, #tpu.memory_space<vmem>>, vector<64x128xf32>,
    } else {
    }
    %c0 = arith.constant 0 : index
    %c0_1 = arith.constant 0 : index
    %3 = vector.load %arg7[%c0, %c0_1] : memref<64x128xf32, #tpu.memory_space<vmem>>, vector<64x128xf32>
    %c0_2 = arith.constant 0 : index
    %c0_3 = arith.constant 0 : index
    %4 = vector.load %arg3[%c0_2, %c0_3] : memref<64x128xbf16, #tpu.memory_space<vmem>>, vector<64x128xbf16>
    %c0_4 = arith.constant 0 : index
    %c0_5 = arith.constant 0 : index
    %5 = vector.load %arg4[%c0_4, %c0_5] : memref<128x128xbf16, #tpu.memory_space<vmem>>, vector<128x128xbf16>
    %cst = arith.constant dense<0.000000e+00> : vector<64x128xf32>
    %6 = tpu.matmul %4, %5, %cst {dimension_numbers = #tpu.dot_dimension_numbers<[1], [0], [0], [1], [0, 0, 1, 1], [], []>} : vector<64x128xbf16>, vector<128x128xbf16>, vector<64x128xf32> -> vector<64x128xf32>
    %7 = arith.addf %3, %6 : vector<64x128xf32>
    %c0_6 = arith.constant 0 : index
    %c0_7 = arith.constant 0 : index
    %8 = vector.load %arg7[%c0_6, %c0_7] : memref<64x128xf32, #tpu.memory_space<vmem>>, vector<64x128xf32>
    tpu.vector_store %arg7[%c0_6, %c0_7], %7 {strides = array<i32>} : memref<64x128xf32, #tpu.memory_space<vmem>>, vector<64x128xf32>,
    %c0_i32_8 = arith.constant 0 : i32
    %9 = arith.cmpi eq, %arg2, %c0_i32_8 : i32
    %10 = arith.extui %9 : i1 to i32
    %c0_i32_9 = arith.constant 0 : i32
    %11 = arith.cmpi ne, %10, %c0_i32_9 : i32
    scf.if %11 {
      %c0_10 = arith.constant 0 : index
      %c0_11 = arith.constant 0 : index
      %12 = vector.load %arg7[%c0_10, %c0_11] : memref<64x128xf32, #tpu.memory_space<vmem>>, vector<64x128xf32>
      %c0_12 = arith.constant 0 : index
      %c0_13 = arith.constant 0 : index
      %13 = vector.load %arg5[%c0_12, %c0_13] : memref<1x128xf32, #tpu.memory_space<vmem>>, vector<1x128xf32>
      %14 = vector.broadcast %13 : vector<1x128xf32> to vector<64x128xf32>
      %15 = arith.addf %12, %14 : vector<64x128xf32>
      %c0_14 = arith.constant 0 : index
      %c0_15 = arith.constant 0 : index
      %16 = vector.load %arg6[%c0_14, %c0_15] : memref<64x128xf32, #tpu.memory_space<vmem>>, vector<64x128xf32>
      tpu.vector_store %arg6[%c0_14, %c0_15], %15 {strides = array<i32>} : memref<64x128xf32, #tpu.memory_space<vmem>>, vector<64x128xf32>,
    } else {
    }
    return
  }
  func.func @transform_0(%arg0: i32, %arg1: i32, %arg2: i32) -> (i32, i32) {
    %c0_i32 = arith.constant 0 : i32
    return %arg0, %arg2 : i32, i32
  }
  func.func @transform_1(%arg0: i32, %arg1: i32, %arg2: i32) -> (i32, i32) {
    %c0_i32 = arith.constant 0 : i32
    return %arg2, %arg1 : i32, i32
  }
  func.func @transform_2(%arg0: i32, %arg1: i32, %arg2: i32) -> (i32, i32) {
    %c0_i32 = arith.constant 0 : i32
    %c0_i32_0 = arith.constant 0 : i32
    return %c0_i32, %arg1 : i32, i32
  }
  func.func @transform_3(%arg0: i32, %arg1: i32, %arg2: i32) -> (i32, i32) {
    %c0_i32 = arith.constant 0 : i32
    return %arg0, %arg1 : i32, i32
  }
}

module attributes {stable_mosaic.version = 11 : i64} {
  func.func @_matmul_kernel(%arg0: i32, %arg1: i32, %arg2: i32, %arg3: memref<64x128xbf16, #tpu.memory_space<vmem>>, %arg4: memref<128x128xbf16, #tpu.memory_space<vmem>>, %arg5: memref<1x128xf32, #tpu.memory_space<vmem>>, %arg6: memref<64x128xf32, #tpu.memory_space<vmem>>, %arg7: memref<64x128xf32, #tpu.memory_space<vmem>>, %arg8: memref<64x128xf32, #tpu.memory_space<vmem>>) attributes {dimension_semantics = [#tpu.dimension_semantics<parallel>, #tpu.dimension_semantics<parallel>, #tpu.dimension_semantics<arbitrary>], iteration_bounds = array<i64: 1, 1, 1>, scalar_prefetch = 0 : i64, scratch_operands = 1 : i64, tpu.core_type = #tpu.core_type<tc>, window_params = [{transform_indices = @transform_0, window_bounds = array<i64: 64, 128>}, {transform_indices = @transform_1, window_bounds = array<i64: 128, 128>}, {transform_indices = @transform_2, window_bounds = array<i64: 1, 128>}, {transform_indices = @transform_3, window_bounds = array<i64: 64, 128>}, {transform_indices = @transform_4, window_bounds = array<i64: 64, 128>}]} {
    %c0_i32 = arith.constant 0 : i32
    %0 = arith.cmpi eq, %arg2, %c0_i32 : i32
    %1 = arith.extui %0 : i1 to i32
    %c0_i32_0 = arith.constant 0 : i32
    %2 = arith.cmpi ne, %1, %c0_i32_0 : i32
    scf.if %2 {
      %cst_10 = arith.constant 0.000000e+00 : f32
      %12 = vector.broadcast %cst_10 : f32 to vector<64x128xf32>
      %c0_11 = arith.constant 0 : index
      %c0_12 = arith.constant 0 : index
      %13 = vector.load %arg8[%c0_11, %c0_12] : memref<64x128xf32, #tpu.memory_space<vmem>>, vector<64x128xf32>
      tpu.vector_store %arg8[%c0_11, %c0_12], %12 {strides = array<i32>} : memref<64x128xf32, #tpu.memory_space<vmem>>, vector<64x128xf32>,
    } else {
    }
    %c0 = arith.constant 0 : index
    %c0_1 = arith.constant 0 : index
    %3 = vector.load %arg8[%c0, %c0_1] : memref<64x128xf32, #tpu.memory_space<vmem>>, vector<64x128xf32>
    %c0_2 = arith.constant 0 : index
    %c0_3 = arith.constant 0 : index
    %4 = vector.load %arg3[%c0_2, %c0_3] : memref<64x128xbf16, #tpu.memory_space<vmem>>, vector<64x128xbf16>
    %c0_4 = arith.constant 0 : index
    %c0_5 = arith.constant 0 : index
    %5 = vector.load %arg4[%c0_4, %c0_5] : memref<128x128xbf16, #tpu.memory_space<vmem>>, vector<128x128xbf16>
    %cst = arith.constant dense<0.000000e+00> : vector<64x128xf32>
    %6 = tpu.matmul %4, %5, %cst {dimension_numbers = #tpu.dot_dimension_numbers<[1], [0], [0], [1], [0, 0, 1, 1], [], []>} : vector<64x128xbf16>, vector<128x128xbf16>, vector<64x128xf32> -> vector<64x128xf32>
    %7 = arith.addf %3, %6 : vector<64x128xf32>
    %c0_6 = arith.constant 0 : index
    %c0_7 = arith.constant 0 : index
    %8 = vector.load %arg8[%c0_6, %c0_7] : memref<64x128xf32, #tpu.memory_space<vmem>>, vector<64x128xf32>
    tpu.vector_store %arg8[%c0_6, %c0_7], %7 {strides = array<i32>} : memref<64x128xf32, #tpu.memory_space<vmem>>, vector<64x128xf32>,
    %c0_i32_8 = arith.constant 0 : i32
    %9 = arith.cmpi eq, %arg2, %c0_i32_8 : i32
    %10 = arith.extui %9 : i1 to i32
    %c0_i32_9 = arith.constant 0 : i32
    %11 = arith.cmpi ne, %10, %c0_i32_9 : i32
    scf.if %11 {
      %c0_10 = arith.constant 0 : index
      %c0_11 = arith.constant 0 : index
      %12 = vector.load %arg8[%c0_10, %c0_11] : memref<64x128xf32, #tpu.memory_space<vmem>>, vector<64x128xf32>
      %c0_12 = arith.constant 0 : index
      %c0_13 = arith.constant 0 : index
      %13 = vector.load %arg5[%c0_12, %c0_13] : memref<1x128xf32, #tpu.memory_space<vmem>>, vector<1x128xf32>
      %14 = vector.broadcast %13 : vector<1x128xf32> to vector<64x128xf32>
      %15 = arith.addf %12, %14 : vector<64x128xf32>
      %c0_14 = arith.constant 0 : index
      %c0_15 = arith.constant 0 : index
      %16 = vector.load %arg6[%c0_14, %c0_15] : memref<64x128xf32, #tpu.memory_space<vmem>>, vector<64x128xf32>
      %17 = arith.addf %15, %16 : vector<64x128xf32>
      %cst_16 = arith.constant 0.000000e+00 : f32
      %18 = vector.broadcast %cst_16 : f32 to vector<64x128xf32>
      %19 = arith.maximumf %17, %18 : vector<64x128xf32>
      %c0_17 = arith.constant 0 : index
      %c0_18 = arith.constant 0 : index
      %20 = vector.load %arg7[%c0_17, %c0_18] : memref<64x128xf32, #tpu.memory_space<vmem>>, vector<64x128xf32>
      tpu.vector_store %arg7[%c0_17, %c0_18], %19 {strides = array<i32>} : memref<64x128xf32, #tpu.memory_space<vmem>>, vector<64x128xf32>,
    } else {
    }
    return
  }
  func.func @transform_0(%arg0: i32, %arg1: i32, %arg2: i32) -> (i32, i32) {
    %c0_i32 = arith.constant 0 : i32
    return %arg0, %arg2 : i32, i32
  }
  func.func @transform_1(%arg0: i32, %arg1: i32, %arg2: i32) -> (i32, i32) {
    %c0_i32 = arith.constant 0 : i32
    return %arg2, %arg1 : i32, i32
  }
  func.func @transform_2(%arg0: i32, %arg1: i32, %arg2: i32) -> (i32, i32) {
    %c0_i32 = arith.constant 0 : i32
    %c0_i32_0 = arith.constant 0 : i32
    return %c0_i32, %arg1 : i32, i32
  }
  func.func @transform_3(%arg0: i32, %arg1: i32, %arg2: i32) -> (i32, i32) {
    %c0_i32 = arith.constant 0 : i32
    return %arg0, %arg1 : i32, i32
  }
  func.func @transform_4(%arg0: i32, %arg1: i32, %arg2: i32) -> (i32, i32) {
    %c0_i32 = arith.constant 0 : i32
    return %arg0, %arg1 : i32, i32
  }
}

module attributes {stable_mosaic.version = 11 : i64} {
  func.func @_matmul_kernel(%arg0: i32, %arg1: i32, %arg2: i32, %arg3: memref<64x128xbf16, #tpu.memory_space<vmem>>, %arg4: memref<128x128xbf16, #tpu.memory_space<vmem>>, %arg5: memref<1x128xf32, #tpu.memory_space<vmem>>, %arg6: memref<64x128xf32, #tpu.memory_space<vmem>>, %arg7: memref<64x128xf32, #tpu.memory_space<vmem>>) attributes {dimension_semantics = [#tpu.dimension_semantics<parallel>, #tpu.dimension_semantics<parallel>, #tpu.dimension_semantics<arbitrary>], iteration_bounds = array<i64: 1, 1, 1>, scalar_prefetch = 0 : i64, scratch_operands = 1 : i64, tpu.core_type = #tpu.core_type<tc>, window_params = [{transform_indices = @transform_0, window_bounds = array<i64: 64, 128>}, {transform_indices = @transform_1, window_bounds = array<i64: 128, 128>}, {transform_indices = @transform_2, window_bounds = array<i64: 1, 128>}, {transform_indices = @transform_3, window_bounds = array<i64: 64, 128>}]} {
    %c0_i32 = arith.constant 0 : i32
    %0 = arith.cmpi eq, %arg2, %c0_i32 : i32
    %1 = arith.extui %0 : i1 to i32
    %c0_i32_0 = arith.constant 0 : i32
    %2 = arith.cmpi ne, %1, %c0_i32_0 : i32
    scf.if %2 {
      %cst_10 = arith.constant 0.000000e+00 : f32
      %12 = vector.broadcast %cst_10 : f32 to vector<64x128xf32>
      %c0_11 = arith.constant 0 : index
      %c0_12 = arith.constant 0 : index
      %13 = vector.load %arg7[%c0_11, %c0_12] : memref<64x128xf32, #tpu.memory_space<vmem>>, vector<64x128xf32>
      tpu.vector_store %arg7[%c0_11, %c0_12], %12 {strides = array<i32>} : memref<64x128xf32, #tpu.memory_space<vmem>>, vector<64x128xf32>,
    } else {
    }
    %c0 = arith.constant 0 : index
    %c0_1 = arith.constant 0 : index
    %3 = vector.load %arg7[%c0, %c0_1] : memref<64x128xf32, #tpu.memory_space<vmem>>, vector<64x128xf32>
    %c0_2 = arith.constant 0 : index
    %c0_3 = arith.constant 0 : index
    %4 = vector.load %arg3[%c0_2, %c0_3] : memref<64x128xbf16, #tpu.memory_space<vmem>>, vector<64x128xbf16>
    %c0_4 = arith.constant 0 : index
    %c0_5 = arith.constant 0 : index
    %5 = vector.load %arg4[%c0_4, %c0_5] : memref<128x128xbf16, #tpu.memory_space<vmem>>, vector<128x128xbf16>
    %cst = arith.constant dense<0.000000e+00> : vector<64x128xf32>
    %6 = tpu.matmul %4, %5, %cst {dimension_numbers = #tpu.dot_dimension_numbers<[1], [0], [0], [1], [0, 0, 1, 1], [], []>} : vector<64x128xbf16>, vector<128x128xbf16>, vector<64x128xf32> -> vector<64x128xf32>
    %7 = arith.addf %3, %6 : vector<64x128xf32>
    %c0_6 = arith.constant 0 : index
    %c0_7 = arith.constant 0 : index
    %8 = vector.load %arg7[%c0_6, %c0_7] : memref<64x128xf32, #tpu.memory_space<vmem>>, vector<64x128xf32>
    tpu.vector_store %arg7[%c0_6, %c0_7], %7 {strides = array<i32>} : memref<64x128xf32, #tpu.memory_space<vmem>>, vector<64x128xf32>,
    %c0_i32_8 = arith.constant 0 : i32
    %9 = arith.cmpi eq, %arg2, %c0_i32_8 : i32
    %10 = arith.extui %9 : i1 to i32
    %c0_i32_9 = arith.constant 0 : i32
    %11 = arith.cmpi ne, %10, %c0_i32_9 : i32
    scf.if %11 {
      %c0_10 = arith.constant 0 : index
      %c0_11 = arith.constant 0 : index
      %12 = vector.load %arg7[%c0_10, %c0_11] : memref<64x128xf32, #tpu.memory_space<vmem>>, vector<64x128xf32>
      %c0_12 = arith.constant 0 : index
      %c0_13 = arith.constant 0 : index
      %13 = vector.load %arg5[%c0_12, %c0_13] : memref<1x128xf32, #tpu.memory_space<vmem>>, vector<1x128xf32>
      %14 = vector.broadcast %13 : vector<1x128xf32> to vector<64x128xf32>
      %15 = arith.addf %12, %14 : vector<64x128xf32>
      %cst_14 = arith.constant 0.000000e+00 : f32
      %16 = vector.broadcast %cst_14 : f32 to vector<64x128xf32>
      %17 = arith.maximumf %15, %16 : vector<64x128xf32>
      %c0_15 = arith.constant 0 : index
      %c0_16 = arith.constant 0 : index
      %18 = vector.load %arg6[%c0_15, %c0_16] : memref<64x128xf32, #tpu.memory_space<vmem>>, vector<64x128xf32>
      tpu.vector_store %arg6[%c0_15, %c0_16], %17 {strides = array<i32>} : memref<64x128xf32, #tpu.memory_space<vmem>>, vector<64x128xf32>,
    } else {
    }
    return
  }
  func.func @transform_0(%arg0: i32, %arg1: i32, %arg2: i32) -> (i32, i32) {
    %c0_i32 = arith.constant 0 : i32
    return %arg0, %arg2 : i32, i32
  }
  func.func @transform_1(%arg0: i32, %arg1: i32, %arg2: i32) -> (i32, i32) {
    %c0_i32 = arith.constant 0 : i32
    return %arg2, %arg1 : i32, i32
  }
  func.func @transform_2(%arg0: i32, %arg1: i32, %arg2: i32) -> (i32, i32) {
    %c0_i32 = arith.constant 0 : i32
    %c0_i32_0 = arith.constant 0 : i32
    return %c0_i32, %arg1 : i32, i32
  }
  func.func @transform_3(%arg0: i32, %arg1: i32, %arg2: i32) -> (i32, i32) {
    %c0_i32 = arith.constant 0 : i32
    return %arg0, %arg1 : i32, i32
  }
}

module attributes {stable_mosaic.version = 11 : i64} {
  func.func @_matmul_kernel(%arg0: i32, %arg1: i32, %arg2: i32, %arg3: memref<16x384xbf16, #tpu.memory_space<vmem>>, %arg4: memref<384x128xbf16, #tpu.memory_space<vmem>>, %arg5: memref<1x128xf32, #tpu.memory_space<vmem>>, %arg6: memref<16x128xf32, #tpu.memory_space<vmem>>, %arg7: memref<16x128xf32, #tpu.memory_space<vmem>>) attributes {dimension_semantics = [#tpu.dimension_semantics<parallel>, #tpu.dimension_semantics<parallel>, #tpu.dimension_semantics<arbitrary>], iteration_bounds = array<i64: 1, 1, 1>, scalar_prefetch = 0 : i64, scratch_operands = 1 : i64, tpu.core_type = #tpu.core_type<tc>, window_params = [{transform_indices = @transform_0, window_bounds = array<i64: 16, 384>}, {transform_indices = @transform_1, window_bounds = array<i64: 384, 128>}, {transform_indices = @transform_2, window_bounds = array<i64: 1, 128>}, {transform_indices = @transform_3, window_bounds = array<i64: 16, 128>}]} {
    %c0_i32 = arith.constant 0 : i32
    %0 = arith.cmpi eq, %arg2, %c0_i32 : i32
    %1 = arith.extui %0 : i1 to i32
    %c0_i32_0 = arith.constant 0 : i32
    %2 = arith.cmpi ne, %1, %c0_i32_0 : i32
    scf.if %2 {
      %cst_10 = arith.constant 0.000000e+00 : f32
      %12 = vector.broadcast %cst_10 : f32 to vector<16x128xf32>
      %c0_11 = arith.constant 0 : index
      %c0_12 = arith.constant 0 : index
      %13 = vector.load %arg7[%c0_11, %c0_12] : memref<16x128xf32, #tpu.memory_space<vmem>>, vector<16x128xf32>
      tpu.vector_store %arg7[%c0_11, %c0_12], %12 {strides = array<i32>} : memref<16x128xf32, #tpu.memory_space<vmem>>, vector<16x128xf32>,
    } else {
    }
    %c0 = arith.constant 0 : index
    %c0_1 = arith.constant 0 : index
    %3 = vector.load %arg7[%c0, %c0_1] : memref<16x128xf32, #tpu.memory_space<vmem>>, vector<16x128xf32>
    %c0_2 = arith.constant 0 : index
    %c0_3 = arith.constant 0 : index
    %4 = vector.load %arg3[%c0_2, %c0_3] : memref<16x384xbf16, #tpu.memory_space<vmem>>, vector<16x384xbf16>
    %c0_4 = arith.constant 0 : index
    %c0_5 = arith.constant 0 : index
    %5 = vector.load %arg4[%c0_4, %c0_5] : memref<384x128xbf16, #tpu.memory_space<vmem>>, vector<384x128xbf16>
    %cst = arith.constant dense<0.000000e+00> : vector<16x128xf32>
    %6 = tpu.matmul %4, %5, %cst {dimension_numbers = #tpu.dot_dimension_numbers<[1], [0], [0], [1], [0, 0, 1, 1], [], []>} : vector<16x384xbf16>, vector<384x128xbf16>, vector<16x128xf32> -> vector<16x128xf32>
    %7 = arith.addf %3, %6 : vector<16x128xf32>
    %c0_6 = arith.constant 0 : index
    %c0_7 = arith.constant 0 : index
    %8 = vector.load %arg7[%c0_6, %c0_7] : memref<16x128xf32, #tpu.memory_space<vmem>>, vector<16x128xf32>
    tpu.vector_store %arg7[%c0_6, %c0_7], %7 {strides = array<i32>} : memref<16x128xf32, #tpu.memory_space<vmem>>, vector<16x128xf32>,
    %c0_i32_8 = arith.constant 0 : i32
    %9 = arith.cmpi eq, %arg2, %c0_i32_8 : i32
    %10 = arith.extui %9 : i1 to i32
    %c0_i32_9 = arith.constant 0 : i32
    %11 = arith.cmpi ne, %10, %c0_i32_9 : i32
    scf.if %11 {
      %c0_10 = arith.constant 0 : index
      %c0_11 = arith.constant 0 : index
      %12 = vector.load %arg7[%c0_10, %c0_11] : memref<16x128xf32, #tpu.memory_space<vmem>>, vector<16x128xf32>
      %c0_12 = arith.constant 0 : index
      %c0_13 = arith.constant 0 : index
      %13 = vector.load %arg5[%c0_12, %c0_13] : memref<1x128xf32, #tpu.memory_space<vmem>>, vector<1x128xf32>
      %14 = vector.broadcast %13 : vector<1x128xf32> to vector<16x128xf32>
      %15 = arith.addf %12, %14 : vector<16x128xf32>
      %cst_14 = arith.constant 0.000000e+00 : f32
      %16 = vector.broadcast %cst_14 : f32 to vector<16x128xf32>
      %17 = arith.maximumf %15, %16 : vector<16x128xf32>
      %c0_15 = arith.constant 0 : index
      %c0_16 = arith.constant 0 : index
      %18 = vector.load %arg6[%c0_15, %c0_16] : memref<16x128xf32, #tpu.memory_space<vmem>>, vector<16x128xf32>
      tpu.vector_store %arg6[%c0_15, %c0_16], %17 {strides = array<i32>} : memref<16x128xf32, #tpu.memory_space<vmem>>, vector<16x128xf32>,
    } else {
    }
    return
  }
  func.func @transform_0(%arg0: i32, %arg1: i32, %arg2: i32) -> (i32, i32) {
    %c0_i32 = arith.constant 0 : i32
    return %arg0, %arg2 : i32, i32
  }
  func.func @transform_1(%arg0: i32, %arg1: i32, %arg2: i32) -> (i32, i32) {
    %c0_i32 = arith.constant 0 : i32
    return %arg2, %arg1 : i32, i32
  }
  func.func @transform_2(%arg0: i32, %arg1: i32, %arg2: i32) -> (i32, i32) {
    %c0_i32 = arith.constant 0 : i32
    %c0_i32_0 = arith.constant 0 : i32
    return %c0_i32, %arg1 : i32, i32
  }
  func.func @transform_3(%arg0: i32, %arg1: i32, %arg2: i32) -> (i32, i32) {
    %c0_i32 = arith.constant 0 : i32
    return %arg0, %arg1 : i32, i32
  }
}

module attributes {stable_mosaic.version = 11 : i64} {
  func.func @_matmul_kernel(%arg0: i32, %arg1: i32, %arg2: i32, %arg3: memref<16x128xbf16, #tpu.memory_space<vmem>>, %arg4: memref<128x128xbf16, #tpu.memory_space<vmem>>, %arg5: memref<1x128xf32, #tpu.memory_space<vmem>>, %arg6: memref<16x128xf32, #tpu.memory_space<vmem>>, %arg7: memref<16x128xf32, #tpu.memory_space<vmem>>) attributes {dimension_semantics = [#tpu.dimension_semantics<parallel>, #tpu.dimension_semantics<parallel>, #tpu.dimension_semantics<arbitrary>], iteration_bounds = array<i64: 1, 1, 1>, scalar_prefetch = 0 : i64, scratch_operands = 1 : i64, tpu.core_type = #tpu.core_type<tc>, window_params = [{transform_indices = @transform_0, window_bounds = array<i64: 16, 128>}, {transform_indices = @transform_1, window_bounds = array<i64: 128, 128>}, {transform_indices = @transform_2, window_bounds = array<i64: 1, 128>}, {transform_indices = @transform_3, window_bounds = array<i64: 16, 128>}]} {
    %c0_i32 = arith.constant 0 : i32
    %0 = arith.cmpi eq, %arg2, %c0_i32 : i32
    %1 = arith.extui %0 : i1 to i32
    %c0_i32_0 = arith.constant 0 : i32
    %2 = arith.cmpi ne, %1, %c0_i32_0 : i32
    scf.if %2 {
      %cst_10 = arith.constant 0.000000e+00 : f32
      %12 = vector.broadcast %cst_10 : f32 to vector<16x128xf32>
      %c0_11 = arith.constant 0 : index
      %c0_12 = arith.constant 0 : index
      %13 = vector.load %arg7[%c0_11, %c0_12] : memref<16x128xf32, #tpu.memory_space<vmem>>, vector<16x128xf32>
      tpu.vector_store %arg7[%c0_11, %c0_12], %12 {strides = array<i32>} : memref<16x128xf32, #tpu.memory_space<vmem>>, vector<16x128xf32>,
    } else {
    }
    %c0 = arith.constant 0 : index
    %c0_1 = arith.constant 0 : index
    %3 = vector.load %arg7[%c0, %c0_1] : memref<16x128xf32, #tpu.memory_space<vmem>>, vector<16x128xf32>
    %c0_2 = arith.constant 0 : index
    %c0_3 = arith.constant 0 : index
    %4 = vector.load %arg3[%c0_2, %c0_3] : memref<16x128xbf16, #tpu.memory_space<vmem>>, vector<16x128xbf16>
    %c0_4 = arith.constant 0 : index
    %c0_5 = arith.constant 0 : index
    %5 = vector.load %arg4[%c0_4, %c0_5] : memref<128x128xbf16, #tpu.memory_space<vmem>>, vector<128x128xbf16>
    %cst = arith.constant dense<0.000000e+00> : vector<16x128xf32>
    %6 = tpu.matmul %4, %5, %cst {dimension_numbers = #tpu.dot_dimension_numbers<[1], [0], [0], [1], [0, 0, 1, 1], [], []>} : vector<16x128xbf16>, vector<128x128xbf16>, vector<16x128xf32> -> vector<16x128xf32>
    %7 = arith.addf %3, %6 : vector<16x128xf32>
    %c0_6 = arith.constant 0 : index
    %c0_7 = arith.constant 0 : index
    %8 = vector.load %arg7[%c0_6, %c0_7] : memref<16x128xf32, #tpu.memory_space<vmem>>, vector<16x128xf32>
    tpu.vector_store %arg7[%c0_6, %c0_7], %7 {strides = array<i32>} : memref<16x128xf32, #tpu.memory_space<vmem>>, vector<16x128xf32>,
    %c0_i32_8 = arith.constant 0 : i32
    %9 = arith.cmpi eq, %arg2, %c0_i32_8 : i32
    %10 = arith.extui %9 : i1 to i32
    %c0_i32_9 = arith.constant 0 : i32
    %11 = arith.cmpi ne, %10, %c0_i32_9 : i32
    scf.if %11 {
      %c0_10 = arith.constant 0 : index
      %c0_11 = arith.constant 0 : index
      %12 = vector.load %arg7[%c0_10, %c0_11] : memref<16x128xf32, #tpu.memory_space<vmem>>, vector<16x128xf32>
      %c0_12 = arith.constant 0 : index
      %c0_13 = arith.constant 0 : index
      %13 = vector.load %arg5[%c0_12, %c0_13] : memref<1x128xf32, #tpu.memory_space<vmem>>, vector<1x128xf32>
      %14 = vector.broadcast %13 : vector<1x128xf32> to vector<16x128xf32>
      %15 = arith.addf %12, %14 : vector<16x128xf32>
      %c0_14 = arith.constant 0 : index
      %c0_15 = arith.constant 0 : index
      %16 = vector.load %arg6[%c0_14, %c0_15] : memref<16x128xf32, #tpu.memory_space<vmem>>, vector<16x128xf32>
      tpu.vector_store %arg6[%c0_14, %c0_15], %15 {strides = array<i32>} : memref<16x128xf32, #tpu.memory_space<vmem>>, vector<16x128xf32>,
    } else {
    }
    return
  }
  func.func @transform_0(%arg0: i32, %arg1: i32, %arg2: i32) -> (i32, i32) {
    %c0_i32 = arith.constant 0 : i32
    return %arg0, %arg2 : i32, i32
  }
  func.func @transform_1(%arg0: i32, %arg1: i32, %arg2: i32) -> (i32, i32) {
    %c0_i32 = arith.constant 0 : i32
    return %arg2, %arg1 : i32, i32
  }
  func.func @transform_2(%arg0: i32, %arg1: i32, %arg2: i32) -> (i32, i32) {
    %c0_i32 = arith.constant 0 : i32
    %c0_i32_0 = arith.constant 0 : i32
    return %c0_i32, %arg1 : i32, i32
  }
  func.func @transform_3(%arg0: i32, %arg1: i32, %arg2: i32) -> (i32, i32) {
    %c0_i32 = arith.constant 0 : i32
    return %arg0, %arg1 : i32, i32
  }
}

module attributes {stable_mosaic.version = 11 : i64} {
  func.func @_matmul_kernel(%arg0: i32, %arg1: i32, %arg2: i32, %arg3: memref<16x128xbf16, #tpu.memory_space<vmem>>, %arg4: memref<128x128xbf16, #tpu.memory_space<vmem>>, %arg5: memref<1x128xf32, #tpu.memory_space<vmem>>, %arg6: memref<16x128xf32, #tpu.memory_space<vmem>>, %arg7: memref<16x128xf32, #tpu.memory_space<vmem>>, %arg8: memref<16x128xf32, #tpu.memory_space<vmem>>) attributes {dimension_semantics = [#tpu.dimension_semantics<parallel>, #tpu.dimension_semantics<parallel>, #tpu.dimension_semantics<arbitrary>], iteration_bounds = array<i64: 1, 1, 1>, scalar_prefetch = 0 : i64, scratch_operands = 1 : i64, tpu.core_type = #tpu.core_type<tc>, window_params = [{transform_indices = @transform_0, window_bounds = array<i64: 16, 128>}, {transform_indices = @transform_1, window_bounds = array<i64: 128, 128>}, {transform_indices = @transform_2, window_bounds = array<i64: 1, 128>}, {transform_indices = @transform_3, window_bounds = array<i64: 16, 128>}, {transform_indices = @transform_4, window_bounds = array<i64: 16, 128>}]} {
    %c0_i32 = arith.constant 0 : i32
    %0 = arith.cmpi eq, %arg2, %c0_i32 : i32
    %1 = arith.extui %0 : i1 to i32
    %c0_i32_0 = arith.constant 0 : i32
    %2 = arith.cmpi ne, %1, %c0_i32_0 : i32
    scf.if %2 {
      %cst_10 = arith.constant 0.000000e+00 : f32
      %12 = vector.broadcast %cst_10 : f32 to vector<16x128xf32>
      %c0_11 = arith.constant 0 : index
      %c0_12 = arith.constant 0 : index
      %13 = vector.load %arg8[%c0_11, %c0_12] : memref<16x128xf32, #tpu.memory_space<vmem>>, vector<16x128xf32>
      tpu.vector_store %arg8[%c0_11, %c0_12], %12 {strides = array<i32>} : memref<16x128xf32, #tpu.memory_space<vmem>>, vector<16x128xf32>,
    } else {
    }
    %c0 = arith.constant 0 : index
    %c0_1 = arith.constant 0 : index
    %3 = vector.load %arg8[%c0, %c0_1] : memref<16x128xf32, #tpu.memory_space<vmem>>, vector<16x128xf32>
    %c0_2 = arith.constant 0 : index
    %c0_3 = arith.constant 0 : index
    %4 = vector.load %arg3[%c0_2, %c0_3] : memref<16x128xbf16, #tpu.memory_space<vmem>>, vector<16x128xbf16>
    %c0_4 = arith.constant 0 : index
    %c0_5 = arith.constant 0 : index
    %5 = vector.load %arg4[%c0_4, %c0_5] : memref<128x128xbf16, #tpu.memory_space<vmem>>, vector<128x128xbf16>
    %cst = arith.constant dense<0.000000e+00> : vector<16x128xf32>
    %6 = tpu.matmul %4, %5, %cst {dimension_numbers = #tpu.dot_dimension_numbers<[1], [0], [0], [1], [0, 0, 1, 1], [], []>} : vector<16x128xbf16>, vector<128x128xbf16>, vector<16x128xf32> -> vector<16x128xf32>
    %7 = arith.addf %3, %6 : vector<16x128xf32>
    %c0_6 = arith.constant 0 : index
    %c0_7 = arith.constant 0 : index
    %8 = vector.load %arg8[%c0_6, %c0_7] : memref<16x128xf32, #tpu.memory_space<vmem>>, vector<16x128xf32>
    tpu.vector_store %arg8[%c0_6, %c0_7], %7 {strides = array<i32>} : memref<16x128xf32, #tpu.memory_space<vmem>>, vector<16x128xf32>,
    %c0_i32_8 = arith.constant 0 : i32
    %9 = arith.cmpi eq, %arg2, %c0_i32_8 : i32
    %10 = arith.extui %9 : i1 to i32
    %c0_i32_9 = arith.constant 0 : i32
    %11 = arith.cmpi ne, %10, %c0_i32_9 : i32
    scf.if %11 {
      %c0_10 = arith.constant 0 : index
      %c0_11 = arith.constant 0 : index
      %12 = vector.load %arg8[%c0_10, %c0_11] : memref<16x128xf32, #tpu.memory_space<vmem>>, vector<16x128xf32>
      %c0_12 = arith.constant 0 : index
      %c0_13 = arith.constant 0 : index
      %13 = vector.load %arg5[%c0_12, %c0_13] : memref<1x128xf32, #tpu.memory_space<vmem>>, vector<1x128xf32>
      %14 = vector.broadcast %13 : vector<1x128xf32> to vector<16x128xf32>
      %15 = arith.addf %12, %14 : vector<16x128xf32>
      %c0_14 = arith.constant 0 : index
      %c0_15 = arith.constant 0 : index
      %16 = vector.load %arg6[%c0_14, %c0_15] : memref<16x128xf32, #tpu.memory_space<vmem>>, vector<16x128xf32>
      %17 = arith.addf %15, %16 : vector<16x128xf32>
      %cst_16 = arith.constant 0.000000e+00 : f32
      %18 = vector.broadcast %cst_16 : f32 to vector<16x128xf32>
      %19 = arith.maximumf %17, %18 : vector<16x128xf32>
      %c0_17 = arith.constant 0 : index
      %c0_18 = arith.constant 0 : index
      %20 = vector.load %arg7[%c0_17, %c0_18] : memref<16x128xf32, #tpu.memory_space<vmem>>, vector<16x128xf32>
      tpu.vector_store %arg7[%c0_17, %c0_18], %19 {strides = array<i32>} : memref<16x128xf32, #tpu.memory_space<vmem>>, vector<16x128xf32>,
    } else {
    }
    return
  }
  func.func @transform_0(%arg0: i32, %arg1: i32, %arg2: i32) -> (i32, i32) {
    %c0_i32 = arith.constant 0 : i32
    return %arg0, %arg2 : i32, i32
  }
  func.func @transform_1(%arg0: i32, %arg1: i32, %arg2: i32) -> (i32, i32) {
    %c0_i32 = arith.constant 0 : i32
    return %arg2, %arg1 : i32, i32
  }
  func.func @transform_2(%arg0: i32, %arg1: i32, %arg2: i32) -> (i32, i32) {
    %c0_i32 = arith.constant 0 : i32
    %c0_i32_0 = arith.constant 0 : i32
    return %c0_i32, %arg1 : i32, i32
  }
  func.func @transform_3(%arg0: i32, %arg1: i32, %arg2: i32) -> (i32, i32) {
    %c0_i32 = arith.constant 0 : i32
    return %arg0, %arg1 : i32, i32
  }
  func.func @transform_4(%arg0: i32, %arg1: i32, %arg2: i32) -> (i32, i32) {
    %c0_i32 = arith.constant 0 : i32
    return %arg0, %arg1 : i32, i32
  }
}

module attributes {stable_mosaic.version = 11 : i64} {
  func.func @_matmul_kernel(%arg0: i32, %arg1: i32, %arg2: i32, %arg3: memref<16x128xf32, #tpu.memory_space<vmem>>, %arg4: memref<128x128xbf16, #tpu.memory_space<vmem>>, %arg5: memref<1x128xf32, #tpu.memory_space<vmem>>, %arg6: memref<16x128xf32, #tpu.memory_space<vmem>>, %arg7: memref<16x128xf32, #tpu.memory_space<vmem>>) attributes {dimension_semantics = [#tpu.dimension_semantics<parallel>, #tpu.dimension_semantics<parallel>, #tpu.dimension_semantics<arbitrary>], iteration_bounds = array<i64: 1, 1, 1>, scalar_prefetch = 0 : i64, scratch_operands = 1 : i64, tpu.core_type = #tpu.core_type<tc>, window_params = [{transform_indices = @transform_0, window_bounds = array<i64: 16, 128>}, {transform_indices = @transform_1, window_bounds = array<i64: 128, 128>}, {transform_indices = @transform_2, window_bounds = array<i64: 1, 128>}, {transform_indices = @transform_3, window_bounds = array<i64: 16, 128>}]} {
    %c0_i32 = arith.constant 0 : i32
    %0 = arith.cmpi eq, %arg2, %c0_i32 : i32
    %1 = arith.extui %0 : i1 to i32
    %c0_i32_0 = arith.constant 0 : i32
    %2 = arith.cmpi ne, %1, %c0_i32_0 : i32
    scf.if %2 {
      %cst_10 = arith.constant 0.000000e+00 : f32
      %13 = vector.broadcast %cst_10 : f32 to vector<16x128xf32>
      %c0_11 = arith.constant 0 : index
      %c0_12 = arith.constant 0 : index
      %14 = vector.load %arg7[%c0_11, %c0_12] : memref<16x128xf32, #tpu.memory_space<vmem>>, vector<16x128xf32>
      tpu.vector_store %arg7[%c0_11, %c0_12], %13 {strides = array<i32>} : memref<16x128xf32, #tpu.memory_space<vmem>>, vector<16x128xf32>,
    } else {
    }
    %c0 = arith.constant 0 : index
    %c0_1 = arith.constant 0 : index
    %3 = vector.load %arg7[%c0, %c0_1] : memref<16x128xf32, #tpu.memory_space<vmem>>, vector<16x128xf32>
    %c0_2 = arith.constant 0 : index
    %c0_3 = arith.constant 0 : index
    %4 = vector.load %arg3[%c0_2, %c0_3] : memref<16x128xf32, #tpu.memory_space<vmem>>, vector<16x128xf32>
    %5 = arith.truncf %4 : vector<16x128xf32> to vector<16x128xbf16>
    %c0_4 = arith.constant 0 : index
    %c0_5 = arith.constant 0 : index
    %6 = vector.load %arg4[%c0_4, %c0_5] : memref<128x128xbf16, #tpu.memory_space<vmem>>, vector<128x128xbf16>
    %cst = arith.constant dense<0.000000e+00> : vector<16x128xf32>
    %7 = tpu.matmul %5, %6, %cst {dimension_numbers = #tpu.dot_dimension_numbers<[1], [0], [0], [1], [0, 0, 1, 1], [], []>} : vector<16x128xbf16>, vector<128x128xbf16>, vector<16x128xf32> -> vector<16x128xf32>
    %8 = arith.addf %3, %7 : vector<16x128xf32>
    %c0_6 = arith.constant 0 : index
    %c0_7 = arith.constant 0 : index
    %9 = vector.load %arg7[%c0_6, %c0_7] : memref<16x128xf32, #tpu.memory_space<vmem>>, vector<16x128xf32>
    tpu.vector_store %arg7[%c0_6, %c0_7], %8 {strides = array<i32>} : memref<16x128xf32, #tpu.memory_space<vmem>>, vector<16x128xf32>,
    %c0_i32_8 = arith.constant 0 : i32
    %10 = arith.cmpi eq, %arg2, %c0_i32_8 : i32
    %11 = arith.extui %10 : i1 to i32
    %c0_i32_9 = arith.constant 0 : i32
    %12 = arith.cmpi ne, %11, %c0_i32_9 : i32
    scf.if %12 {
      %c0_10 = arith.constant 0 : index
      %c0_11 = arith.constant 0 : index
      %13 = vector.load %arg7[%c0_10, %c0_11] : memref<16x128xf32, #tpu.memory_space<vmem>>, vector<16x128xf32>
      %c0_12 = arith.constant 0 : index
      %c0_13 = arith.constant 0 : index
      %14 = vector.load %arg5[%c0_12, %c0_13] : memref<1x128xf32, #tpu.memory_space<vmem>>, vector<1x128xf32>
      %15 = vector.broadcast %14 : vector<1x128xf32> to vector<16x128xf32>
      %16 = arith.addf %13, %15 : vector<16x128xf32>
      %cst_14 = arith.constant 0.000000e+00 : f32
      %17 = vector.broadcast %cst_14 : f32 to vector<16x128xf32>
      %18 = arith.maximumf %16, %17 : vector<16x128xf32>
      %c0_15 = arith.constant 0 : index
      %c0_16 = arith.constant 0 : index
      %19 = vector.load %arg6[%c0_15, %c0_16] : memref<16x128xf32, #tpu.memory_space<vmem>>, vector<16x128xf32>
      tpu.vector_store %arg6[%c0_15, %c0_16], %18 {strides = array<i32>} : memref<16x128xf32, #tpu.memory_space<vmem>>, vector<16x128xf32>,
    } else {
    }
    return
  }
  func.func @transform_0(%arg0: i32, %arg1: i32, %arg2: i32) -> (i32, i32) {
    %c0_i32 = arith.constant 0 : i32
    return %arg0, %arg2 : i32, i32
  }
  func.func @transform_1(%arg0: i32, %arg1: i32, %arg2: i32) -> (i32, i32) {
    %c0_i32 = arith.constant 0 : i32
    return %arg2, %arg1 : i32, i32
  }
  func.func @transform_2(%arg0: i32, %arg1: i32, %arg2: i32) -> (i32, i32) {
    %c0_i32 = arith.constant 0 : i32
    %c0_i32_0 = arith.constant 0 : i32
    return %c0_i32, %arg1 : i32, i32
  }
  func.func @transform_3(%arg0: i32, %arg1: i32, %arg2: i32) -> (i32, i32) {
    %c0_i32 = arith.constant 0 : i32
    return %arg0, %arg1 : i32, i32
  }
}

module attributes {stable_mosaic.version = 11 : i64} {
  func.func @_matmul_kernel(%arg0: i32, %arg1: i32, %arg2: i32, %arg3: memref<16x640xbf16, #tpu.memory_space<vmem>>, %arg4: memref<640x128xbf16, #tpu.memory_space<vmem>>, %arg5: memref<1x128xf32, #tpu.memory_space<vmem>>, %arg6: memref<16x128xf32, #tpu.memory_space<vmem>>, %arg7: memref<16x128xf32, #tpu.memory_space<vmem>>) attributes {dimension_semantics = [#tpu.dimension_semantics<parallel>, #tpu.dimension_semantics<parallel>, #tpu.dimension_semantics<arbitrary>], iteration_bounds = array<i64: 1, 1, 1>, scalar_prefetch = 0 : i64, scratch_operands = 1 : i64, tpu.core_type = #tpu.core_type<tc>, window_params = [{transform_indices = @transform_0, window_bounds = array<i64: 16, 640>}, {transform_indices = @transform_1, window_bounds = array<i64: 640, 128>}, {transform_indices = @transform_2, window_bounds = array<i64: 1, 128>}, {transform_indices = @transform_3, window_bounds = array<i64: 16, 128>}]} {
    %c0_i32 = arith.constant 0 : i32
    %0 = arith.cmpi eq, %arg2, %c0_i32 : i32
    %1 = arith.extui %0 : i1 to i32
    %c0_i32_0 = arith.constant 0 : i32
    %2 = arith.cmpi ne, %1, %c0_i32_0 : i32
    scf.if %2 {
      %cst_10 = arith.constant 0.000000e+00 : f32
      %12 = vector.broadcast %cst_10 : f32 to vector<16x128xf32>
      %c0_11 = arith.constant 0 : index
      %c0_12 = arith.constant 0 : index
      %13 = vector.load %arg7[%c0_11, %c0_12] : memref<16x128xf32, #tpu.memory_space<vmem>>, vector<16x128xf32>
      tpu.vector_store %arg7[%c0_11, %c0_12], %12 {strides = array<i32>} : memref<16x128xf32, #tpu.memory_space<vmem>>, vector<16x128xf32>,
    } else {
    }
    %c0 = arith.constant 0 : index
    %c0_1 = arith.constant 0 : index
    %3 = vector.load %arg7[%c0, %c0_1] : memref<16x128xf32, #tpu.memory_space<vmem>>, vector<16x128xf32>
    %c0_2 = arith.constant 0 : index
    %c0_3 = arith.constant 0 : index
    %4 = vector.load %arg3[%c0_2, %c0_3] : memref<16x640xbf16, #tpu.memory_space<vmem>>, vector<16x640xbf16>
    %c0_4 = arith.constant 0 : index
    %c0_5 = arith.constant 0 : index
    %5 = vector.load %arg4[%c0_4, %c0_5] : memref<640x128xbf16, #tpu.memory_space<vmem>>, vector<640x128xbf16>
    %cst = arith.constant dense<0.000000e+00> : vector<16x128xf32>
    %6 = tpu.matmul %4, %5, %cst {dimension_numbers = #tpu.dot_dimension_numbers<[1], [0], [0], [1], [0, 0, 1, 1], [], []>} : vector<16x640xbf16>, vector<640x128xbf16>, vector<16x128xf32> -> vector<16x128xf32>
    %7 = arith.addf %3, %6 : vector<16x128xf32>
    %c0_6 = arith.constant 0 : index
    %c0_7 = arith.constant 0 : index
    %8 = vector.load %arg7[%c0_6, %c0_7] : memref<16x128xf32, #tpu.memory_space<vmem>>, vector<16x128xf32>
    tpu.vector_store %arg7[%c0_6, %c0_7], %7 {strides = array<i32>} : memref<16x128xf32, #tpu.memory_space<vmem>>, vector<16x128xf32>,
    %c0_i32_8 = arith.constant 0 : i32
    %9 = arith.cmpi eq, %arg2, %c0_i32_8 : i32
    %10 = arith.extui %9 : i1 to i32
    %c0_i32_9 = arith.constant 0 : i32
    %11 = arith.cmpi ne, %10, %c0_i32_9 : i32
    scf.if %11 {
      %c0_10 = arith.constant 0 : index
      %c0_11 = arith.constant 0 : index
      %12 = vector.load %arg7[%c0_10, %c0_11] : memref<16x128xf32, #tpu.memory_space<vmem>>, vector<16x128xf32>
      %c0_12 = arith.constant 0 : index
      %c0_13 = arith.constant 0 : index
      %13 = vector.load %arg5[%c0_12, %c0_13] : memref<1x128xf32, #tpu.memory_space<vmem>>, vector<1x128xf32>
      %14 = vector.broadcast %13 : vector<1x128xf32> to vector<16x128xf32>
      %15 = arith.addf %12, %14 : vector<16x128xf32>
      %cst_14 = arith.constant 0.000000e+00 : f32
      %16 = vector.broadcast %cst_14 : f32 to vector<16x128xf32>
      %17 = arith.maximumf %15, %16 : vector<16x128xf32>
      %c0_15 = arith.constant 0 : index
      %c0_16 = arith.constant 0 : index
      %18 = vector.load %arg6[%c0_15, %c0_16] : memref<16x128xf32, #tpu.memory_space<vmem>>, vector<16x128xf32>
      tpu.vector_store %arg6[%c0_15, %c0_16], %17 {strides = array<i32>} : memref<16x128xf32, #tpu.memory_space<vmem>>, vector<16x128xf32>,
    } else {
    }
    return
  }
  func.func @transform_0(%arg0: i32, %arg1: i32, %arg2: i32) -> (i32, i32) {
    %c0_i32 = arith.constant 0 : i32
    return %arg0, %arg2 : i32, i32
  }
  func.func @transform_1(%arg0: i32, %arg1: i32, %arg2: i32) -> (i32, i32) {
    %c0_i32 = arith.constant 0 : i32
    return %arg2, %arg1 : i32, i32
  }
  func.func @transform_2(%arg0: i32, %arg1: i32, %arg2: i32) -> (i32, i32) {
    %c0_i32 = arith.constant 0 : i32
    %c0_i32_0 = arith.constant 0 : i32
    return %c0_i32, %arg1 : i32, i32
  }
  func.func @transform_3(%arg0: i32, %arg1: i32, %arg2: i32) -> (i32, i32) {
    %c0_i32 = arith.constant 0 : i32
    return %arg0, %arg1 : i32, i32
  }
}

module attributes {stable_mosaic.version = 11 : i64} {
  func.func @_matmul_kernel(%arg0: i32, %arg1: i32, %arg2: i32, %arg3: memref<16x128xbf16, #tpu.memory_space<vmem>>, %arg4: memref<128x128xbf16, #tpu.memory_space<vmem>>, %arg5: memref<1x128xf32, #tpu.memory_space<vmem>>, %arg6: memref<16x128xf32, #tpu.memory_space<vmem>>, %arg7: memref<16x128xf32, #tpu.memory_space<vmem>>) attributes {dimension_semantics = [#tpu.dimension_semantics<parallel>, #tpu.dimension_semantics<parallel>, #tpu.dimension_semantics<arbitrary>], iteration_bounds = array<i64: 1, 2, 1>, scalar_prefetch = 0 : i64, scratch_operands = 1 : i64, tpu.core_type = #tpu.core_type<tc>, window_params = [{transform_indices = @transform_0, window_bounds = array<i64: 16, 128>}, {transform_indices = @transform_1, window_bounds = array<i64: 128, 128>}, {transform_indices = @transform_2, window_bounds = array<i64: 1, 128>}, {transform_indices = @transform_3, window_bounds = array<i64: 16, 128>}]} {
    %c0_i32 = arith.constant 0 : i32
    %0 = arith.cmpi eq, %arg2, %c0_i32 : i32
    %1 = arith.extui %0 : i1 to i32
    %c0_i32_0 = arith.constant 0 : i32
    %2 = arith.cmpi ne, %1, %c0_i32_0 : i32
    scf.if %2 {
      %cst_10 = arith.constant 0.000000e+00 : f32
      %12 = vector.broadcast %cst_10 : f32 to vector<16x128xf32>
      %c0_11 = arith.constant 0 : index
      %c0_12 = arith.constant 0 : index
      %13 = vector.load %arg7[%c0_11, %c0_12] : memref<16x128xf32, #tpu.memory_space<vmem>>, vector<16x128xf32>
      tpu.vector_store %arg7[%c0_11, %c0_12], %12 {strides = array<i32>} : memref<16x128xf32, #tpu.memory_space<vmem>>, vector<16x128xf32>,
    } else {
    }
    %c0 = arith.constant 0 : index
    %c0_1 = arith.constant 0 : index
    %3 = vector.load %arg7[%c0, %c0_1] : memref<16x128xf32, #tpu.memory_space<vmem>>, vector<16x128xf32>
    %c0_2 = arith.constant 0 : index
    %c0_3 = arith.constant 0 : index
    %4 = vector.load %arg3[%c0_2, %c0_3] : memref<16x128xbf16, #tpu.memory_space<vmem>>, vector<16x128xbf16>
    %c0_4 = arith.constant 0 : index
    %c0_5 = arith.constant 0 : index
    %5 = vector.load %arg4[%c0_4, %c0_5] : memref<128x128xbf16, #tpu.memory_space<vmem>>, vector<128x128xbf16>
    %cst = arith.constant dense<0.000000e+00> : vector<16x128xf32>
    %6 = tpu.matmul %4, %5, %cst {dimension_numbers = #tpu.dot_dimension_numbers<[1], [0], [0], [1], [0, 0, 1, 1], [], []>} : vector<16x128xbf16>, vector<128x128xbf16>, vector<16x128xf32> -> vector<16x128xf32>
    %7 = arith.addf %3, %6 : vector<16x128xf32>
    %c0_6 = arith.constant 0 : index
    %c0_7 = arith.constant 0 : index
    %8 = vector.load %arg7[%c0_6, %c0_7] : memref<16x128xf32, #tpu.memory_space<vmem>>, vector<16x128xf32>
    tpu.vector_store %arg7[%c0_6, %c0_7], %7 {strides = array<i32>} : memref<16x128xf32, #tpu.memory_space<vmem>>, vector<16x128xf32>,
    %c0_i32_8 = arith.constant 0 : i32
    %9 = arith.cmpi eq, %arg2, %c0_i32_8 : i32
    %10 = arith.extui %9 : i1 to i32
    %c0_i32_9 = arith.constant 0 : i32
    %11 = arith.cmpi ne, %10, %c0_i32_9 : i32
    scf.if %11 {
      %c0_10 = arith.constant 0 : index
      %c0_11 = arith.constant 0 : index
      %12 = vector.load %arg7[%c0_10, %c0_11] : memref<16x128xf32, #tpu.memory_space<vmem>>, vector<16x128xf32>
      %c0_12 = arith.constant 0 : index
      %c0_13 = arith.constant 0 : index
      %13 = vector.load %arg5[%c0_12, %c0_13] : memref<1x128xf32, #tpu.memory_space<vmem>>, vector<1x128xf32>
      %14 = vector.broadcast %13 : vector<1x128xf32> to vector<16x128xf32>
      %15 = arith.addf %12, %14 : vector<16x128xf32>
      %c0_14 = arith.constant 0 : index
      %c0_15 = arith.constant 0 : index
      %16 = vector.load %arg6[%c0_14, %c0_15] : memref<16x128xf32, #tpu.memory_space<vmem>>, vector<16x128xf32>
      tpu.vector_store %arg6[%c0_14, %c0_15], %15 {strides = array<i32>} : memref<16x128xf32, #tpu.memory_space<vmem>>, vector<16x128xf32>,
    } else {
    }
    return
  }
  func.func @transform_0(%arg0: i32, %arg1: i32, %arg2: i32) -> (i32, i32) {
    %c0_i32 = arith.constant 0 : i32
    return %arg0, %arg2 : i32, i32
  }
  func.func @transform_1(%arg0: i32, %arg1: i32, %arg2: i32) -> (i32, i32) {
    %c0_i32 = arith.constant 0 : i32
    return %arg2, %arg1 : i32, i32
  }
  func.func @transform_2(%arg0: i32, %arg1: i32, %arg2: i32) -> (i32, i32) {
    %c0_i32 = arith.constant 0 : i32
    %c0_i32_0 = arith.constant 0 : i32
    return %c0_i32, %arg1 : i32, i32
  }
  func.func @transform_3(%arg0: i32, %arg1: i32, %arg2: i32) -> (i32, i32) {
    %c0_i32 = arith.constant 0 : i32
    return %arg0, %arg1 : i32, i32
  }
}

module attributes {stable_mosaic.version = 11 : i64} {
  func.func @_matmul_kernel(%arg0: i32, %arg1: i32, %arg2: i32, %arg3: memref<16x128xbf16, #tpu.memory_space<vmem>>, %arg4: memref<128x128xbf16, #tpu.memory_space<vmem>>, %arg5: memref<1x128xf32, #tpu.memory_space<vmem>>, %arg6: memref<16x128xf32, #tpu.memory_space<vmem>>, %arg7: memref<16x128xf32, #tpu.memory_space<vmem>>, %arg8: memref<16x128xf32, #tpu.memory_space<vmem>>) attributes {dimension_semantics = [#tpu.dimension_semantics<parallel>, #tpu.dimension_semantics<parallel>, #tpu.dimension_semantics<arbitrary>], iteration_bounds = array<i64: 1, 2, 1>, scalar_prefetch = 0 : i64, scratch_operands = 1 : i64, tpu.core_type = #tpu.core_type<tc>, window_params = [{transform_indices = @transform_0, window_bounds = array<i64: 16, 128>}, {transform_indices = @transform_1, window_bounds = array<i64: 128, 128>}, {transform_indices = @transform_2, window_bounds = array<i64: 1, 128>}, {transform_indices = @transform_3, window_bounds = array<i64: 16, 128>}, {transform_indices = @transform_4, window_bounds = array<i64: 16, 128>}]} {
    %c0_i32 = arith.constant 0 : i32
    %0 = arith.cmpi eq, %arg2, %c0_i32 : i32
    %1 = arith.extui %0 : i1 to i32
    %c0_i32_0 = arith.constant 0 : i32
    %2 = arith.cmpi ne, %1, %c0_i32_0 : i32
    scf.if %2 {
      %cst_10 = arith.constant 0.000000e+00 : f32
      %12 = vector.broadcast %cst_10 : f32 to vector<16x128xf32>
      %c0_11 = arith.constant 0 : index
      %c0_12 = arith.constant 0 : index
      %13 = vector.load %arg8[%c0_11, %c0_12] : memref<16x128xf32, #tpu.memory_space<vmem>>, vector<16x128xf32>
      tpu.vector_store %arg8[%c0_11, %c0_12], %12 {strides = array<i32>} : memref<16x128xf32, #tpu.memory_space<vmem>>, vector<16x128xf32>,
    } else {
    }
    %c0 = arith.constant 0 : index
    %c0_1 = arith.constant 0 : index
    %3 = vector.load %arg8[%c0, %c0_1] : memref<16x128xf32, #tpu.memory_space<vmem>>, vector<16x128xf32>
    %c0_2 = arith.constant 0 : index
    %c0_3 = arith.constant 0 : index
    %4 = vector.load %arg3[%c0_2, %c0_3] : memref<16x128xbf16, #tpu.memory_space<vmem>>, vector<16x128xbf16>
    %c0_4 = arith.constant 0 : index
    %c0_5 = arith.constant 0 : index
    %5 = vector.load %arg4[%c0_4, %c0_5] : memref<128x128xbf16, #tpu.memory_space<vmem>>, vector<128x128xbf16>
    %cst = arith.constant dense<0.000000e+00> : vector<16x128xf32>
    %6 = tpu.matmul %4, %5, %cst {dimension_numbers = #tpu.dot_dimension_numbers<[1], [0], [0], [1], [0, 0, 1, 1], [], []>} : vector<16x128xbf16>, vector<128x128xbf16>, vector<16x128xf32> -> vector<16x128xf32>
    %7 = arith.addf %3, %6 : vector<16x128xf32>
    %c0_6 = arith.constant 0 : index
    %c0_7 = arith.constant 0 : index
    %8 = vector.load %arg8[%c0_6, %c0_7] : memref<16x128xf32, #tpu.memory_space<vmem>>, vector<16x128xf32>
    tpu.vector_store %arg8[%c0_6, %c0_7], %7 {strides = array<i32>} : memref<16x128xf32, #tpu.memory_space<vmem>>, vector<16x128xf32>,
    %c0_i32_8 = arith.constant 0 : i32
    %9 = arith.cmpi eq, %arg2, %c0_i32_8 : i32
    %10 = arith.extui %9 : i1 to i32
    %c0_i32_9 = arith.constant 0 : i32
    %11 = arith.cmpi ne, %10, %c0_i32_9 : i32
    scf.if %11 {
      %c0_10 = arith.constant 0 : index
      %c0_11 = arith.constant 0 : index
      %12 = vector.load %arg8[%c0_10, %c0_11] : memref<16x128xf32, #tpu.memory_space<vmem>>, vector<16x128xf32>
      %c0_12 = arith.constant 0 : index
      %c0_13 = arith.constant 0 : index
      %13 = vector.load %arg5[%c0_12, %c0_13] : memref<1x128xf32, #tpu.memory_space<vmem>>, vector<1x128xf32>
      %14 = vector.broadcast %13 : vector<1x128xf32> to vector<16x128xf32>
      %15 = arith.addf %12, %14 : vector<16x128xf32>
      %c0_14 = arith.constant 0 : index
      %c0_15 = arith.constant 0 : index
      %16 = vector.load %arg6[%c0_14, %c0_15] : memref<16x128xf32, #tpu.memory_space<vmem>>, vector<16x128xf32>
      %17 = arith.addf %15, %16 : vector<16x128xf32>
      %cst_16 = arith.constant 0.000000e+00 : f32
      %18 = vector.broadcast %cst_16 : f32 to vector<16x128xf32>
      %19 = arith.maximumf %17, %18 : vector<16x128xf32>
      %c0_17 = arith.constant 0 : index
      %c0_18 = arith.constant 0 : index
      %20 = vector.load %arg7[%c0_17, %c0_18] : memref<16x128xf32, #tpu.memory_space<vmem>>, vector<16x128xf32>
      tpu.vector_store %arg7[%c0_17, %c0_18], %19 {strides = array<i32>} : memref<16x128xf32, #tpu.memory_space<vmem>>, vector<16x128xf32>,
    } else {
    }
    return
  }
  func.func @transform_0(%arg0: i32, %arg1: i32, %arg2: i32) -> (i32, i32) {
    %c0_i32 = arith.constant 0 : i32
    return %arg0, %arg2 : i32, i32
  }
  func.func @transform_1(%arg0: i32, %arg1: i32, %arg2: i32) -> (i32, i32) {
    %c0_i32 = arith.constant 0 : i32
    return %arg2, %arg1 : i32, i32
  }
  func.func @transform_2(%arg0: i32, %arg1: i32, %arg2: i32) -> (i32, i32) {
    %c0_i32 = arith.constant 0 : i32
    %c0_i32_0 = arith.constant 0 : i32
    return %c0_i32, %arg1 : i32, i32
  }
  func.func @transform_3(%arg0: i32, %arg1: i32, %arg2: i32) -> (i32, i32) {
    %c0_i32 = arith.constant 0 : i32
    return %arg0, %arg1 : i32, i32
  }
  func.func @transform_4(%arg0: i32, %arg1: i32, %arg2: i32) -> (i32, i32) {
    %c0_i32 = arith.constant 0 : i32
    return %arg0, %arg1 : i32, i32
  }
}

module attributes {stable_mosaic.version = 11 : i64} {
  func.func @_mean_pool_kernel(%arg0: memref<4x256xf32, #tpu.memory_space<vmem>>, %arg1: memref<1x256xf32, #tpu.memory_space<vmem>>) attributes {dimension_semantics = [], scalar_prefetch = 0 : i64, scratch_operands = 0 : i64, tpu.core_type = #tpu.core_type<tc>} {
    %c0 = arith.constant 0 : index
    %c0_0 = arith.constant 0 : index
    %0 = vector.load %arg0[%c0, %c0_0] : memref<4x256xf32, #tpu.memory_space<vmem>>, vector<4x256xf32>
    %cst = arith.constant dense<0.000000e+00> : vector<256xf32>
    %1 = vector.multi_reduction <add>, %0, %cst [0] : vector<4x256xf32> to vector<256xf32>
    %2 = vector.shape_cast %1 : vector<256xf32> to vector<1x256xf32>
    %cst_1 = arith.constant 4.000000e+00 : f32
    %3 = vector.broadcast %cst_1 : f32 to vector<1x256xf32>
    %4 = arith.divf %2, %3 : vector<1x256xf32>
    %c0_2 = arith.constant 0 : index
    %c0_3 = arith.constant 0 : index
    %5 = vector.load %arg1[%c0_2, %c0_3] : memref<1x256xf32, #tpu.memory_space<vmem>>, vector<1x256xf32>
    tpu.vector_store %arg1[%c0_2, %c0_3], %4 {strides = array<i32>} : memref<1x256xf32, #tpu.memory_space<vmem>>, vector<1x256xf32>,
    return
  }
}

</mosaic_0001>

<bundles_post_ra>
// kernel: _lambda_.19
= control target key start
LH: loop header
LB: loop body
LE: loop exit
PB: predicated region body
PF: predicated region fallthrough
CT: control target
= control target key end

     0   :  { %s807_s12 = smov 0   ;;  %s1480_s0 = inlined_call_operand.vmem [shape: f32[4096,3], index: 0, kind: input, shape index: {}]   ;;  %s1481_s1 = inlined_call_operand.vmem [shape: f32[1,3], index: 1, kind: input, shape index: {}]   ;;  %s1482_s2 = inlined_call_operand.vmem [shape: f32[1,3], index: 2, kind: input, shape index: {}]   ;;  %s1483_s3 = inlined_call_operand.vmem [shape: f32[4096,3], index: 3, kind: output, shape index: {}]  }
   0x1 LB: > { %s757_s13 = sadd.s32 4294967295, %s785_s12   ;;  %p761_p0 = scmp.ge.s32.totalorder %s785_s12, 1  ;;  %s785_s12 = sphi %s807_s12, %s13_s12  }
   0x2   : > { %p138_p1 = scmp.lt.s32.totalorder %s785_s12, 5 }
   0x4   : > { %p139_p2 = pnand %p761_p0, %p138_p1 }
   0x5   : > { %s762_s14 = sshll.u32 (!%p139_p2), %s757_s13, 7  ;;  %v818_v0 = vld [vmem:[%s1481_s1] ss:$0 sm:$0xff] (!%p139_p2)  ;;  %vm572_vm0 = vcmask (!%p139_p2), 23552  }
   0x6   : > { %142 = sbr.rel (%p139_p2) target bundleno = 97 (0x61), region = 32  ;;  %p163_p3 = scmp.lt.s32.totalorder (!%p139_p2), %s762_s14, 511  ;;  %v828_v1 = vld [vmem:[%s1482_s2] ss:$0 sm:$0xff] (!%p139_p2) }
   0xd   : > { %s1485_s14 = smov (!%p163_p3, %s762_s14), 511 }
   0xe   : > { %s763_s15 = sshll.u32 %s1485_s14, 3 }
   0xf   : > { %s823_s20 = scalar_lea.vmem %s1480_s0, %s763_s15  ;;  %s842_s25 = scalar_lea.vmem %s1483_s3, %s763_s15 }
  0x10   : > { %v174_v2 = vld [vmem:[%s823_s20] sm:$0xff]  ;;  %v175_v3 = vld [vmem:[%s823_s20 + $0x8] sm:$0xff]  ;;  %v176_v4 = vld [vmem:[%s823_s20 + $0x10] sm:$0xff] }
  0x11   : > { %v309_v5 = vsub.f32 %v174_v2, %v818_v0  ;;  %v310_v6 = vsub.f32 %v175_v3, %v818_v0  ;;  %v311_v7 = vsub.f32 %v176_v4, %v818_v0  ;;  %v177_v8 = vld [vmem:[%s823_s20 + $0x18] sm:$0xff]  ;;  %v178_v9 = vld [vmem:[%s823_s20 + $0x20] sm:$0xff]  ;;  %v179_v10 = vld [vmem:[%s823_s20 + $0x28] sm:$0xff] }
  0x12   : > { %v312_v11 = vsub.f32 %v177_v8, %v818_v0  ;;  %v313_v12 = vsub.f32 %v178_v9, %v818_v0  ;;  %v314_v13 = vsub.f32 %v179_v10, %v818_v0  ;;  %v180_v14 = vld [vmem:[%s823_s20 + $0x30] sm:$0xff]  ;;  %v181_v15 = vld [vmem:[%s823_s20 + $0x38] sm:$0xff]  ;;  %v182_v16 = vld [vmem:[%s823_s20 + $0x40] sm:$0xff] }
  0x13   : > { %v444_v17 = vmul.f32 %v828_v1, %v309_v5  ;;  %v445_v18 = vmul.f32 %v828_v1, %v310_v6  ;;  %v446_v19 = vmul.f32 %v828_v1, %v311_v7  ;;  %v315_v20 = vsub.f32 %v180_v14, %v818_v0  ;;  %v183_v21 = vld [vmem:[%s823_s20 + $0x48] sm:$0xff]  ;;  %v184_v22 = vld [vmem:[%s823_s20 + $0x50] sm:$0xff]  ;;  %v185_v23 = vld [vmem:[%s823_s20 + $0x58] sm:$0xff] }
  0x14   : > { %v447_v24 = vmul.f32 %v828_v1, %v312_v11  ;;  %v448_v25 = vmul.f32 %v828_v1, %v313_v12  ;;  %v449_v26 = vmul.f32 %v828_v1, %v314_v13  ;;  %v316_v27 = vsub.f32 %v181_v15, %v818_v0  ;;  %v186_v28 = vld [vmem:[%s823_s20 + $0x60] sm:$0xff]  ;;  %v187_v29 = vld [vmem:[%s823_s20 + $0x68] sm:$0xff]  ;;  %v188_v30 = vld [vmem:[%s823_s20 + $0x70] sm:$0xff] }
  0x15   : > { %573 = vst.msk [vmem:[%s842_s25] sm:$0xff] %vm572_vm0, %v444_v17  ;;  %574 = vst.msk [vmem:[%s842_s25 + $0x8] sm:$0xff] %vm572_vm0, %v445_v18  ;;  %v450_v31 = vmul.f32 %v828_v1, %v315_v20  ;;  %v317_v32 = vsub.f32 %v182_v16, %v818_v0  ;;  %v318_v33 = vsub.f32 %v183_v21, %v818_v0  ;;  %v189_v35 = vld [vmem:[%s823_s20 + $0x78] sm:$0xff]  ;;  %v190_v40 = vld [vmem:[%s823_s20 + $0x80] sm:$0xff] }
  0x16   : > { %575 = vst.msk [vmem:[%s842_s25 + $0x10] sm:$0xff] %vm572_vm0, %v446_v19  ;;  %v319_v34 = vsub.f32 %v184_v22, %v818_v0  ;;  %576 = vst.msk [vmem:[%s842_s25 + $0x18] sm:$0xff] %vm572_vm0, %v447_v24  ;;  %v451_v36 = vmul.f32 %v828_v1, %v316_v27  ;;  %v320_v37 = vsub.f32 %v185_v23, %v818_v0  ;;  %v191_v41 = vld [vmem:[%s823_s20 + $0x88] sm:$0xff]  ;;  %v192_v42 = vld [vmem:[%s823_s20 + $0x90] sm:$0xff] }
  0x17   : > { %577 = vst.msk [vmem:[%s842_s25 + $0x20] sm:$0xff] %vm572_vm0, %v448_v25  ;;  %578 = vst.msk [vmem:[%s842_s25 + $0x28] sm:$0xff] %vm572_vm0, %v449_v26  ;;  %v321_v38 = vsub.f32 %v186_v28, %v818_v0  ;;  %v322_v39 = vsub.f32 %v187_v29, %v818_v0  ;;  %v452_v43 = vmul.f32 %v828_v1, %v317_v32  ;;  %v193_v47 = vld [vmem:[%s823_s20 + $0x98] sm:$0xff]  ;;  %v194_v48 = vld [vmem:[%s823_s20 + $0xa0] sm:$0xff] }
  0x18   : > { %579 = vst.msk [vmem:[%s842_s25 + $0x30] sm:$0xff] %vm572_vm0, %v450_v31  ;;  %v453_v44 = vmul.f32 %v828_v1, %v318_v33  ;;  %v454_v45 = vmul.f32 %v828_v1, %v319_v34  ;;  %v323_v46 = vsub.f32 %v188_v30, %v818_v0  ;;  %v195_v49 = vld [vmem:[%s823_s20 + $0xa8] sm:$0xff]  ;;  %580 = vst.msk [vmem:[%s842_s25 + $0x38] sm:$0xff] %vm572_vm0, %v451_v36  ;;  %v196_v54 = vld [vmem:[%s823_s20 + $0xb0] sm:$0xff] }
  0x19   : > { %v455_v50 = vmul.f32 %v828_v1, %v320_v37  ;;  %v456_v51 = vmul.f32 %v828_v1, %v321_v38  ;;  %v457_v52 = vmul.f32 %v828_v1, %v322_v39  ;;  %v324_v53 = vsub.f32 %v189_v35, %v818_v0  ;;  %581 = vst.msk [vmem:[%s842_s25 + $0x40] sm:$0xff] %vm572_vm0, %v452_v43  ;;  %v197_v59 = vld [vmem:[%s823_s20 + $0xb8] sm:$0xff]  ;;  %v198_v2 = vld [vmem:[%s823_s20 + $0xc0] sm:$0xff]  ;;  %v199_v3 = vld [vmem:[%s823_s20 + $0xc8] sm:$0xff] }
  0x1a   : > { %582 = vst.msk [vmem:[%s842_s25 + $0x48] sm:$0xff] %vm572_vm0, %v453_v44  ;;  %583 = vst.msk [vmem:[%s842_s25 + $0x50] sm:$0xff] %vm572_vm0, %v454_v45  ;;  %v458_v55 = vmul.f32 %v828_v1, %v323_v46  ;;  %v325_v56 = vsub.f32 %v190_v40, %v818_v0  ;;  %v326_v57 = vsub.f32 %v191_v41, %v818_v0  ;;  %v200_v4 = vld [vmem:[%s823_s20 + $0xd0] sm:$0xff]  ;;  %v201_v9 = vld [vmem:[%s823_s20 + $0xd8] sm:$0xff] }
  0x1b   : > { %v327_v58 = vsub.f32 %v192_v42, %v818_v0  ;;  %584 = vst.msk [vmem:[%s842_s25 + $0x58] sm:$0xff] %vm572_vm0, %v455_v50  ;;  %585 = vst.msk [vmem:[%s842_s25 + $0x60] sm:$0xff] %vm572_vm0, %v456_v51  ;;  %v459_v60 = vmul.f32 %v828_v1, %v324_v53  ;;  %v328_v61 = vsub.f32 %v193_v47, %v818_v0  ;;  %v202_v10 = vld [vmem:[%s823_s20 + $0xe0] sm:$0xff]  ;;  %v203_v11 = vld [vmem:[%s823_s20 + $0xe8] sm:$0xff] }
  0x1c   : > { %586 = vst.msk [vmem:[%s842_s25 + $0x68] sm:$0xff] %vm572_vm0, %v457_v52  ;;  %v329_v62 = vsub.f32 %v194_v48, %v818_v0  ;;  %v330_v63 = vsub.f32 %v195_v49, %v818_v0  ;;  %587 = vst.msk [vmem:[%s842_s25 + $0x70] sm:$0xff] %vm572_vm0, %v458_v55  ;;  %v460_v5 = vmul.f32 %v828_v1, %v325_v56  ;;  %v204_v16 = vld [vmem:[%s823_s20 + $0xf0] sm:$0xff]  ;;  %v205_v21 = vld [vmem:[%s823_s20 + $0xf8] sm:$0xff] }
  0x1d   : > { %v461_v6 = vmul.f32 %v828_v1, %v326_v57  ;;  %v462_v7 = vmul.f32 %v828_v1, %v327_v58  ;;  %v331_v8 = vsub.f32 %v196_v54, %v818_v0  ;;  %588 = vst.msk [vmem:[%s842_s25 + $0x78] sm:$0xff] %vm572_vm0, %v459_v60  ;;  %v463_v12 = vmul.f32 %v828_v1, %v328_v61  ;;  %v206_v26 = vld [vmem:[%s823_s20 + $0x100] sm:$0xff]  ;;  %v207_v27 = vld [vmem:[%s823_s20 + $0x108] sm:$0xff]  ;;  %v208_v28 = vld [vmem:[%s823_s20 + $0x110] sm:$0xff] }
  0x1e   : > { %v464_v13 = vmul.f32 %v828_v1, %v329_v62  ;;  %v465_v14 = vmul.f32 %v828_v1, %v330_v63  ;;  %v332_v15 = vsub.f32 %v197_v59, %v818_v0  ;;  %589 = vst.msk [vmem:[%s842_s25 + $0x80] sm:$0xff] %vm572_vm0, %v460_v5  ;;  %v333_v18 = vsub.f32 %v198_v2, %v818_v0  ;;  %v209_v33 = vld [vmem:[%s823_s20 + $0x118] sm:$0xff]  ;;  %v210_v34 = vld [vmem:[%s823_s20 + $0x120] sm:$0xff]  ;;  %v211_v35 = vld [vmem:[%s823_s20 + $0x128] sm:$0xff] }
  0x1f   : > { %590 = vst.msk [vmem:[%s842_s25 + $0x88] sm:$0xff] %vm572_vm0, %v461_v6  ;;  %591 = vst.msk [vmem:[%s842_s25 + $0x90] sm:$0xff] %vm572_vm0, %v462_v7  ;;  %v466_v17 = vmul.f32 %v828_v1, %v331_v8  ;;  %v334_v19 = vsub.f32 %v199_v3, %v818_v0  ;;  %v335_v20 = vsub.f32 %v200_v4, %v818_v0  ;;  %v212_v40 = vld [vmem:[%s823_s20 + $0x130] sm:$0xff]  ;;  %v213_v45 = vld [vmem:[%s823_s20 + $0x138] sm:$0xff] }
  0x20   : > { %592 = vst.msk [vmem:[%s842_s25 + $0x98] sm:$0xff] %vm572_vm0, %v463_v12  ;;  %593 = vst.msk [vmem:[%s842_s25 + $0xa0] sm:$0xff] %vm572_vm0, %v464_v13  ;;  %v467_v22 = vmul.f32 %v828_v1, %v332_v15  ;;  %v336_v23 = vsub.f32 %v201_v9, %v818_v0  ;;  %v337_v24 = vsub.f32 %v202_v10, %v818_v0  ;;  %v214_v50 = vld [vmem:[%s823_s20 + $0x140] sm:$0xff]  ;;  %v215_v51 = vld [vmem:[%s823_s20 + $0x148] sm:$0xff] }
  0x21   : > { %594 = vst.msk [vmem:[%s842_s25 + $0xa8] sm:$0xff] %vm572_vm0, %v465_v14  ;;  %v338_v25 = vsub.f32 %v203_v11, %v818_v0  ;;  %595 = vst.msk [vmem:[%s842_s25 + $0xb0] sm:$0xff] %vm572_vm0, %v466_v17  ;;  %v468_v29 = vmul.f32 %v828_v1, %v333_v18  ;;  %v469_v30 = vmul.f32 %v828_v1, %v334_v19  ;;  %v216_v52 = vld [vmem:[%s823_s20 + $0x150] sm:$0xff]  ;;  %v217_v57 = vld [vmem:[%s823_s20 + $0x158] sm:$0xff] }
  0x22   : > { %v470_v31 = vmul.f32 %v828_v1, %v335_v20  ;;  %v339_v32 = vsub.f32 %v204_v16, %v818_v0  ;;  %596 = vst.msk [vmem:[%s842_s25 + $0xb8] sm:$0xff] %vm572_vm0, %v467_v22  ;;  %v471_v36 = vmul.f32 %v828_v1, %v336_v23  ;;  %v472_v37 = vmul.f32 %v828_v1, %v337_v24  ;;  %v218_v58 = vld [vmem:[%s823_s20 + $0x160] sm:$0xff]  ;;  %v219_v59 = vld [vmem:[%s823_s20 + $0x168] sm:$0xff]  ;;  %v220_v2 = vld [vmem:[%s823_s20 + $0x170] sm:$0xff] }
  0x23   : > { %v473_v38 = vmul.f32 %v828_v1, %v338_v25  ;;  %v340_v39 = vsub.f32 %v205_v21, %v818_v0  ;;  %597 = vst.msk [vmem:[%s842_s25 + $0xc0] sm:$0xff] %vm572_vm0, %v468_v29  ;;  %598 = vst.msk [vmem:[%s842_s25 + $0xc8] sm:$0xff] %vm572_vm0, %v469_v30  ;;  %v341_v42 = vsub.f32 %v206_v26, %v818_v0  ;;  %v221_v7 = vld [vmem:[%s823_s20 + $0x178] sm:$0xff]  ;;  %v222_v12 = vld [vmem:[%s823_s20 + $0x180] sm:$0xff] }
  0x24   : > { %599 = vst.msk [vmem:[%s842_s25 + $0xd0] sm:$0xff] %vm572_vm0, %v470_v31  ;;  %v474_v41 = vmul.f32 %v828_v1, %v339_v32  ;;  %v342_v43 = vsub.f32 %v207_v27, %v818_v0  ;;  %v343_v44 = vsub.f32 %v208_v28, %v818_v0  ;;  %600 = vst.msk [vmem:[%s842_s25 + $0xd8] sm:$0xff] %vm572_vm0, %v471_v36  ;;  %v223_v13 = vld [vmem:[%s823_s20 + $0x188] sm:$0xff]  ;;  %v224_v14 = vld [vmem:[%s823_s20 + $0x190] sm:$0xff] }
  0x25   : > { %601 = vst.msk [vmem:[%s842_s25 + $0xe0] sm:$0xff] %vm572_vm0, %v472_v37  ;;  %602 = vst.msk [vmem:[%s842_s25 + $0xe8] sm:$0xff] %vm572_vm0, %v473_v38  ;;  %v475_v46 = vmul.f32 %v828_v1, %v340_v39  ;;  %v344_v47 = vsub.f32 %v209_v33, %v818_v0  ;;  %v345_v48 = vsub.f32 %v210_v34, %v818_v0  ;;  %v225_v19 = vld [vmem:[%s823_s20 + $0x198] sm:$0xff]  ;;  %v226_v20 = vld [vmem:[%s823_s20 + $0x1a0] sm:$0xff] }
  0x26   : > { %v346_v49 = vsub.f32 %v211_v35, %v818_v0  ;;  %603 = vst.msk [vmem:[%s842_s25 + $0xf0] sm:$0xff] %vm572_vm0, %v474_v41  ;;  %v476_v53 = vmul.f32 %v828_v1, %v341_v42  ;;  %v477_v54 = vmul.f32 %v828_v1, %v342_v43  ;;  %v478_v55 = vmul.f32 %v828_v1, %v343_v44  ;;  %v227_v21 = vld [vmem:[%s823_s20 + $0x1a8] sm:$0xff]  ;;  %v228_v26 = vld [vmem:[%s823_s20 + $0x1b0] sm:$0xff]  ;;  %v229_v31 = vld [vmem:[%s823_s20 + $0x1b8] sm:$0xff] }
  0x27   : > { %v347_v56 = vsub.f32 %v212_v40, %v818_v0  ;;  %604 = vst.msk [vmem:[%s842_s25 + $0xf8] sm:$0xff] %vm572_vm0, %v475_v46  ;;  %v479_v60 = vmul.f32 %v828_v1, %v344_v47  ;;  %v480_v61 = vmul.f32 %v828_v1, %v345_v48  ;;  %v348_v63 = vsub.f32 %v213_v45, %v818_v0  ;;  %v230_v36 = vld [vmem:[%s823_s20 + $0x1c0] sm:$0xff]  ;;  %v231_v37 = vld [vmem:[%s823_s20 + $0x1c8] sm:$0xff]  ;;  %v232_v38 = vld [vmem:[%s823_s20 + $0x1d0] sm:$0xff] }
  0x28   : > { %v481_v62 = vmul.f32 %v828_v1, %v346_v49  ;;  %605 = vst.msk [vmem:[%s842_s25 + $0x100] sm:$0xff] %vm572_vm0, %v476_v53  ;;  %606 = vst.msk [vmem:[%s842_s25 + $0x108] sm:$0xff] %vm572_vm0, %v477_v54  ;;  %v349_v4 = vsub.f32 %v214_v50, %v818_v0  ;;  %v350_v5 = vsub.f32 %v215_v51, %v818_v0  ;;  %v233_v43 = vld [vmem:[%s823_s20 + $0x1d8] sm:$0xff]  ;;  %v234_v44 = vld [vmem:[%s823_s20 + $0x1e0] sm:$0xff] }
  0x29   : > { %607 = vst.msk [vmem:[%s842_s25 + $0x110] sm:$0xff] %vm572_vm0, %v478_v55  ;;  %v482_v3 = vmul.f32 %v828_v1, %v347_v56  ;;  %v351_v6 = vsub.f32 %v216_v52, %v818_v0  ;;  %608 = vst.msk [vmem:[%s842_s25 + $0x118] sm:$0xff] %vm572_vm0, %v479_v60  ;;  %v483_v8 = vmul.f32 %v828_v1, %v348_v63  ;;  %v235_v45 = vld [vmem:[%s823_s20 + $0x1e8] sm:$0xff]  ;;  %v236_v50 = vld [vmem:[%s823_s20 + $0x1f0] sm:$0xff] }
  0x2a   : > { %609 = vst.msk [vmem:[%s842_s25 + $0x120] sm:$0xff] %vm572_vm0, %v480_v61  ;;  %610 = vst.msk [vmem:[%s842_s25 + $0x128] sm:$0xff] %vm572_vm0, %v481_v62  ;;  %v352_v9 = vsub.f32 %v217_v57, %v818_v0  ;;  %v353_v10 = vsub.f32 %v218_v58, %v818_v0  ;;  %v354_v11 = vsub.f32 %v219_v59, %v818_v0  ;;  %v237_v55 = vld [vmem:[%s823_s20 + $0x1f8] sm:$0xff]  ;;  %v238_v60 = vld [vmem:[%s823_s20 + $0x200] sm:$0xff] }
  0x2b   : > { %611 = vst.msk [vmem:[%s842_s25 + $0x130] sm:$0xff] %vm572_vm0, %v482_v3  ;;  %v484_v15 = vmul.f32 %v828_v1, %v349_v4  ;;  %v485_v16 = vmul.f32 %v828_v1, %v350_v5  ;;  %v486_v17 = vmul.f32 %v828_v1, %v351_v6  ;;  %v355_v18 = vsub.f32 %v220_v2, %v818_v0  ;;  %v239_v61 = vld [vmem:[%s823_s20 + $0x208] sm:$0xff]  ;;  %v240_v62 = vld [vmem:[%s823_s20 + $0x210] sm:$0xff]  ;;  %v241_v5 = vld [vmem:[%s823_s20 + $0x218] sm:$0xff] }
  0x2c   : > { %612 = vst.msk [vmem:[%s842_s25 + $0x138] sm:$0xff] %vm572_vm0, %v483_v8  ;;  %v487_v22 = vmul.f32 %v828_v1, %v352_v9  ;;  %v488_v23 = vmul.f32 %v828_v1, %v353_v10  ;;  %v489_v24 = vmul.f32 %v828_v1, %v354_v11  ;;  %v356_v25 = vsub.f32 %v221_v7, %v818_v0  ;;  %v242_v6 = vld [vmem:[%s823_s20 + $0x220] sm:$0xff]  ;;  %v243_v7 = vld [vmem:[%s823_s20 + $0x228] sm:$0xff] }
  0x2d   : > { %613 = vst.msk [vmem:[%s842_s25 + $0x140] sm:$0xff] %vm572_vm0, %v484_v15  ;;  %614 = vst.msk [vmem:[%s842_s25 + $0x148] sm:$0xff] %vm572_vm0, %v485_v16  ;;  %v490_v27 = vmul.f32 %v828_v1, %v355_v18  ;;  %v357_v28 = vsub.f32 %v222_v12, %v818_v0  ;;  %v358_v29 = vsub.f32 %v223_v13, %v818_v0  ;;  %v244_v12 = vld [vmem:[%s823_s20 + $0x230] sm:$0xff] }
  0x2e   : > { %615 = vst.msk [vmem:[%s842_s25 + $0x150] sm:$0xff] %vm572_vm0, %v486_v17  ;;  %v359_v30 = vsub.f32 %v224_v14, %v818_v0  ;;  %616 = vst.msk [vmem:[%s842_s25 + $0x158] sm:$0xff] %vm572_vm0, %v487_v22  ;;  %v491_v32 = vmul.f32 %v828_v1, %v356_v25  ;;  %v360_v33 = vsub.f32 %v225_v19, %v818_v0  ;;  %v245_v17 = vld [vmem:[%s823_s20 + $0x238] sm:$0xff]  ;;  %v246_v22 = vld [vmem:[%s823_s20 + $0x240] sm:$0xff] }
  0x2f   : > { %617 = vst.msk [vmem:[%s842_s25 + $0x160] sm:$0xff] %vm572_vm0, %v488_v23  ;;  %618 = vst.msk [vmem:[%s842_s25 + $0x168] sm:$0xff] %vm572_vm0, %v489_v24  ;;  %v361_v34 = vsub.f32 %v226_v20, %v818_v0  ;;  %v362_v35 = vsub.f32 %v227_v21, %v818_v0  ;;  %v492_v39 = vmul.f32 %v828_v1, %v357_v28  ;;  %v247_v23 = vld [vmem:[%s823_s20 + $0x248] sm:$0xff]  ;;  %v248_v24 = vld [vmem:[%s823_s20 + $0x250] sm:$0xff] }
  0x30   : > { %619 = vst.msk [vmem:[%s842_s25 + $0x170] sm:$0xff] %vm572_vm0, %v490_v27  ;;  %v493_v40 = vmul.f32 %v828_v1, %v358_v29  ;;  %v494_v41 = vmul.f32 %v828_v1, %v359_v30  ;;  %v363_v42 = vsub.f32 %v228_v26, %v818_v0  ;;  %620 = vst.msk [vmem:[%s842_s25 + $0x178] sm:$0xff] %vm572_vm0, %v491_v32  ;;  %v249_v29 = vld [vmem:[%s823_s20 + $0x258] sm:$0xff]  ;;  %v250_v30 = vld [vmem:[%s823_s20 + $0x260] sm:$0xff] }
  0x31   : > { %v495_v46 = vmul.f32 %v828_v1, %v360_v33  ;;  %v496_v47 = vmul.f32 %v828_v1, %v361_v34  ;;  %v497_v48 = vmul.f32 %v828_v1, %v362_v35  ;;  %v364_v49 = vsub.f32 %v229_v31, %v818_v0  ;;  %621 = vst.msk [vmem:[%s842_s25 + $0x180] sm:$0xff] %vm572_vm0, %v492_v39  ;;  %v251_v31 = vld [vmem:[%s823_s20 + $0x268] sm:$0xff] }
  0x32   : > { %622 = vst.msk [vmem:[%s842_s25 + $0x188] sm:$0xff] %vm572_vm0, %v493_v40  ;;  %623 = vst.msk [vmem:[%s842_s25 + $0x190] sm:$0xff] %vm572_vm0, %v494_v41  ;;  %v498_v51 = vmul.f32 %v828_v1, %v363_v42  ;;  %v365_v52 = vsub.f32 %v230_v36, %v818_v0  ;;  %v366_v53 = vsub.f32 %v231_v37, %v818_v0  ;;  %v252_v36 = vld [vmem:[%s823_s20 + $0x270] sm:$0xff]  ;;  %v253_v41 = vld [vmem:[%s823_s20 + $0x278] sm:$0xff] }
  0x33   : > { %v367_v54 = vsub.f32 %v232_v38, %v818_v0  ;;  %624 = vst.msk [vmem:[%s842_s25 + $0x198] sm:$0xff] %vm572_vm0, %v495_v46  ;;  %625 = vst.msk [vmem:[%s842_s25 + $0x1a0] sm:$0xff] %vm572_vm0, %v496_v47  ;;  %v499_v56 = vmul.f32 %v828_v1, %v364_v49  ;;  %v368_v57 = vsub.f32 %v233_v43, %v818_v0  ;;  %v254_v46 = vld [vmem:[%s823_s20 + $0x280] sm:$0xff]  ;;  %v255_v47 = vld [vmem:[%s823_s20 + $0x288] sm:$0xff] }
  0x34   : > { %626 = vst.msk [vmem:[%s842_s25 + $0x1a8] sm:$0xff] %vm572_vm0, %v497_v48  ;;  %v369_v58 = vsub.f32 %v234_v44, %v818_v0  ;;  %v370_v59 = vsub.f32 %v235_v45, %v818_v0  ;;  %627 = vst.msk [vmem:[%s842_s25 + $0x1b0] sm:$0xff] %vm572_vm0, %v498_v51  ;;  %v500_v63 = vmul.f32 %v828_v1, %v365_v52  ;;  %v256_v48 = vld [vmem:[%s823_s20 + $0x290] sm:$0xff] }
  0x35   : > { %v501_v2 = vmul.f32 %v828_v1, %v366_v53  ;;  %v502_v3 = vmul.f32 %v828_v1, %v367_v54  ;;  %v371_v4 = vsub.f32 %v236_v50, %v818_v0  ;;  %628 = vst.msk [vmem:[%s842_s25 + $0x1b8] sm:$0xff] %vm572_vm0, %v499_v56  ;;  %v503_v8 = vmul.f32 %v828_v1, %v368_v57  ;;  %v257_v53 = vld [vmem:[%s823_s20 + $0x298] sm:$0xff]  ;;  %v258_v54 = vld [vmem:[%s823_s20 + $0x2a0] sm:$0xff] }
  0x36   : > { %v504_v9 = vmul.f32 %v828_v1, %v369_v58  ;;  %v505_v10 = vmul.f32 %v828_v1, %v370_v59  ;;  %v372_v11 = vsub.f32 %v237_v55, %v818_v0  ;;  %629 = vst.msk [vmem:[%s842_s25 + $0x1c0] sm:$0xff] %vm572_vm0, %v500_v63  ;;  %v373_v14 = vsub.f32 %v238_v60, %v818_v0  ;;  %v259_v55 = vld [vmem:[%s823_s20 + $0x2a8] sm:$0xff]  ;;  %v260_v60 = vld [vmem:[%s823_s20 + $0x2b0] sm:$0xff] }
  0x37   : > { %630 = vst.msk [vmem:[%s842_s25 + $0x1c8] sm:$0xff] %vm572_vm0, %v501_v2  ;;  %631 = vst.msk [vmem:[%s842_s25 + $0x1d0] sm:$0xff] %vm572_vm0, %v502_v3  ;;  %v506_v13 = vmul.f32 %v828_v1, %v371_v4  ;;  %v374_v15 = vsub.f32 %v239_v61, %v818_v0  ;;  %v375_v16 = vsub.f32 %v240_v62, %v818_v0  ;;  %v261_v3 = vld [vmem:[%s823_s20 + $0x2b8] sm:$0xff] }
  0x38   : > { %632 = vst.msk [vmem:[%s842_s25 + $0x1d8] sm:$0xff] %vm572_vm0, %v503_v8  ;;  %633 = vst.msk [vmem:[%s842_s25 + $0x1e0] sm:$0xff] %vm572_vm0, %v504_v9  ;;  %v507_v18 = vmul.f32 %v828_v1, %v372_v11  ;;  %v376_v19 = vsub.f32 %v241_v5, %v818_v0  ;;  %v377_v20 = vsub.f32 %v242_v6, %v818_v0  ;;  %v262_v8 = vld [vmem:[%s823_s20 + $0x2c0] sm:$0xff]  ;;  %v263_v9 = vld [vmem:[%s823_s20 + $0x2c8] sm:$0xff] }
  0x39   : > { %634 = vst.msk [vmem:[%s842_s25 + $0x1e8] sm:$0xff] %vm572_vm0, %v505_v10  ;;  %v378_v21 = vsub.f32 %v243_v7, %v818_v0  ;;  %635 = vst.msk [vmem:[%s842_s25 + $0x1f0] sm:$0xff] %vm572_vm0, %v506_v13  ;;  %v508_v25 = vmul.f32 %v828_v1, %v373_v14  ;;  %v509_v26 = vmul.f32 %v828_v1, %v374_v15  ;;  %v264_v10 = vld [vmem:[%s823_s20 + $0x2d0] sm:$0xff]  ;;  %v265_v15 = vld [vmem:[%s823_s20 + $0x2d8] sm:$0xff] }
  0x3a   : > { %v510_v27 = vmul.f32 %v828_v1, %v375_v16  ;;  %v379_v28 = vsub.f32 %v244_v12, %v818_v0  ;;  %636 = vst.msk [vmem:[%s842_s25 + $0x1f8] sm:$0xff] %vm572_vm0, %v507_v18  ;;  %v511_v32 = vmul.f32 %v828_v1, %v376_v19  ;;  %v512_v33 = vmul.f32 %v828_v1, %v377_v20  ;;  %v266_v16 = vld [vmem:[%s823_s20 + $0x2e0] sm:$0xff] }
  0x3b   : > { %v513_v34 = vmul.f32 %v828_v1, %v378_v21  ;;  %v380_v35 = vsub.f32 %v245_v17, %v818_v0  ;;  %637 = vst.msk [vmem:[%s842_s25 + $0x200] sm:$0xff] %vm572_vm0, %v508_v25  ;;  %638 = vst.msk [vmem:[%s842_s25 + $0x208] sm:$0xff] %vm572_vm0, %v509_v26  ;;  %v381_v38 = vsub.f32 %v246_v22, %v818_v0  ;;  %v267_v17 = vld [vmem:[%s823_s20 + $0x2e8] sm:$0xff]  ;;  %v268_v22 = vld [vmem:[%s823_s20 + $0x2f0] sm:$0xff] }
  0x3c   : > { %639 = vst.msk [vmem:[%s842_s25 + $0x210] sm:$0xff] %vm572_vm0, %v510_v27  ;;  %v514_v37 = vmul.f32 %v828_v1, %v379_v28  ;;  %v382_v39 = vsub.f32 %v247_v23, %v818_v0  ;;  %v383_v40 = vsub.f32 %v248_v24, %v818_v0  ;;  %640 = vst.msk [vmem:[%s842_s25 + $0x218] sm:$0xff] %vm572_vm0, %v511_v32  ;;  %v269_v27 = vld [vmem:[%s823_s20 + $0x2f8] sm:$0xff]  ;;  %v270_v32 = vld [vmem:[%s823_s20 + $0x300] sm:$0xff] }
  0x3d   : > { %641 = vst.msk [vmem:[%s842_s25 + $0x220] sm:$0xff] %vm572_vm0, %v512_v33  ;;  %642 = vst.msk [vmem:[%s842_s25 + $0x228] sm:$0xff] %vm572_vm0, %v513_v34  ;;  %v515_v42 = vmul.f32 %v828_v1, %v380_v35  ;;  %v384_v43 = vsub.f32 %v249_v29, %v818_v0  ;;  %v385_v44 = vsub.f32 %v250_v30, %v818_v0  ;;  %v271_v33 = vld [vmem:[%s823_s20 + $0x308] sm:$0xff]  ;;  %v272_v34 = vld [vmem:[%s823_s20 + $0x310] sm:$0xff] }
  0x3e   : > { %v386_v45 = vsub.f32 %v251_v31, %v818_v0  ;;  %643 = vst.msk [vmem:[%s842_s25 + $0x230] sm:$0xff] %vm572_vm0, %v514_v37  ;;  %v516_v49 = vmul.f32 %v828_v1, %v381_v38  ;;  %v517_v50 = vmul.f32 %v828_v1, %v382_v39  ;;  %v518_v51 = vmul.f32 %v828_v1, %v383_v40  ;;  %v273_v39 = vld [vmem:[%s823_s20 + $0x318] sm:$0xff]  ;;  %v274_v40 = vld [vmem:[%s823_s20 + $0x320] sm:$0xff] }
  0x3f   : > { %v387_v52 = vsub.f32 %v252_v36, %v818_v0  ;;  %644 = vst.msk [vmem:[%s842_s25 + $0x238] sm:$0xff] %vm572_vm0, %v515_v42  ;;  %v519_v56 = vmul.f32 %v828_v1, %v384_v43  ;;  %v520_v57 = vmul.f32 %v828_v1, %v385_v44  ;;  %v388_v59 = vsub.f32 %v253_v41, %v818_v0  ;;  %v275_v41 = vld [vmem:[%s823_s20 + $0x328] sm:$0xff] }
  0x40   : > { %v521_v58 = vmul.f32 %v828_v1, %v386_v45  ;;  %645 = vst.msk [vmem:[%s842_s25 + $0x240] sm:$0xff] %vm572_vm0, %v516_v49  ;;  %646 = vst.msk [vmem:[%s842_s25 + $0x248] sm:$0xff] %vm572_vm0, %v517_v50  ;;  %v389_v62 = vsub.f32 %v254_v46, %v818_v0  ;;  %v390_v63 = vsub.f32 %v255_v47, %v818_v0  ;;  %v276_v46 = vld [vmem:[%s823_s20 + $0x330] sm:$0xff] }
  0x41   : > { %647 = vst.msk [vmem:[%s842_s25 + $0x250] sm:$0xff] %vm572_vm0, %v518_v51  ;;  %v522_v61 = vmul.f32 %v828_v1, %v387_v52  ;;  %v391_v2 = vsub.f32 %v256_v48, %v818_v0  ;;  %648 = vst.msk [vmem:[%s842_s25 + $0x258] sm:$0xff] %vm572_vm0, %v519_v56  ;;  %v523_v4 = vmul.f32 %v828_v1, %v388_v59  ;;  %v277_v51 = vld [vmem:[%s823_s20 + $0x338] sm:$0xff]  ;;  %v278_v56 = vld [vmem:[%s823_s20 + $0x340] sm:$0xff] }
  0x42   : > { %649 = vst.msk [vmem:[%s842_s25 + $0x260] sm:$0xff] %vm572_vm0, %v520_v57  ;;  %650 = vst.msk [vmem:[%s842_s25 + $0x268] sm:$0xff] %vm572_vm0, %v521_v58  ;;  %v392_v5 = vsub.f32 %v257_v53, %v818_v0  ;;  %v393_v6 = vsub.f32 %v258_v54, %v818_v0  ;;  %v394_v7 = vsub.f32 %v259_v55, %v818_v0  ;;  %v279_v57 = vld [vmem:[%s823_s20 + $0x348] sm:$0xff]  ;;  %v280_v58 = vld [vmem:[%s823_s20 + $0x350] sm:$0xff] }
  0x43   : > { %651 = vst.msk [vmem:[%s842_s25 + $0x270] sm:$0xff] %vm572_vm0, %v522_v61  ;;  %v524_v11 = vmul.f32 %v828_v1, %v389_v62  ;;  %v525_v12 = vmul.f32 %v828_v1, %v390_v63  ;;  %v526_v13 = vmul.f32 %v828_v1, %v391_v2  ;;  %v395_v14 = vsub.f32 %v260_v60, %v818_v0  ;;  %v281_v63 = vld [vmem:[%s823_s20 + $0x358] sm:$0xff]  ;;  %v282_v2 = vld [vmem:[%s823_s20 + $0x360] sm:$0xff] }
  0x44   : > { %652 = vst.msk [vmem:[%s842_s25 + $0x278] sm:$0xff] %vm572_vm0, %v523_v4  ;;  %v527_v18 = vmul.f32 %v828_v1, %v392_v5  ;;  %v528_v19 = vmul.f32 %v828_v1, %v393_v6  ;;  %v529_v20 = vmul.f32 %v828_v1, %v394_v7  ;;  %v396_v21 = vsub.f32 %v261_v3, %v818_v0  ;;  %v283_v3 = vld [vmem:[%s823_s20 + $0x368] sm:$0xff] }
  0x45   : > { %653 = vst.msk [vmem:[%s842_s25 + $0x280] sm:$0xff] %vm572_vm0, %v524_v11  ;;  %654 = vst.msk [vmem:[%s842_s25 + $0x288] sm:$0xff] %vm572_vm0, %v525_v12  ;;  %v530_v23 = vmul.f32 %v828_v1, %v395_v14  ;;  %v397_v24 = vsub.f32 %v262_v8, %v818_v0  ;;  %v398_v25 = vsub.f32 %v263_v9, %v818_v0  ;;  %v284_v8 = vld [vmem:[%s823_s20 + $0x370] sm:$0xff] }
  0x46   : > { %655 = vst.msk [vmem:[%s842_s25 + $0x290] sm:$0xff] %vm572_vm0, %v526_v13  ;;  %v399_v26 = vsub.f32 %v264_v10, %v818_v0  ;;  %656 = vst.msk [vmem:[%s842_s25 + $0x298] sm:$0xff] %vm572_vm0, %v527_v18  ;;  %v531_v28 = vmul.f32 %v828_v1, %v396_v21  ;;  %v400_v29 = vsub.f32 %v265_v15, %v818_v0  ;;  %v285_v13 = vld [vmem:[%s823_s20 + $0x378] sm:$0xff]  ;;  %v286_v18 = vld [vmem:[%s823_s20 + $0x380] sm:$0xff] }
  0x47   : > { %657 = vst.msk [vmem:[%s842_s25 + $0x2a0] sm:$0xff] %vm572_vm0, %v528_v19  ;;  %658 = vst.msk [vmem:[%s842_s25 + $0x2a8] sm:$0xff] %vm572_vm0, %v529_v20  ;;  %v401_v30 = vsub.f32 %v266_v16, %v818_v0  ;;  %v402_v31 = vsub.f32 %v267_v17, %v818_v0  ;;  %v532_v35 = vmul.f32 %v828_v1, %v397_v24  ;;  %v287_v19 = vld [vmem:[%s823_s20 + $0x388] sm:$0xff]  ;;  %v288_v20 = vld [vmem:[%s823_s20 + $0x390] sm:$0xff] }
  0x48   : > { %659 = vst.msk [vmem:[%s842_s25 + $0x2b0] sm:$0xff] %vm572_vm0, %v530_v23  ;;  %v533_v36 = vmul.f32 %v828_v1, %v398_v25  ;;  %v534_v37 = vmul.f32 %v828_v1, %v399_v26  ;;  %v403_v38 = vsub.f32 %v268_v22, %v818_v0  ;;  %660 = vst.msk [vmem:[%s842_s25 + $0x2b8] sm:$0xff] %vm572_vm0, %v531_v28  ;;  %v289_v25 = vld [vmem:[%s823_s20 + $0x398] sm:$0xff]  ;;  %v290_v26 = vld [vmem:[%s823_s20 + $0x3a0] sm:$0xff] }
  0x49   : > { %v535_v42 = vmul.f32 %v828_v1, %v400_v29  ;;  %v536_v43 = vmul.f32 %v828_v1, %v401_v30  ;;  %v537_v44 = vmul.f32 %v828_v1, %v402_v31  ;;  %v404_v45 = vsub.f32 %v269_v27, %v818_v0  ;;  %661 = vst.msk [vmem:[%s842_s25 + $0x2c0] sm:$0xff] %vm572_vm0, %v532_v35  ;;  %v291_v27 = vld [vmem:[%s823_s20 + $0x3a8] sm:$0xff] }
  0x4a   : > { %662 = vst.msk [vmem:[%s842_s25 + $0x2c8] sm:$0xff] %vm572_vm0, %v533_v36  ;;  %663 = vst.msk [vmem:[%s842_s25 + $0x2d0] sm:$0xff] %vm572_vm0, %v534_v37  ;;  %v538_v47 = vmul.f32 %v828_v1, %v403_v38  ;;  %v405_v48 = vsub.f32 %v270_v32, %v818_v0  ;;  %v406_v49 = vsub.f32 %v271_v33, %v818_v0  ;;  %v292_v32 = vld [vmem:[%s823_s20 + $0x3b0] sm:$0xff]  ;;  %v293_v37 = vld [vmem:[%s823_s20 + $0x3b8] sm:$0xff] }
  0x4b   : > { %v407_v50 = vsub.f32 %v272_v34, %v818_v0  ;;  %664 = vst.msk [vmem:[%s842_s25 + $0x2d8] sm:$0xff] %vm572_vm0, %v535_v42  ;;  %665 = vst.msk [vmem:[%s842_s25 + $0x2e0] sm:$0xff] %vm572_vm0, %v536_v43  ;;  %v539_v52 = vmul.f32 %v828_v1, %v404_v45  ;;  %v408_v53 = vsub.f32 %v273_v39, %v818_v0  ;;  %v294_v42 = vld [vmem:[%s823_s20 + $0x3c0] sm:$0xff]  ;;  %v295_v43 = vld [vmem:[%s823_s20 + $0x3c8] sm:$0xff] }
  0x4c   : > { %666 = vst.msk [vmem:[%s842_s25 + $0x2e8] sm:$0xff] %vm572_vm0, %v537_v44  ;;  %v409_v54 = vsub.f32 %v274_v40, %v818_v0  ;;  %v410_v55 = vsub.f32 %v275_v41, %v818_v0  ;;  %667 = vst.msk [vmem:[%s842_s25 + $0x2f0] sm:$0xff] %vm572_vm0, %v538_v47  ;;  %v540_v59 = vmul.f32 %v828_v1, %v405_v48  ;;  %v296_v44 = vld [vmem:[%s823_s20 + $0x3d0] sm:$0xff] }
  0x4d   : > { %v541_v60 = vmul.f32 %v828_v1, %v406_v49  ;;  %v542_v61 = vmul.f32 %v828_v1, %v407_v50  ;;  %v411_v62 = vsub.f32 %v276_v46, %v818_v0  ;;  %668 = vst.msk [vmem:[%s842_s25 + $0x2f8] sm:$0xff] %vm572_vm0, %v539_v52  ;;  %v543_v4 = vmul.f32 %v828_v1, %v408_v53  ;;  %v297_v49 = vld [vmem:[%s823_s20 + $0x3d8] sm:$0xff]  ;;  %v298_v50 = vld [vmem:[%s823_s20 + $0x3e0] sm:$0xff] }
  0x4e   : > { %v544_v5 = vmul.f32 %v828_v1, %v409_v54  ;;  %v545_v6 = vmul.f32 %v828_v1, %v410_v55  ;;  %v412_v7 = vsub.f32 %v277_v51, %v818_v0  ;;  %669 = vst.msk [vmem:[%s842_s25 + $0x300] sm:$0xff] %vm572_vm0, %v540_v59  ;;  %v413_v10 = vsub.f32 %v278_v56, %v818_v0  ;;  %v299_v51 = vld [vmem:[%s823_s20 + $0x3e8] sm:$0xff]  ;;  %v300_v56 = vld [vmem:[%s823_s20 + $0x3f0] sm:$0xff] }
  0x4f   : > { %670 = vst.msk [vmem:[%s842_s25 + $0x308] sm:$0xff] %vm572_vm0, %v541_v60  ;;  %671 = vst.msk [vmem:[%s842_s25 + $0x310] sm:$0xff] %vm572_vm0, %v542_v61  ;;  %v546_v9 = vmul.f32 %v828_v1, %v411_v62  ;;  %v414_v11 = vsub.f32 %v279_v57, %v818_v0  ;;  %v415_v12 = vsub.f32 %v280_v58, %v818_v0  ;;  %v301_v61 = vld [vmem:[%s823_s20 + $0x3f8] sm:$0xff] }
  0x50   : > { %672 = vst.msk [vmem:[%s842_s25 + $0x318] sm:$0xff] %vm572_vm0, %v543_v4  ;;  %673 = vst.msk [vmem:[%s842_s25 + $0x320] sm:$0xff] %vm572_vm0, %v544_v5  ;;  %v547_v14 = vmul.f32 %v828_v1, %v412_v7  ;;  %v416_v15 = vsub.f32 %v281_v63, %v818_v0  ;;  %v417_v16 = vsub.f32 %v282_v2, %v818_v0 }
  0x51   : > { %674 = vst.msk [vmem:[%s842_s25 + $0x328] sm:$0xff] %vm572_vm0, %v545_v6  ;;  %v418_v17 = vsub.f32 %v283_v3, %v818_v0  ;;  %675 = vst.msk [vmem:[%s842_s25 + $0x330] sm:$0xff] %vm572_vm0, %v546_v9  ;;  %v548_v21 = vmul.f32 %v828_v1, %v413_v10  ;;  %v549_v22 = vmul.f32 %v828_v1, %v414_v11 }
  0x52   : > { %v550_v23 = vmul.f32 %v828_v1, %v415_v12  ;;  %v419_v24 = vsub.f32 %v284_v8, %v818_v0  ;;  %676 = vst.msk [vmem:[%s842_s25 + $0x338] sm:$0xff] %vm572_vm0, %v547_v14  ;;  %v551_v28 = vmul.f32 %v828_v1, %v416_v15  ;;  %v552_v29 = vmul.f32 %v828_v1, %v417_v16 }
  0x53   : > { %v553_v30 = vmul.f32 %v828_v1, %v418_v17  ;;  %v420_v31 = vsub.f32 %v285_v13, %v818_v0  ;;  %677 = vst.msk [vmem:[%s842_s25 + $0x340] sm:$0xff] %vm572_vm0, %v548_v21  ;;  %678 = vst.msk [vmem:[%s842_s25 + $0x348] sm:$0xff] %vm572_vm0, %v549_v22  ;;  %v421_v34 = vsub.f32 %v286_v18, %v818_v0  ;;  %v778_v13 = vld [vmem:[%s1482_s2] ss:$0 sm:$0xff] }
  0x54   : > { %679 = vst.msk [vmem:[%s842_s25 + $0x350] sm:$0xff] %vm572_vm0, %v550_v23  ;;  %v554_v33 = vmul.f32 %v828_v1, %v419_v24  ;;  %v422_v35 = vsub.f32 %v287_v19, %v818_v0  ;;  %v423_v36 = vsub.f32 %v288_v20, %v818_v0  ;;  %680 = vst.msk [vmem:[%s842_s25 + $0x358] sm:$0xff] %vm572_vm0, %v551_v28 }
  0x55   : > { %681 = vst.msk [vmem:[%s842_s25 + $0x360] sm:$0xff] %vm572_vm0, %v552_v29  ;;  %682 = vst.msk [vmem:[%s842_s25 + $0x368] sm:$0xff] %vm572_vm0, %v553_v30  ;;  %v555_v38 = vmul.f32 %v828_v1, %v420_v31  ;;  %v424_v39 = vsub.f32 %v289_v25, %v818_v0  ;;  %v425_v40 = vsub.f32 %v290_v26, %v818_v0 }
  0x56   : > { %v426_v41 = vsub.f32 %v291_v27, %v818_v0  ;;  %683 = vst.msk [vmem:[%s842_s25 + $0x370] sm:$0xff] %vm572_vm0, %v554_v33  ;;  %v556_v45 = vmul.f32 %v828_v1, %v421_v34  ;;  %v557_v46 = vmul.f32 %v828_v1, %v422_v35  ;;  %v558_v47 = vmul.f32 %v828_v1, %v423_v36 }
  0x57   : > { %v427_v48 = vsub.f32 %v292_v32, %v818_v0  ;;  %684 = vst.msk [vmem:[%s842_s25 + $0x378] sm:$0xff] %vm572_vm0, %v555_v38  ;;  %v559_v52 = vmul.f32 %v828_v1, %v424_v39  ;;  %v560_v53 = vmul.f32 %v828_v1, %v425_v40  ;;  %v428_v55 = vsub.f32 %v293_v37, %v818_v0 }
  0x58   : > { %v561_v54 = vmul.f32 %v828_v1, %v426_v41  ;;  %685 = vst.msk [vmem:[%s842_s25 + $0x380] sm:$0xff] %vm572_vm0, %v556_v45  ;;  %686 = vst.msk [vmem:[%s842_s25 + $0x388] sm:$0xff] %vm572_vm0, %v557_v46  ;;  %v429_v58 = vsub.f32 %v294_v42, %v818_v0  ;;  %v430_v59 = vsub.f32 %v295_v43, %v818_v0 }
  0x59   : > { %687 = vst.msk [vmem:[%s842_s25 + $0x390] sm:$0xff] %vm572_vm0, %v558_v47  ;;  %v562_v57 = vmul.f32 %v828_v1, %v427_v48  ;;  %v431_v60 = vsub.f32 %v296_v44, %v818_v0  ;;  %688 = vst.msk [vmem:[%s842_s25 + $0x398] sm:$0xff] %vm572_vm0, %v559_v52  ;;  %v563_v62 = vmul.f32 %v828_v1, %v428_v55 }
  0x5a   : > { %689 = vst.msk [vmem:[%s842_s25 + $0x3a0] sm:$0xff] %vm572_vm0, %v560_v53  ;;  %690 = vst.msk [vmem:[%s842_s25 + $0x3a8] sm:$0xff] %vm572_vm0, %v561_v54  ;;  %v432_v63 = vsub.f32 %v297_v49, %v818_v0  ;;  %v433_v2 = vsub.f32 %v298_v50, %v818_v0  ;;  %v434_v3 = vsub.f32 %v299_v51, %v818_v0 }
  0x5b   : > { %691 = vst.msk [vmem:[%s842_s25 + $0x3b0] sm:$0xff] %vm572_vm0, %v562_v57  ;;  %v564_v4 = vmul.f32 %v828_v1, %v429_v58  ;;  %v565_v5 = vmul.f32 %v828_v1, %v430_v59  ;;  %v566_v6 = vmul.f32 %v828_v1, %v431_v60  ;;  %v435_v7 = vsub.f32 %v300_v56, %v818_v0 }
  0x5c   : > { %692 = vst.msk [vmem:[%s842_s25 + $0x3b8] sm:$0xff] %vm572_vm0, %v563_v62  ;;  %v567_v8 = vmul.f32 %v828_v1, %v432_v63  ;;  %v568_v9 = vmul.f32 %v828_v1, %v433_v2  ;;  %v569_v10 = vmul.f32 %v828_v1, %v434_v3  ;;  %v436_v11 = vsub.f32 %v301_v61, %v818_v0 }
  0x5d   : > { %693 = vst.msk [vmem:[%s842_s25 + $0x3c0] sm:$0xff] %vm572_vm0, %v564_v4  ;;  %694 = vst.msk [vmem:[%s842_s25 + $0x3c8] sm:$0xff] %vm572_vm0, %v565_v5  ;;  %v570_v12 = vmul.f32 %v828_v1, %v435_v7 }
  0x5e   : > { %695 = vst.msk [vmem:[%s842_s25 + $0x3d0] sm:$0xff] %vm572_vm0, %v566_v6  ;;  %696 = vst.msk [vmem:[%s842_s25 + $0x3d8] sm:$0xff] %vm572_vm0, %v567_v8  ;;  %v571_v14 = vmul.f32 %v778_v13, %v436_v11 }
  0x5f   : > { %697 = vst.msk [vmem:[%s842_s25 + $0x3e0] sm:$0xff] %vm572_vm0, %v568_v9  ;;  %698 = vst.msk [vmem:[%s842_s25 + $0x3e8] sm:$0xff] %vm572_vm0, %v569_v10 }
  0x60   : > { %699 = vst.msk [vmem:[%s842_s25 + $0x3f0] sm:$0xff] %vm572_vm0, %v570_v12  ;;  %700 = vst.msk [vmem:[%s842_s25 + $0x3f8] sm:$0xff] %vm572_vm0, %v571_v14 }
  0x61 PF: > { %s13_s12 = sadd.s32 1, %s785_s12  }
  0x62   : > { %p10_p4 = scmp.ge.s32.totalorder %s13_s12, 6  }
  0x64   :  { %12 = sbr.rel (!%p10_p4) target bundleno = 1 (0x1), region = 62 }

// kernel: _lambda_.20
= control target key start
LH: loop header
LB: loop body
LE: loop exit
PB: predicated region body
PF: predicated region fallthrough
CT: control target
= control target key end

     0   :  { %s1457_s12 = smov 0   ;;  %s1459_s13 = smov 0   ;;  %s1650_s0 = inlined_call_operand.vmem [shape: bf16[1024,256], index: 0, kind: input, shape index: {}]   ;;  %s1651_s1 = inlined_call_operand.vmem [shape: bf16[256,128], index: 1, kind: input, shape index: {}]   ;;  %s1652_s2 = inlined_call_operand.vmem [shape: f32[1,128], index: 2, kind: input, shape index: {}]   ;;  %s1653_s3 = inlined_call_operand.vmem [shape: f32[1024,128], index: 3, kind: output, shape index: {}]  }
   0x1   :  { %s1461_s14 = smov 0  }
   0x2 LB: > { %s32_s15 = sadd.s32 1, %s1431_s13  ;;  %p1139_p0 = scmp.ge.s32.totalorder %s1435_s14, 1  ;;  %s1435_s14 = sphi %s1461_s14, %s13_s14   ;;  %s1431_s13 = sphi %s1459_s13, %s1655_s13   ;;  %s1427_s12 = sphi %s1457_s12, %s1654_s12  }
   0x3   : > { %p34_p1 = scmp.ge.s32.totalorder %s32_s15, 4  ;;  %p191_p2 = scmp.lt.s32.totalorder %s1435_s14, 5 }
   0x5   : > { %s1657_s15 = smov (%p34_p1, %s32_s15), 0  ;;  %p192_p3 = pnand %p1139_p0, %p191_p2 }
   0x6   : > { %v1349_v0 = vld [vmem:[%s1651_s1 + $0x40] sm:$0xff] (!%p192_p3)   ;;  %s1140_s18 = sshll.u32 (!%p192_p3), %s1427_s12, 5  ;;  %v1351_v2 = vld [vmem:[%s1651_s1 + $0x48] sm:$0xff] (!%p192_p3)   ;;  %v1353_v4 = vld [vmem:[%s1651_s1 + $0x50] sm:$0xff] (!%p192_p3)  }
   0x7   : > { %195 = sbr.rel (%p192_p3) target bundleno = 317 (0x13d), region = 32  ;;  %v1350_v1 = vld [vmem:[%s1651_s1] sm:$0xff] (!%p192_p3)   ;;  %1197 = vmatprep.subr.bf16.mxu0 (!%p192_p3), %v1349_v0  ;;  %1309 = vmatprep.subr.bf16.mxu1 (!%p192_p3), %v1349_v0  ;;  %v1352_v3 = vld [vmem:[%s1651_s1 + $0x8] sm:$0xff] (!%p192_p3)   ;;  %p236_p4 = scmp.lt.s32.totalorder (!%p192_p3), %s1140_s18, 127  ;;  %v1354_v5 = vld [vmem:[%s1651_s1 + $0x10] sm:$0xff] (!%p192_p3)  }
   0x8   : > { %1198 = vmatpush3.bf16.msra.mxu0 (!%p192_p3), %v1350_v1  ;;  %1317 = vmatpush3.bf16.msra.mxu1 (!%p192_p3), %v1350_v1  ;;  %v1355_v6 = vld [vmem:[%s1651_s1 + $0x58] sm:$0xff] (!%p192_p3)   ;;  %v1357_v8 = vld [vmem:[%s1651_s1 + $0x60] sm:$0xff] (!%p192_p3)   ;;  %v1359_v10 = vld [vmem:[%s1651_s1 + $0x68] sm:$0xff] (!%p192_p3)  }
   0x9   : > { %1199 = vmatprep.subr.bf16.mxu0 (!%p192_p3), %v1351_v2  ;;  %1310 = vmatprep.subr.bf16.mxu1 (!%p192_p3), %v1351_v2  ;;  %v1356_v7 = vld [vmem:[%s1651_s1 + $0x18] sm:$0xff] (!%p192_p3)   ;;  %v1358_v9 = vld [vmem:[%s1651_s1 + $0x20] sm:$0xff] (!%p192_p3)   ;;  %v1360_v13 = vld [vmem:[%s1651_s1 + $0x28] sm:$0xff] (!%p192_p3)  }
   0xa   : > { %v1361_v14 = vld [vmem:[%s1651_s1 + $0x70] sm:$0xff] (!%p192_p3)   ;;  %v1363_v16 = vld [vmem:[%s1651_s1 + $0x78] sm:$0xff] (!%p192_p3)   ;;  %v1568_v51 = vld [vmem:[%s1652_s2] ss:$0 sm:$0xff] (!%p192_p3) }
   0xb   : > { %v1362_v15 = vld [vmem:[%s1651_s1 + $0x30] sm:$0xff] (!%p192_p3)   ;;  %v1364_v17 = vld [vmem:[%s1651_s1 + $0x38] sm:$0xff] (!%p192_p3)  }
   0xc   : > { %1200 = vmatpush3.bf16.msra.mxu0 (!%p192_p3), %v1352_v3  ;;  %1318 = vmatpush3.bf16.msra.mxu1 (!%p192_p3), %v1352_v3 }
   0xd   : > { %1201 = vmatprep.subr.bf16.mxu0 (!%p192_p3), %v1353_v4  ;;  %1311 = vmatprep.subr.bf16.mxu1 (!%p192_p3), %v1353_v4 }
   0xe   : > { %s1659_s18 = smov (!%p236_p4, %s1140_s18), 127 }
   0xf   : > { %s1196_s6 = sshll.u32 %s1659_s18, 3 }
  0x10   : > { %1202 = vmatpush3.bf16.msra.mxu0 %v1354_v5  ;;  %1319 = vmatpush3.bf16.msra.mxu1 %v1354_v5  ;;  %s1510_s11 = scalar_lea.vmem %s1650_s0, %s1196_s6  ;;  %s1577_s8 = scalar_lea.vmem %s1653_s3, %s1196_s6 }
  0x11   : > { %1203 = vmatprep.subr.bf16.mxu0 %v1355_v6  ;;  %1312 = vmatprep.subr.bf16.mxu1 %v1355_v6  ;;  %v1367_v11 = vld [vmem:[%s1510_s11 + $0x4] ss:$8 sps:$4 sm:$0xff]   ;;  %v1365_v18 = vld [vmem:[%s1510_s11] ss:$8 sps:$4 sm:$0xff]   ;;  %v1371_v20 = vld [vmem:[%s1510_s11 + $0x14] ss:$8 sps:$4 sm:$0xff]  }
  0x12   : > { %v1370_v12 = vld [vmem:[%s1510_s11 + $0x84] ss:$8 sps:$4 sm:$0xff]   ;;  %688 = vmatprep.mubr.bf16.mxu0 %v1367_v11  ;;  %v1368_v19 = vld [vmem:[%s1510_s11 + $0x80] ss:$8 sps:$4 sm:$0xff]   ;;  %v1373_v21 = vld [vmem:[%s1510_s11 + $0x94] ss:$8 sps:$4 sm:$0xff]  }
  0x13   : > { %752 = vmatprep.mubr.bf16.mxu1 %v1370_v12  ;;  %v1375_v22 = vld [vmem:[%s1510_s11 + $0x10] ss:$8 sps:$4 sm:$0xff]   ;;  %v1377_v24 = vld [vmem:[%s1510_s11 + $0x24] ss:$8 sps:$4 sm:$0xff]   ;;  %v1381_v26 = vld [vmem:[%s1510_s11 + $0x20] ss:$8 sps:$4 sm:$0xff]  }
  0x14   : > { %1204 = vmatpush3.bf16.msra.mxu0 %v1356_v7  ;;  %1320 = vmatpush3.bf16.msra.mxu1 %v1356_v7  ;;  %v1376_v23 = vld [vmem:[%s1510_s11 + $0x90] ss:$8 sps:$4 sm:$0xff]   ;;  %v1379_v25 = vld [vmem:[%s1510_s11 + $0xa4] ss:$8 sps:$4 sm:$0xff]   ;;  %v1382_v27 = vld [vmem:[%s1510_s11 + $0xa0] ss:$8 sps:$4 sm:$0xff]  }
  0x15   : > { %1205 = vmatprep.subr.bf16.mxu0 %v1357_v8  ;;  %1313 = vmatprep.subr.bf16.mxu1 %v1357_v8  ;;  %v1383_v28 = vld [vmem:[%s1510_s11 + $0x34] ss:$8 sps:$4 sm:$0xff]   ;;  %v1387_v30 = vld [vmem:[%s1510_s11 + $0x30] ss:$8 sps:$4 sm:$0xff]   ;;  %v1389_v32 = vld [vmem:[%s1510_s11 + $0x44] ss:$8 sps:$4 sm:$0xff]  }
  0x16   : > { %v1385_v29 = vld [vmem:[%s1510_s11 + $0xb4] ss:$8 sps:$4 sm:$0xff]   ;;  %v1388_v31 = vld [vmem:[%s1510_s11 + $0xb0] ss:$8 sps:$4 sm:$0xff]   ;;  %v1391_v33 = vld [vmem:[%s1510_s11 + $0xc4] ss:$8 sps:$4 sm:$0xff]  }
  0x17   : > { %v1393_v34 = vld [vmem:[%s1510_s11 + $0x40] ss:$8 sps:$4 sm:$0xff]   ;;  %v1395_v36 = vld [vmem:[%s1510_s11 + $0x54] ss:$8 sps:$4 sm:$0xff]   ;;  %v1399_v38 = vld [vmem:[%s1510_s11 + $0x50] ss:$8 sps:$4 sm:$0xff]  }
  0x18   : > { %1206 = vmatpush3.bf16.msra.mxu0 %v1358_v9  ;;  %1321 = vmatpush3.bf16.msra.mxu1 %v1358_v9  ;;  %v1394_v35 = vld [vmem:[%s1510_s11 + $0xc0] ss:$8 sps:$4 sm:$0xff]   ;;  %v1397_v37 = vld [vmem:[%s1510_s11 + $0xd4] ss:$8 sps:$4 sm:$0xff]   ;;  %v1400_v39 = vld [vmem:[%s1510_s11 + $0xd0] ss:$8 sps:$4 sm:$0xff]  }
  0x19   : > { %1207 = vmatprep.subr.bf16.mxu0 %v1359_v10  ;;  %1314 = vmatprep.subr.bf16.mxu1 %v1359_v10  ;;  %v1401_v40 = vld [vmem:[%s1510_s11 + $0x64] ss:$8 sps:$4 sm:$0xff]   ;;  %v1405_v42 = vld [vmem:[%s1510_s11 + $0x60] ss:$8 sps:$4 sm:$0xff]   ;;  %v1407_v44 = vld [vmem:[%s1510_s11 + $0x74] ss:$8 sps:$4 sm:$0xff]  }
  0x1a   : > { %v1403_v41 = vld [vmem:[%s1510_s11 + $0xe4] ss:$8 sps:$4 sm:$0xff]   ;;  %v1406_v43 = vld [vmem:[%s1510_s11 + $0xe0] ss:$8 sps:$4 sm:$0xff]   ;;  %v1409_v45 = vld [vmem:[%s1510_s11 + $0xf4] ss:$8 sps:$4 sm:$0xff]  }
  0x1b   : > { %v1411_v46 = vld [vmem:[%s1510_s11 + $0x70] ss:$8 sps:$4 sm:$0xff]  }
  0x1c   : > { %1208 = vmatpush3.bf16.msra.mxu0 %v1360_v13  ;;  %1322 = vmatpush3.bf16.msra.mxu1 %v1360_v13  ;;  %v1412_v47 = vld [vmem:[%s1510_s11 + $0xf0] ss:$8 sps:$4 sm:$0xff]  }
  0x1d   : > { %1209 = vmatprep.subr.bf16.mxu0 %v1361_v14  ;;  %1315 = vmatprep.subr.bf16.mxu1 %v1361_v14 }
  0x20   : > { %1210 = vmatpush3.bf16.msra.mxu0 %v1362_v15  ;;  %1323 = vmatpush3.bf16.msra.mxu1 %v1362_v15 }
  0x21   : > { %1211 = vmatprep.subr.bf16.mxu0 %v1363_v16  ;;  %1316 = vmatprep.subr.bf16.mxu1 %v1363_v16 }
  0x24   : > { %1212 = vmatpush3.bf16.msra.mxu0 %v1364_v17  ;;  %1324 = vmatpush3.bf16.msra.mxu1 %v1364_v17 }
  0x27   : > { %689 = vmatmul.mubr.bf16.vlgmr.msra.gmra.mrb[0].mxu0 %v1365_v18  ;;  %753 = vmatmul.mubr.bf16.vlgmr.msra.gmra.mrb[0].mxu1 %v1368_v19 }
  0x28   : > { %696 = vmatprep.mubr.bf16.mxu0 %v1371_v20  ;;  %760 = vmatprep.mubr.bf16.mxu1 %v1373_v21 }
  0x2f   : > { %697 = vmatmul.mubr.bf16.gmra.mrb[4].mxu0 %v1375_v22  ;;  %761 = vmatmul.mubr.bf16.gmra.mrb[4].mxu1 %v1376_v23 }
  0x30   : > { %704 = vmatprep.mubr.bf16.mxu0 %v1377_v24  ;;  %768 = vmatprep.mubr.bf16.mxu1 %v1379_v25 }
  0x37   : > { %705 = vmatmul.mubr.bf16.gmra.mrb[8].mxu0 %v1381_v26  ;;  %769 = vmatmul.mubr.bf16.gmra.mrb[8].mxu1 %v1382_v27 }
  0x38   : > { %712 = vmatprep.mubr.bf16.mxu0 %v1383_v28  ;;  %776 = vmatprep.mubr.bf16.mxu1 %v1385_v29 }
  0x3f   : > { %713 = vmatmul.mubr.bf16.gmra.mrb[12].mxu0 %v1387_v30  ;;  %777 = vmatmul.mubr.bf16.gmra.mrb[12].mxu1 %v1388_v31 }
  0x40   : > { %720 = vmatprep.mubr.bf16.mxu0 %v1389_v32  ;;  %784 = vmatprep.mubr.bf16.mxu1 %v1391_v33 }
  0x47   : > { %721 = vmatmul.mubr.bf16.gmra.mrb[16].mxu0 %v1393_v34  ;;  %785 = vmatmul.mubr.bf16.gmra.mrb[16].mxu1 %v1394_v35 }
  0x48   : > { %728 = vmatprep.mubr.bf16.mxu0 %v1395_v36  ;;  %792 = vmatprep.mubr.bf16.mxu1 %v1397_v37 }
  0x4f   : > { %729 = vmatmul.mubr.bf16.gmra.mrb[20].mxu0 %v1399_v38  ;;  %793 = vmatmul.mubr.bf16.gmra.mrb[20].mxu1 %v1400_v39 }
  0x50   : > { %736 = vmatprep.mubr.bf16.mxu0 %v1401_v40  ;;  %800 = vmatprep.mubr.bf16.mxu1 %v1403_v41 }
  0x57   : > { %737 = vmatmul.mubr.bf16.gmra.mrb[24].mxu0 %v1405_v42  ;;  %801 = vmatmul.mubr.bf16.gmra.mrb[24].mxu1 %v1406_v43 }
  0x58   : > { %744 = vmatprep.mubr.bf16.mxu0 %v1407_v44  ;;  %808 = vmatprep.mubr.bf16.mxu1 %v1409_v45 }
  0x5f   : > { %745 = vmatmul.mubr.bf16.gmra.mrb[28].mxu0 %v1411_v46  ;;  %809 = vmatmul.mubr.bf16.gmra.mrb[28].mxu1 %v1412_v47 }
  0xfa   : > { %v1213_v48 = vpop.f32.mrb[0].mxu0  ;;  %v1261_v49 = vpop.f32.mrb[0].mxu1 }
  0xfb   : > { %v1214_v50 = vpop.f32.mrb[1].mxu0  ;;  %v1262_v52 = vpop.f32.mrb[1].mxu1 }
  0xfc   : > { %v1215_v53 = vadd.f32 %v1214_v50, %v1213_v48  ;;  %v1263_v54 = vadd.f32 %v1262_v52, %v1261_v49  ;;  %v1216_v55 = vpop.f32.mrb[2].mxu0  ;;  %v1264_v56 = vpop.f32.mrb[2].mxu1 }
  0xfd   : > { %v1217_v57 = vpop.f32.mrb[3].mxu0  ;;  %v1265_v58 = vpop.f32.mrb[3].mxu1 }
  0xfe   : > { %v923_v59 = vadd.f32 %v1215_v53, %v1568_v51  ;;  %v939_v60 = vadd.f32 %v1263_v54, %v1568_v51  ;;  %v1218_v61 = vadd.f32 %v1217_v57, %v1216_v55  ;;  %v1266_v62 = vadd.f32 %v1265_v58, %v1264_v56 }
 0x100   : > { %v955_v63 = vmax.f32 %v923_v59, 0.0  ;;  %v971_v0 = vmax.f32 %v939_v60, 0.0  ;;  %v924_v1 = vadd.f32 %v1218_v61, %v1568_v51  ;;  %v940_v2 = vadd.f32 %v1266_v62, %v1568_v51 }
 0x102   : > { %987 = vst [vmem:[%s1577_s8] sm:$0xff] %v955_v63  ;;  %1003 = vst [vmem:[%s1577_s8 + $0x80] sm:$0xff] %v971_v0  ;;  %v956_v3 = vmax.f32 %v924_v1, 0.0  ;;  %v972_v4 = vmax.f32 %v940_v2, 0.0  ;;  %v1219_v5 = vpop.f32.mrb[4].mxu0  ;;  %v1267_v6 = vpop.f32.mrb[4].mxu1 }
 0x103   : > { %v1220_v7 = vpop.f32.mrb[5].mxu0  ;;  %v1268_v8 = vpop.f32.mrb[5].mxu1 }
 0x104   : > { %988 = vst [vmem:[%s1577_s8 + $0x8] sm:$0xff] %v956_v3  ;;  %1004 = vst [vmem:[%s1577_s8 + $0x88] sm:$0xff] %v972_v4  ;;  %v1221_v9 = vadd.f32 %v1220_v7, %v1219_v5  ;;  %v1269_v10 = vadd.f32 %v1268_v8, %v1267_v6  ;;  %v1222_v11 = vpop.f32.mrb[6].mxu0  ;;  %v1270_v12 = vpop.f32.mrb[6].mxu1 }
 0x105   : > { %v1223_v13 = vpop.f32.mrb[7].mxu0  ;;  %v1271_v14 = vpop.f32.mrb[7].mxu1 }
 0x106   : > { %v925_v15 = vadd.f32 %v1221_v9, %v1568_v51  ;;  %v941_v16 = vadd.f32 %v1269_v10, %v1568_v51  ;;  %v1224_v17 = vadd.f32 %v1223_v13, %v1222_v11  ;;  %v1272_v18 = vadd.f32 %v1271_v14, %v1270_v12 }
 0x108   : > { %v957_v19 = vmax.f32 %v925_v15, 0.0  ;;  %v973_v20 = vmax.f32 %v941_v16, 0.0  ;;  %v926_v21 = vadd.f32 %v1224_v17, %v1568_v51  ;;  %v942_v22 = vadd.f32 %v1272_v18, %v1568_v51 }
 0x10a   : > { %989 = vst [vmem:[%s1577_s8 + $0x10] sm:$0xff] %v957_v19  ;;  %1005 = vst [vmem:[%s1577_s8 + $0x90] sm:$0xff] %v973_v20  ;;  %v958_v23 = vmax.f32 %v926_v21, 0.0  ;;  %v974_v24 = vmax.f32 %v942_v22, 0.0  ;;  %v1225_v25 = vpop.f32.mrb[8].mxu0  ;;  %v1273_v26 = vpop.f32.mrb[8].mxu1 }
 0x10b   : > { %v1226_v27 = vpop.f32.mrb[9].mxu0  ;;  %v1274_v28 = vpop.f32.mrb[9].mxu1 }
 0x10c   : > { %990 = vst [vmem:[%s1577_s8 + $0x18] sm:$0xff] %v958_v23  ;;  %1006 = vst [vmem:[%s1577_s8 + $0x98] sm:$0xff] %v974_v24  ;;  %v1227_v29 = vadd.f32 %v1226_v27, %v1225_v25  ;;  %v1275_v30 = vadd.f32 %v1274_v28, %v1273_v26  ;;  %v1228_v31 = vpop.f32.mrb[10].mxu0  ;;  %v1276_v32 = vpop.f32.mrb[10].mxu1 }
 0x10d   : > { %v1229_v33 = vpop.f32.mrb[11].mxu0  ;;  %v1277_v34 = vpop.f32.mrb[11].mxu1 }
 0x10e   : > { %v927_v35 = vadd.f32 %v1227_v29, %v1568_v51  ;;  %v943_v36 = vadd.f32 %v1275_v30, %v1568_v51  ;;  %v1230_v37 = vadd.f32 %v1229_v33, %v1228_v31  ;;  %v1278_v38 = vadd.f32 %v1277_v34, %v1276_v32 }
 0x110   : > { %v959_v39 = vmax.f32 %v927_v35, 0.0  ;;  %v975_v40 = vmax.f32 %v943_v36, 0.0  ;;  %v928_v41 = vadd.f32 %v1230_v37, %v1568_v51  ;;  %v944_v42 = vadd.f32 %v1278_v38, %v1568_v51 }
 0x112   : > { %991 = vst [vmem:[%s1577_s8 + $0x20] sm:$0xff] %v959_v39  ;;  %1007 = vst [vmem:[%s1577_s8 + $0xa0] sm:$0xff] %v975_v40  ;;  %v960_v43 = vmax.f32 %v928_v41, 0.0  ;;  %v976_v44 = vmax.f32 %v944_v42, 0.0  ;;  %v1231_v45 = vpop.f32.mrb[12].mxu0  ;;  %v1279_v46 = vpop.f32.mrb[12].mxu1 }
 0x113   : > { %v1232_v47 = vpop.f32.mrb[13].mxu0  ;;  %v1280_v48 = vpop.f32.mrb[13].mxu1 }
 0x114   : > { %992 = vst [vmem:[%s1577_s8 + $0x28] sm:$0xff] %v960_v43  ;;  %1008 = vst [vmem:[%s1577_s8 + $0xa8] sm:$0xff] %v976_v44  ;;  %v1233_v49 = vadd.f32 %v1232_v47, %v1231_v45  ;;  %v1281_v50 = vadd.f32 %v1280_v48, %v1279_v46  ;;  %v1234_v52 = vpop.f32.mrb[14].mxu0  ;;  %v1282_v53 = vpop.f32.mrb[14].mxu1 }
 0x115   : > { %v1235_v54 = vpop.f32.mrb[15].mxu0  ;;  %v1283_v55 = vpop.f32.mrb[15].mxu1 }
 0x116   : > { %v929_v56 = vadd.f32 %v1233_v49, %v1568_v51  ;;  %v945_v57 = vadd.f32 %v1281_v50, %v1568_v51  ;;  %v1236_v58 = vadd.f32 %v1235_v54, %v1234_v52  ;;  %v1284_v59 = vadd.f32 %v1283_v55, %v1282_v53 }
 0x118   : > { %v961_v60 = vmax.f32 %v929_v56, 0.0  ;;  %v977_v61 = vmax.f32 %v945_v57, 0.0  ;;  %v930_v62 = vadd.f32 %v1236_v58, %v1568_v51  ;;  %v946_v63 = vadd.f32 %v1284_v59, %v1568_v51 }
 0x11a   : > { %993 = vst [vmem:[%s1577_s8 + $0x30] sm:$0xff] %v961_v60  ;;  %1009 = vst [vmem:[%s1577_s8 + $0xb0] sm:$0xff] %v977_v61  ;;  %v962_v0 = vmax.f32 %v930_v62, 0.0  ;;  %v978_v1 = vmax.f32 %v946_v63, 0.0  ;;  %v1237_v2 = vpop.f32.mrb[16].mxu0  ;;  %v1285_v3 = vpop.f32.mrb[16].mxu1 }
 0x11b   : > { %v1238_v4 = vpop.f32.mrb[17].mxu0  ;;  %v1286_v5 = vpop.f32.mrb[17].mxu1 }
 0x11c   : > { %994 = vst [vmem:[%s1577_s8 + $0x38] sm:$0xff] %v962_v0  ;;  %1010 = vst [vmem:[%s1577_s8 + $0xb8] sm:$0xff] %v978_v1  ;;  %v1239_v6 = vadd.f32 %v1238_v4, %v1237_v2  ;;  %v1287_v7 = vadd.f32 %v1286_v5, %v1285_v3  ;;  %v1240_v8 = vpop.f32.mrb[18].mxu0  ;;  %v1288_v9 = vpop.f32.mrb[18].mxu1 }
 0x11d   : > { %v1241_v10 = vpop.f32.mrb[19].mxu0  ;;  %v1289_v11 = vpop.f32.mrb[19].mxu1 }
 0x11e   : > { %v931_v12 = vadd.f32 %v1239_v6, %v1568_v51  ;;  %v947_v13 = vadd.f32 %v1287_v7, %v1568_v51  ;;  %v1242_v14 = vadd.f32 %v1241_v10, %v1240_v8  ;;  %v1290_v15 = vadd.f32 %v1289_v11, %v1288_v9 }
 0x120   : > { %v963_v16 = vmax.f32 %v931_v12, 0.0  ;;  %v979_v17 = vmax.f32 %v947_v13, 0.0  ;;  %v932_v18 = vadd.f32 %v1242_v14, %v1568_v51  ;;  %v948_v19 = vadd.f32 %v1290_v15, %v1568_v51 }
 0x122   : > { %995 = vst [vmem:[%s1577_s8 + $0x40] sm:$0xff] %v963_v16  ;;  %1011 = vst [vmem:[%s1577_s8 + $0xc0] sm:$0xff] %v979_v17  ;;  %v964_v20 = vmax.f32 %v932_v18, 0.0  ;;  %v980_v21 = vmax.f32 %v948_v19, 0.0  ;;  %v1243_v22 = vpop.f32.mrb[20].mxu0  ;;  %v1291_v23 = vpop.f32.mrb[20].mxu1 }
 0x123   : > { %v1244_v24 = vpop.f32.mrb[21].mxu0  ;;  %v1292_v25 = vpop.f32.mrb[21].mxu1 }
 0x124   : > { %996 = vst [vmem:[%s1577_s8 + $0x48] sm:$0xff] %v964_v20  ;;  %1012 = vst [vmem:[%s1577_s8 + $0xc8] sm:$0xff] %v980_v21  ;;  %v1245_v26 = vadd.f32 %v1244_v24, %v1243_v22  ;;  %v1293_v27 = vadd.f32 %v1292_v25, %v1291_v23  ;;  %v1246_v28 = vpop.f32.mrb[22].mxu0  ;;  %v1294_v29 = vpop.f32.mrb[22].mxu1 }
 0x125   : > { %v1247_v30 = vpop.f32.mrb[23].mxu0  ;;  %v1295_v31 = vpop.f32.mrb[23].mxu1 }
 0x126   : > { %v933_v32 = vadd.f32 %v1245_v26, %v1568_v51  ;;  %v949_v33 = vadd.f32 %v1293_v27, %v1568_v51  ;;  %v1248_v34 = vadd.f32 %v1247_v30, %v1246_v28  ;;  %v1296_v35 = vadd.f32 %v1295_v31, %v1294_v29 }
 0x128   : > { %v965_v36 = vmax.f32 %v933_v32, 0.0  ;;  %v981_v37 = vmax.f32 %v949_v33, 0.0  ;;  %v934_v38 = vadd.f32 %v1248_v34, %v1568_v51  ;;  %v950_v39 = vadd.f32 %v1296_v35, %v1568_v51 }
 0x12a   : > { %997 = vst [vmem:[%s1577_s8 + $0x50] sm:$0xff] %v965_v36  ;;  %1013 = vst [vmem:[%s1577_s8 + $0xd0] sm:$0xff] %v981_v37  ;;  %v966_v40 = vmax.f32 %v934_v38, 0.0  ;;  %v982_v41 = vmax.f32 %v950_v39, 0.0  ;;  %v1249_v42 = vpop.f32.mrb[24].mxu0  ;;  %v1297_v43 = vpop.f32.mrb[24].mxu1 }
 0x12b   : > { %v1250_v44 = vpop.f32.mrb[25].mxu0  ;;  %v1298_v45 = vpop.f32.mrb[25].mxu1 }
 0x12c   : > { %998 = vst [vmem:[%s1577_s8 + $0x58] sm:$0xff] %v966_v40  ;;  %1014 = vst [vmem:[%s1577_s8 + $0xd8] sm:$0xff] %v982_v41  ;;  %v1251_v46 = vadd.f32 %v1250_v44, %v1249_v42  ;;  %v1299_v47 = vadd.f32 %v1298_v45, %v1297_v43  ;;  %v1252_v48 = vpop.f32.mrb[26].mxu0  ;;  %v1300_v49 = vpop.f32.mrb[26].mxu1 }
 0x12d   : > { %v1253_v50 = vpop.f32.mrb[27].mxu0  ;;  %v1301_v52 = vpop.f32.mrb[27].mxu1 }
 0x12e   : > { %v935_v53 = vadd.f32 %v1251_v46, %v1568_v51  ;;  %v951_v54 = vadd.f32 %v1299_v47, %v1568_v51  ;;  %v1254_v55 = vadd.f32 %v1253_v50, %v1252_v48  ;;  %v1302_v56 = vadd.f32 %v1301_v52, %v1300_v49 }
 0x130   : > { %v967_v57 = vmax.f32 %v935_v53, 0.0  ;;  %v983_v58 = vmax.f32 %v951_v54, 0.0  ;;  %v936_v59 = vadd.f32 %v1254_v55, %v1568_v51  ;;  %v952_v60 = vadd.f32 %v1302_v56, %v1568_v51 }
 0x132   : > { %999 = vst [vmem:[%s1577_s8 + $0x60] sm:$0xff] %v967_v57  ;;  %1015 = vst [vmem:[%s1577_s8 + $0xe0] sm:$0xff] %v983_v58  ;;  %v968_v61 = vmax.f32 %v936_v59, 0.0  ;;  %v984_v62 = vmax.f32 %v952_v60, 0.0  ;;  %v1255_v63 = vpop.f32.mrb[28].mxu0  ;;  %v1303_v0 = vpop.f32.mrb[28].mxu1 }
 0x133   : > { %v1256_v1 = vpop.f32.mrb[29].mxu0  ;;  %v1304_v2 = vpop.f32.mrb[29].mxu1 }
 0x134   : > { %1000 = vst [vmem:[%s1577_s8 + $0x68] sm:$0xff] %v968_v61  ;;  %1016 = vst [vmem:[%s1577_s8 + $0xe8] sm:$0xff] %v984_v62  ;;  %v1257_v3 = vadd.f32 %v1256_v1, %v1255_v63  ;;  %v1305_v4 = vadd.f32 %v1304_v2, %v1303_v0  ;;  %v1258_v5 = vpop.f32.mrb[30].mxu0  ;;  %v1306_v6 = vpop.f32.mrb[30].mxu1 }
 0x135   : > { %v1259_v7 = vpop.f32.mrb[31].mxu0  ;;  %v1307_v8 = vpop.f32.mrb[31].mxu1 }
 0x136   : > { %v937_v9 = vadd.f32 %v1257_v3, %v1568_v51  ;;  %v953_v10 = vadd.f32 %v1305_v4, %v1568_v51  ;;  %v1260_v11 = vadd.f32 %v1259_v7, %v1258_v5  ;;  %v1308_v12 = vadd.f32 %v1307_v8, %v1306_v6 }
 0x138   : > { %v969_v13 = vmax.f32 %v937_v9, 0.0  ;;  %v985_v14 = vmax.f32 %v953_v10, 0.0  ;;  %v938_v15 = vadd.f32 %v1260_v11, %v1568_v51  ;;  %v954_v16 = vadd.f32 %v1308_v12, %v1568_v51 }
 0x13a   : > { %1001 = vst [vmem:[%s1577_s8 + $0x70] sm:$0xff] %v969_v13  ;;  %1017 = vst [vmem:[%s1577_s8 + $0xf0] sm:$0xff] %v985_v14  ;;  %v970_v17 = vmax.f32 %v938_v15, 0.0  ;;  %v986_v18 = vmax.f32 %v954_v16, 0.0 }
 0x13c   : > { %1002 = vst [vmem:[%s1577_s8 + $0x78] sm:$0xff] %v970_v17  ;;  %1018 = vst [vmem:[%s1577_s8 + $0xf8] sm:$0xff] %v986_v18 }
 0x13d PF: > { %s13_s14 = sadd.s32 1, %s1435_s14   ;;  %s1654_s12 = smov %s1431_s13 }
 0x13e   : > { %p10_p5 = scmp.ge.s32.totalorder %s13_s14, 6   ;;  %s1655_s13 = smov %s1657_s15 }
 0x140   :  { %12 = sbr.rel (!%p10_p5) target bundleno = 2 (0x2), region = 76 }

// kernel: _lambda_.21
= control target key start
LH: loop header
LB: loop body
LE: loop exit
PB: predicated region body
PF: predicated region fallthrough
CT: control target
= control target key end

     0   :  { %s1004_s1 = inlined_call_operand.vmem [shape: bf16[128,128], index: 1, kind: input, shape index: {}]   ;;  %s1005_s0 = inlined_call_operand.vmem [shape: bf16[256,128], index: 0, kind: input, shape index: {}]   ;;  %s1006_s2 = inlined_call_operand.vmem [shape: f32[1,128], index: 2, kind: input, shape index: {}]   ;;  %s1007_s3 = inlined_call_operand.vmem [shape: f32[256,128], index: 3, kind: output, shape index: {}]  }
   0x1   :  { %v755_v0 = vld [vmem:[%s1004_s1] sm:$0xff]   ;;  %v756_v1 = vld [vmem:[%s1004_s1 + $0x8] sm:$0xff]   ;;  %v757_v2 = vld [vmem:[%s1004_s1 + $0x10] sm:$0xff]  }
   0x2   :  { %691 = vmatprep.subr.bf16.mxu0 %v755_v0  ;;  %739 = vmatprep.subr.bf16.mxu1 %v755_v0  ;;  %v758_v3 = vld [vmem:[%s1004_s1 + $0x18] sm:$0xff]   ;;  %v763_v4 = vld [vmem:[%s1005_s0] sm:$0xff]   ;;  %v760_v7 = vld [vmem:[%s1004_s1 + $0x28] sm:$0xff]  }
   0x3   :  { %692 = vmatpush3.bf16.msra.mxu0 %v755_v0  ;;  %747 = vmatpush3.bf16.msra.mxu1 %v755_v0  ;;  %v764_v5 = vld [vmem:[%s1005_s0 + $0x40] sm:$0xff]   ;;  %v761_v8 = vld [vmem:[%s1004_s1 + $0x30] sm:$0xff]   ;;  %v762_v9 = vld [vmem:[%s1004_s1 + $0x38] sm:$0xff]  }
   0x4   :  { %693 = vmatprep.subr.bf16.mxu0 %v756_v1  ;;  %740 = vmatprep.subr.bf16.mxu1 %v756_v1  ;;  %v759_v6 = vld [vmem:[%s1004_s1 + $0x20] sm:$0xff]   ;;  %v765_v10 = vld [vmem:[%s1005_s0 + $0x8] sm:$0xff]   ;;  %v767_v12 = vld [vmem:[%s1005_s0 + $0x10] sm:$0xff]  }
   0x5   :  { %707 = vmatprep.mubr.bf16.mxu0 %v763_v4  ;;  %723 = vmatprep.mubr.bf16.mxu1 %v764_v5  ;;  %v766_v11 = vld [vmem:[%s1005_s0 + $0x48] sm:$0xff]   ;;  %v768_v13 = vld [vmem:[%s1005_s0 + $0x50] sm:$0xff]   ;;  %v769_v14 = vld [vmem:[%s1005_s0 + $0x18] sm:$0xff]  }
   0x6   :  { %v770_v15 = vld [vmem:[%s1005_s0 + $0x58] sm:$0xff]   ;;  %v771_v16 = vld [vmem:[%s1005_s0 + $0x20] sm:$0xff]   ;;  %v773_v18 = vld [vmem:[%s1005_s0 + $0x28] sm:$0xff]  }
   0x7   :  { %694 = vmatpush3.bf16.msra.mxu0 %v756_v1  ;;  %748 = vmatpush3.bf16.msra.mxu1 %v756_v1  ;;  %v772_v17 = vld [vmem:[%s1005_s0 + $0x60] sm:$0xff]   ;;  %v774_v19 = vld [vmem:[%s1005_s0 + $0x68] sm:$0xff]   ;;  %v775_v20 = vld [vmem:[%s1005_s0 + $0x30] sm:$0xff]  }
   0x8   :  { %695 = vmatprep.subr.bf16.mxu0 %v757_v2  ;;  %741 = vmatprep.subr.bf16.mxu1 %v757_v2  ;;  %v776_v21 = vld [vmem:[%s1005_s0 + $0x70] sm:$0xff]   ;;  %v777_v22 = vld [vmem:[%s1005_s0 + $0x38] sm:$0xff]   ;;  %v874_v24 = vld [vmem:[%s1006_s2] ss:$0 sm:$0xff] }
   0x9   :  { %v778_v23 = vld [vmem:[%s1005_s0 + $0x78] sm:$0xff]  }
   0xb   :  { %696 = vmatpush3.bf16.msra.mxu0 %v757_v2  ;;  %749 = vmatpush3.bf16.msra.mxu1 %v757_v2 }
   0xc   :  { %697 = vmatprep.subr.bf16.mxu0 %v758_v3  ;;  %742 = vmatprep.subr.bf16.mxu1 %v758_v3 }
   0xf   :  { %698 = vmatpush3.bf16.msra.mxu0 %v758_v3  ;;  %750 = vmatpush3.bf16.msra.mxu1 %v758_v3 }
  0x10   :  { %699 = vmatprep.subr.bf16.mxu0 %v759_v6  ;;  %743 = vmatprep.subr.bf16.mxu1 %v759_v6 }
  0x13   :  { %700 = vmatpush3.bf16.msra.mxu0 %v759_v6  ;;  %751 = vmatpush3.bf16.msra.mxu1 %v759_v6 }
  0x14   :  { %701 = vmatprep.subr.bf16.mxu0 %v760_v7  ;;  %744 = vmatprep.subr.bf16.mxu1 %v760_v7 }
  0x17   :  { %702 = vmatpush3.bf16.msra.mxu0 %v760_v7  ;;  %752 = vmatpush3.bf16.msra.mxu1 %v760_v7 }
  0x18   :  { %703 = vmatprep.subr.bf16.mxu0 %v761_v8  ;;  %745 = vmatprep.subr.bf16.mxu1 %v761_v8 }
  0x1b   :  { %704 = vmatpush3.bf16.msra.mxu0 %v761_v8  ;;  %753 = vmatpush3.bf16.msra.mxu1 %v761_v8 }
  0x1c   :  { %705 = vmatprep.subr.bf16.mxu0 %v762_v9  ;;  %746 = vmatprep.subr.bf16.mxu1 %v762_v9 }
  0x1f   :  { %706 = vmatpush3.bf16.msra.mxu0 %v762_v9  ;;  %754 = vmatpush3.bf16.msra.mxu1 %v762_v9 }
  0x22   :  { %708 = vmatmul.mubr.bf16.vlgmr.msra.gmra.mrb[0].mxu0 %v765_v10  ;;  %724 = vmatmul.mubr.bf16.vlgmr.msra.gmra.mrb[0].mxu1 %v766_v11 }
  0x23   :  { %711 = vmatprep.mubr.bf16.mxu0 %v767_v12  ;;  %727 = vmatprep.mubr.bf16.mxu1 %v768_v13 }
  0x2a   :  { %712 = vmatmul.mubr.bf16.gmra.mrb[4].mxu0 %v769_v14  ;;  %728 = vmatmul.mubr.bf16.gmra.mrb[4].mxu1 %v770_v15 }
  0x2b   :  { %715 = vmatprep.mubr.bf16.mxu0 %v771_v16  ;;  %731 = vmatprep.mubr.bf16.mxu1 %v772_v17 }
  0x32   :  { %716 = vmatmul.mubr.bf16.gmra.mrb[8].mxu0 %v773_v18  ;;  %732 = vmatmul.mubr.bf16.gmra.mrb[8].mxu1 %v774_v19 }
  0x33   :  { %719 = vmatprep.mubr.bf16.mxu0 %v775_v20  ;;  %735 = vmatprep.mubr.bf16.mxu1 %v776_v21 }
  0x3a   :  { %720 = vmatmul.mubr.bf16.gmra.mrb[12].mxu0 %v777_v22  ;;  %736 = vmatmul.mubr.bf16.gmra.mrb[12].mxu1 %v778_v23 }
  0xf5   :  { %v709_v25 = vpop.f32.mrb[0].mxu0  ;;  %v725_v26 = vpop.f32.mrb[0].mxu1 }
  0xf6   :  { %v544_v27 = vadd.f32 %v709_v25, %v874_v24  ;;  %v560_v28 = vadd.f32 %v725_v26, %v874_v24  ;;  %v309_v29 = vpop.f32.mrb[1].mxu0  ;;  %v373_v30 = vpop.f32.mrb[1].mxu1 }
  0xf7   :  { %v542_v31 = vadd.f32 %v874_v24, %v309_v29  ;;  %v558_v32 = vadd.f32 %v874_v24, %v373_v30  ;;  %v710_v33 = vpop.f32.mrb[2].mxu0  ;;  %v726_v34 = vpop.f32.mrb[2].mxu1 }
  0xf8   :  { %v576_v35 = vmax.f32 %v544_v27, 0.0  ;;  %v592_v36 = vmax.f32 %v560_v28, 0.0  ;;  %v545_v37 = vadd.f32 %v710_v33, %v874_v24  ;;  %v561_v38 = vadd.f32 %v726_v34, %v874_v24  ;;  %v312_v39 = vpop.f32.mrb[3].mxu0  ;;  %v376_v40 = vpop.f32.mrb[3].mxu1 }
  0xf9   :  { %v574_v41 = vmax.f32 %v542_v31, 0.0  ;;  %v590_v42 = vmax.f32 %v558_v32, 0.0  ;;  %v543_v43 = vadd.f32 %v874_v24, %v312_v39  ;;  %v559_v44 = vadd.f32 %v874_v24, %v376_v40 }
  0xfa   :  { %608 = vst [vmem:[%s1007_s3 + $0x10] sm:$0xff] %v576_v35  ;;  %624 = vst [vmem:[%s1007_s3 + $0x90] sm:$0xff] %v592_v36  ;;  %v577_v45 = vmax.f32 %v545_v37, 0.0  ;;  %v593_v46 = vmax.f32 %v561_v38, 0.0 }
  0xfb   :  { %606 = vst [vmem:[%s1007_s3] sm:$0xff] %v574_v41  ;;  %622 = vst [vmem:[%s1007_s3 + $0x80] sm:$0xff] %v590_v42  ;;  %v575_v47 = vmax.f32 %v543_v43, 0.0  ;;  %v591_v48 = vmax.f32 %v559_v44, 0.0 }
  0xfc   :  { %609 = vst [vmem:[%s1007_s3 + $0x18] sm:$0xff] %v577_v45  ;;  %625 = vst [vmem:[%s1007_s3 + $0x98] sm:$0xff] %v593_v46 }
  0xfd   :  { %607 = vst [vmem:[%s1007_s3 + $0x8] sm:$0xff] %v575_v47  ;;  %623 = vst [vmem:[%s1007_s3 + $0x88] sm:$0xff] %v591_v48  ;;  %v713_v49 = vpop.f32.mrb[4].mxu0  ;;  %v729_v50 = vpop.f32.mrb[4].mxu1 }
  0xfe   :  { %v548_v51 = vadd.f32 %v713_v49, %v874_v24  ;;  %v564_v52 = vadd.f32 %v729_v50, %v874_v24  ;;  %v325_v53 = vpop.f32.mrb[5].mxu0  ;;  %v389_v54 = vpop.f32.mrb[5].mxu1 }
  0xff   :  { %v546_v55 = vadd.f32 %v874_v24, %v325_v53  ;;  %v562_v56 = vadd.f32 %v874_v24, %v389_v54  ;;  %v714_v57 = vpop.f32.mrb[6].mxu0  ;;  %v730_v58 = vpop.f32.mrb[6].mxu1 }
 0x100   :  { %v580_v59 = vmax.f32 %v548_v51, 0.0  ;;  %v596_v60 = vmax.f32 %v564_v52, 0.0  ;;  %v549_v61 = vadd.f32 %v714_v57, %v874_v24  ;;  %v565_v62 = vadd.f32 %v730_v58, %v874_v24  ;;  %v328_v63 = vpop.f32.mrb[7].mxu0  ;;  %v392_v0 = vpop.f32.mrb[7].mxu1 }
 0x101   :  { %v578_v1 = vmax.f32 %v546_v55, 0.0  ;;  %v594_v2 = vmax.f32 %v562_v56, 0.0  ;;  %v547_v3 = vadd.f32 %v874_v24, %v328_v63  ;;  %v563_v4 = vadd.f32 %v874_v24, %v392_v0 }
 0x102   :  { %612 = vst [vmem:[%s1007_s3 + $0x30] sm:$0xff] %v580_v59  ;;  %628 = vst [vmem:[%s1007_s3 + $0xb0] sm:$0xff] %v596_v60  ;;  %v581_v5 = vmax.f32 %v549_v61, 0.0  ;;  %v597_v6 = vmax.f32 %v565_v62, 0.0 }
 0x103   :  { %610 = vst [vmem:[%s1007_s3 + $0x20] sm:$0xff] %v578_v1  ;;  %626 = vst [vmem:[%s1007_s3 + $0xa0] sm:$0xff] %v594_v2  ;;  %v579_v7 = vmax.f32 %v547_v3, 0.0  ;;  %v595_v8 = vmax.f32 %v563_v4, 0.0 }
 0x104   :  { %613 = vst [vmem:[%s1007_s3 + $0x38] sm:$0xff] %v581_v5  ;;  %629 = vst [vmem:[%s1007_s3 + $0xb8] sm:$0xff] %v597_v6 }
 0x105   :  { %611 = vst [vmem:[%s1007_s3 + $0x28] sm:$0xff] %v579_v7  ;;  %627 = vst [vmem:[%s1007_s3 + $0xa8] sm:$0xff] %v595_v8  ;;  %v717_v9 = vpop.f32.mrb[8].mxu0  ;;  %v733_v10 = vpop.f32.mrb[8].mxu1 }
 0x106   :  { %v552_v11 = vadd.f32 %v717_v9, %v874_v24  ;;  %v568_v12 = vadd.f32 %v733_v10, %v874_v24  ;;  %v341_v13 = vpop.f32.mrb[9].mxu0  ;;  %v405_v14 = vpop.f32.mrb[9].mxu1 }
 0x107   :  { %v550_v15 = vadd.f32 %v874_v24, %v341_v13  ;;  %v566_v16 = vadd.f32 %v874_v24, %v405_v14  ;;  %v718_v17 = vpop.f32.mrb[10].mxu0  ;;  %v734_v18 = vpop.f32.mrb[10].mxu1 }
 0x108   :  { %v584_v19 = vmax.f32 %v552_v11, 0.0  ;;  %v600_v20 = vmax.f32 %v568_v12, 0.0  ;;  %v553_v21 = vadd.f32 %v718_v17, %v874_v24  ;;  %v569_v22 = vadd.f32 %v734_v18, %v874_v24  ;;  %v344_v23 = vpop.f32.mrb[11].mxu0  ;;  %v408_v25 = vpop.f32.mrb[11].mxu1 }
 0x109   :  { %v582_v26 = vmax.f32 %v550_v15, 0.0  ;;  %v598_v27 = vmax.f32 %v566_v16, 0.0  ;;  %v551_v28 = vadd.f32 %v874_v24, %v344_v23  ;;  %v567_v29 = vadd.f32 %v874_v24, %v408_v25 }
 0x10a   :  { %616 = vst [vmem:[%s1007_s3 + $0x50] sm:$0xff] %v584_v19  ;;  %632 = vst [vmem:[%s1007_s3 + $0xd0] sm:$0xff] %v600_v20  ;;  %v585_v30 = vmax.f32 %v553_v21, 0.0  ;;  %v601_v31 = vmax.f32 %v569_v22, 0.0 }
 0x10b   :  { %614 = vst [vmem:[%s1007_s3 + $0x40] sm:$0xff] %v582_v26  ;;  %630 = vst [vmem:[%s1007_s3 + $0xc0] sm:$0xff] %v598_v27  ;;  %v583_v32 = vmax.f32 %v551_v28, 0.0  ;;  %v599_v33 = vmax.f32 %v567_v29, 0.0 }
 0x10c   :  { %617 = vst [vmem:[%s1007_s3 + $0x58] sm:$0xff] %v585_v30  ;;  %633 = vst [vmem:[%s1007_s3 + $0xd8] sm:$0xff] %v601_v31 }
 0x10d   :  { %615 = vst [vmem:[%s1007_s3 + $0x48] sm:$0xff] %v583_v32  ;;  %631 = vst [vmem:[%s1007_s3 + $0xc8] sm:$0xff] %v599_v33  ;;  %v721_v34 = vpop.f32.mrb[12].mxu0  ;;  %v737_v35 = vpop.f32.mrb[12].mxu1 }
 0x10e   :  { %v556_v36 = vadd.f32 %v721_v34, %v874_v24  ;;  %v572_v37 = vadd.f32 %v737_v35, %v874_v24  ;;  %v357_v38 = vpop.f32.mrb[13].mxu0  ;;  %v421_v39 = vpop.f32.mrb[13].mxu1 }
 0x10f   :  { %v554_v40 = vadd.f32 %v874_v24, %v357_v38  ;;  %v570_v41 = vadd.f32 %v874_v24, %v421_v39  ;;  %v722_v42 = vpop.f32.mrb[14].mxu0  ;;  %v738_v43 = vpop.f32.mrb[14].mxu1 }
 0x110   :  { %v588_v44 = vmax.f32 %v556_v36, 0.0  ;;  %v604_v45 = vmax.f32 %v572_v37, 0.0  ;;  %v557_v46 = vadd.f32 %v722_v42, %v874_v24  ;;  %v573_v47 = vadd.f32 %v738_v43, %v874_v24  ;;  %v360_v48 = vpop.f32.mrb[15].mxu0  ;;  %v424_v49 = vpop.f32.mrb[15].mxu1 }
 0x111   :  { %v586_v50 = vmax.f32 %v554_v40, 0.0  ;;  %v602_v51 = vmax.f32 %v570_v41, 0.0  ;;  %v555_v52 = vadd.f32 %v874_v24, %v360_v48  ;;  %v571_v53 = vadd.f32 %v874_v24, %v424_v49 }
 0x112   :  { %620 = vst [vmem:[%s1007_s3 + $0x70] sm:$0xff] %v588_v44  ;;  %636 = vst [vmem:[%s1007_s3 + $0xf0] sm:$0xff] %v604_v45  ;;  %v589_v54 = vmax.f32 %v557_v46, 0.0  ;;  %v605_v55 = vmax.f32 %v573_v47, 0.0 }
 0x113   :  { %618 = vst [vmem:[%s1007_s3 + $0x60] sm:$0xff] %v586_v50  ;;  %634 = vst [vmem:[%s1007_s3 + $0xe0] sm:$0xff] %v602_v51  ;;  %v587_v56 = vmax.f32 %v555_v52, 0.0  ;;  %v603_v24 = vmax.f32 %v571_v53, 0.0 }
 0x114   :  { %621 = vst [vmem:[%s1007_s3 + $0x78] sm:$0xff] %v589_v54  ;;  %637 = vst [vmem:[%s1007_s3 + $0xf8] sm:$0xff] %v605_v55 }
 0x115   :  { %619 = vst [vmem:[%s1007_s3 + $0x68] sm:$0xff] %v587_v56  ;;  %635 = vst [vmem:[%s1007_s3 + $0xe8] sm:$0xff] %v603_v24 }

// kernel: _lambda_.23
= control target key start
LH: loop header
LB: loop body
LE: loop exit
PB: predicated region body
PF: predicated region fallthrough
CT: control target
= control target key end

     0   :  { %s972_s1 = inlined_call_operand.vmem [shape: bf16[128,128], index: 1, kind: input, shape index: {}]   ;;  %s973_s0 = inlined_call_operand.vmem [shape: bf16[256,128], index: 0, kind: input, shape index: {}]   ;;  %s974_s2 = inlined_call_operand.vmem [shape: f32[1,128], index: 2, kind: input, shape index: {}]   ;;  %s975_s3 = inlined_call_operand.vmem [shape: f32[256,128], index: 3, kind: output, shape index: {}]  }
   0x1   :  { %v723_v0 = vld [vmem:[%s972_s1] sm:$0xff]   ;;  %v724_v1 = vld [vmem:[%s972_s1 + $0x8] sm:$0xff]   ;;  %v725_v2 = vld [vmem:[%s972_s1 + $0x10] sm:$0xff]  }
   0x2   :  { %659 = vmatprep.subr.bf16.mxu0 %v723_v0  ;;  %707 = vmatprep.subr.bf16.mxu1 %v723_v0  ;;  %v726_v3 = vld [vmem:[%s972_s1 + $0x18] sm:$0xff]   ;;  %v731_v4 = vld [vmem:[%s973_s0] sm:$0xff]   ;;  %v728_v7 = vld [vmem:[%s972_s1 + $0x28] sm:$0xff]  }
   0x3   :  { %660 = vmatpush3.bf16.msra.mxu0 %v723_v0  ;;  %715 = vmatpush3.bf16.msra.mxu1 %v723_v0  ;;  %v732_v5 = vld [vmem:[%s973_s0 + $0x40] sm:$0xff]   ;;  %v729_v8 = vld [vmem:[%s972_s1 + $0x30] sm:$0xff]   ;;  %v730_v9 = vld [vmem:[%s972_s1 + $0x38] sm:$0xff]  }
   0x4   :  { %661 = vmatprep.subr.bf16.mxu0 %v724_v1  ;;  %708 = vmatprep.subr.bf16.mxu1 %v724_v1  ;;  %v727_v6 = vld [vmem:[%s972_s1 + $0x20] sm:$0xff]   ;;  %v733_v10 = vld [vmem:[%s973_s0 + $0x8] sm:$0xff]   ;;  %v735_v12 = vld [vmem:[%s973_s0 + $0x10] sm:$0xff]  }
   0x5   :  { %675 = vmatprep.mubr.bf16.mxu0 %v731_v4  ;;  %691 = vmatprep.mubr.bf16.mxu1 %v732_v5  ;;  %v734_v11 = vld [vmem:[%s973_s0 + $0x48] sm:$0xff]   ;;  %v736_v13 = vld [vmem:[%s973_s0 + $0x50] sm:$0xff]   ;;  %v737_v14 = vld [vmem:[%s973_s0 + $0x18] sm:$0xff]  }
   0x6   :  { %v738_v15 = vld [vmem:[%s973_s0 + $0x58] sm:$0xff]   ;;  %v739_v16 = vld [vmem:[%s973_s0 + $0x20] sm:$0xff]   ;;  %v741_v18 = vld [vmem:[%s973_s0 + $0x28] sm:$0xff]  }
   0x7   :  { %662 = vmatpush3.bf16.msra.mxu0 %v724_v1  ;;  %716 = vmatpush3.bf16.msra.mxu1 %v724_v1  ;;  %v740_v17 = vld [vmem:[%s973_s0 + $0x60] sm:$0xff]   ;;  %v742_v19 = vld [vmem:[%s973_s0 + $0x68] sm:$0xff]   ;;  %v743_v20 = vld [vmem:[%s973_s0 + $0x30] sm:$0xff]  }
   0x8   :  { %663 = vmatprep.subr.bf16.mxu0 %v725_v2  ;;  %709 = vmatprep.subr.bf16.mxu1 %v725_v2  ;;  %v744_v21 = vld [vmem:[%s973_s0 + $0x70] sm:$0xff]   ;;  %v745_v22 = vld [vmem:[%s973_s0 + $0x38] sm:$0xff]   ;;  %v842_v24 = vld [vmem:[%s974_s2] ss:$0 sm:$0xff] }
   0x9   :  { %v746_v23 = vld [vmem:[%s973_s0 + $0x78] sm:$0xff]  }
   0xb   :  { %664 = vmatpush3.bf16.msra.mxu0 %v725_v2  ;;  %717 = vmatpush3.bf16.msra.mxu1 %v725_v2 }
   0xc   :  { %665 = vmatprep.subr.bf16.mxu0 %v726_v3  ;;  %710 = vmatprep.subr.bf16.mxu1 %v726_v3 }
   0xf   :  { %666 = vmatpush3.bf16.msra.mxu0 %v726_v3  ;;  %718 = vmatpush3.bf16.msra.mxu1 %v726_v3 }
  0x10   :  { %667 = vmatprep.subr.bf16.mxu0 %v727_v6  ;;  %711 = vmatprep.subr.bf16.mxu1 %v727_v6 }
  0x13   :  { %668 = vmatpush3.bf16.msra.mxu0 %v727_v6  ;;  %719 = vmatpush3.bf16.msra.mxu1 %v727_v6 }
  0x14   :  { %669 = vmatprep.subr.bf16.mxu0 %v728_v7  ;;  %712 = vmatprep.subr.bf16.mxu1 %v728_v7 }
  0x17   :  { %670 = vmatpush3.bf16.msra.mxu0 %v728_v7  ;;  %720 = vmatpush3.bf16.msra.mxu1 %v728_v7 }
  0x18   :  { %671 = vmatprep.subr.bf16.mxu0 %v729_v8  ;;  %713 = vmatprep.subr.bf16.mxu1 %v729_v8 }
  0x1b   :  { %672 = vmatpush3.bf16.msra.mxu0 %v729_v8  ;;  %721 = vmatpush3.bf16.msra.mxu1 %v729_v8 }
  0x1c   :  { %673 = vmatprep.subr.bf16.mxu0 %v730_v9  ;;  %714 = vmatprep.subr.bf16.mxu1 %v730_v9 }
  0x1f   :  { %674 = vmatpush3.bf16.msra.mxu0 %v730_v9  ;;  %722 = vmatpush3.bf16.msra.mxu1 %v730_v9 }
  0x22   :  { %676 = vmatmul.mubr.bf16.vlgmr.msra.gmra.mrb[0].mxu0 %v733_v10  ;;  %692 = vmatmul.mubr.bf16.vlgmr.msra.gmra.mrb[0].mxu1 %v734_v11 }
  0x23   :  { %679 = vmatprep.mubr.bf16.mxu0 %v735_v12  ;;  %695 = vmatprep.mubr.bf16.mxu1 %v736_v13 }
  0x2a   :  { %680 = vmatmul.mubr.bf16.gmra.mrb[4].mxu0 %v737_v14  ;;  %696 = vmatmul.mubr.bf16.gmra.mrb[4].mxu1 %v738_v15 }
  0x2b   :  { %683 = vmatprep.mubr.bf16.mxu0 %v739_v16  ;;  %699 = vmatprep.mubr.bf16.mxu1 %v740_v17 }
  0x32   :  { %684 = vmatmul.mubr.bf16.gmra.mrb[8].mxu0 %v741_v18  ;;  %700 = vmatmul.mubr.bf16.gmra.mrb[8].mxu1 %v742_v19 }
  0x33   :  { %687 = vmatprep.mubr.bf16.mxu0 %v743_v20  ;;  %703 = vmatprep.mubr.bf16.mxu1 %v744_v21 }
  0x3a   :  { %688 = vmatmul.mubr.bf16.gmra.mrb[12].mxu0 %v745_v22  ;;  %704 = vmatmul.mubr.bf16.gmra.mrb[12].mxu1 %v746_v23 }
  0xf5   :  { %v677_v25 = vpop.f32.mrb[0].mxu0  ;;  %v693_v26 = vpop.f32.mrb[0].mxu1 }
  0xf6   :  { %v544_v27 = vadd.f32 %v677_v25, %v842_v24  ;;  %v560_v28 = vadd.f32 %v693_v26, %v842_v24  ;;  %v309_v29 = vpop.f32.mrb[1].mxu0  ;;  %v373_v30 = vpop.f32.mrb[1].mxu1 }
  0xf7   :  { %v542_v31 = vadd.f32 %v842_v24, %v309_v29  ;;  %v558_v32 = vadd.f32 %v842_v24, %v373_v30  ;;  %v678_v33 = vpop.f32.mrb[2].mxu0  ;;  %v694_v34 = vpop.f32.mrb[2].mxu1 }
  0xf8   :  { %576 = vst [vmem:[%s975_s3 + $0x10] sm:$0xff] %v544_v27  ;;  %592 = vst [vmem:[%s975_s3 + $0x90] sm:$0xff] %v560_v28  ;;  %v545_v35 = vadd.f32 %v678_v33, %v842_v24  ;;  %v561_v36 = vadd.f32 %v694_v34, %v842_v24  ;;  %v312_v37 = vpop.f32.mrb[3].mxu0  ;;  %v376_v38 = vpop.f32.mrb[3].mxu1 }
  0xf9   :  { %574 = vst [vmem:[%s975_s3] sm:$0xff] %v542_v31  ;;  %590 = vst [vmem:[%s975_s3 + $0x80] sm:$0xff] %v558_v32  ;;  %v543_v39 = vadd.f32 %v842_v24, %v312_v37  ;;  %v559_v40 = vadd.f32 %v842_v24, %v376_v38 }
  0xfa   :  { %577 = vst [vmem:[%s975_s3 + $0x18] sm:$0xff] %v545_v35  ;;  %593 = vst [vmem:[%s975_s3 + $0x98] sm:$0xff] %v561_v36 }
  0xfb   :  { %575 = vst [vmem:[%s975_s3 + $0x8] sm:$0xff] %v543_v39  ;;  %591 = vst [vmem:[%s975_s3 + $0x88] sm:$0xff] %v559_v40 }
  0xfd   :  { %v681_v41 = vpop.f32.mrb[4].mxu0  ;;  %v697_v42 = vpop.f32.mrb[4].mxu1 }
  0xfe   :  { %v548_v43 = vadd.f32 %v681_v41, %v842_v24  ;;  %v564_v44 = vadd.f32 %v697_v42, %v842_v24  ;;  %v325_v45 = vpop.f32.mrb[5].mxu0  ;;  %v389_v46 = vpop.f32.mrb[5].mxu1 }
  0xff   :  { %v546_v47 = vadd.f32 %v842_v24, %v325_v45  ;;  %v562_v48 = vadd.f32 %v842_v24, %v389_v46  ;;  %v682_v49 = vpop.f32.mrb[6].mxu0  ;;  %v698_v50 = vpop.f32.mrb[6].mxu1 }
 0x100   :  { %580 = vst [vmem:[%s975_s3 + $0x30] sm:$0xff] %v548_v43  ;;  %596 = vst [vmem:[%s975_s3 + $0xb0] sm:$0xff] %v564_v44  ;;  %v549_v51 = vadd.f32 %v682_v49, %v842_v24  ;;  %v565_v52 = vadd.f32 %v698_v50, %v842_v24  ;;  %v328_v53 = vpop.f32.mrb[7].mxu0  ;;  %v392_v54 = vpop.f32.mrb[7].mxu1 }
 0x101   :  { %578 = vst [vmem:[%s975_s3 + $0x20] sm:$0xff] %v546_v47  ;;  %594 = vst [vmem:[%s975_s3 + $0xa0] sm:$0xff] %v562_v48  ;;  %v547_v55 = vadd.f32 %v842_v24, %v328_v53  ;;  %v563_v56 = vadd.f32 %v842_v24, %v392_v54 }
 0x102   :  { %581 = vst [vmem:[%s975_s3 + $0x38] sm:$0xff] %v549_v51  ;;  %597 = vst [vmem:[%s975_s3 + $0xb8] sm:$0xff] %v565_v52 }
 0x103   :  { %579 = vst [vmem:[%s975_s3 + $0x28] sm:$0xff] %v547_v55  ;;  %595 = vst [vmem:[%s975_s3 + $0xa8] sm:$0xff] %v563_v56 }
 0x105   :  { %v685_v57 = vpop.f32.mrb[8].mxu0  ;;  %v701_v58 = vpop.f32.mrb[8].mxu1 }
 0x106   :  { %v552_v59 = vadd.f32 %v685_v57, %v842_v24  ;;  %v568_v60 = vadd.f32 %v701_v58, %v842_v24  ;;  %v341_v61 = vpop.f32.mrb[9].mxu0  ;;  %v405_v62 = vpop.f32.mrb[9].mxu1 }
 0x107   :  { %v550_v63 = vadd.f32 %v842_v24, %v341_v61  ;;  %v566_v0 = vadd.f32 %v842_v24, %v405_v62  ;;  %v686_v1 = vpop.f32.mrb[10].mxu0  ;;  %v702_v2 = vpop.f32.mrb[10].mxu1 }
 0x108   :  { %584 = vst [vmem:[%s975_s3 + $0x50] sm:$0xff] %v552_v59  ;;  %600 = vst [vmem:[%s975_s3 + $0xd0] sm:$0xff] %v568_v60  ;;  %v553_v3 = vadd.f32 %v686_v1, %v842_v24  ;;  %v569_v4 = vadd.f32 %v702_v2, %v842_v24  ;;  %v344_v5 = vpop.f32.mrb[11].mxu0  ;;  %v408_v6 = vpop.f32.mrb[11].mxu1 }
 0x109   :  { %582 = vst [vmem:[%s975_s3 + $0x40] sm:$0xff] %v550_v63  ;;  %598 = vst [vmem:[%s975_s3 + $0xc0] sm:$0xff] %v566_v0  ;;  %v551_v7 = vadd.f32 %v842_v24, %v344_v5  ;;  %v567_v8 = vadd.f32 %v842_v24, %v408_v6 }
 0x10a   :  { %585 = vst [vmem:[%s975_s3 + $0x58] sm:$0xff] %v553_v3  ;;  %601 = vst [vmem:[%s975_s3 + $0xd8] sm:$0xff] %v569_v4 }
 0x10b   :  { %583 = vst [vmem:[%s975_s3 + $0x48] sm:$0xff] %v551_v7  ;;  %599 = vst [vmem:[%s975_s3 + $0xc8] sm:$0xff] %v567_v8 }
 0x10d   :  { %v689_v9 = vpop.f32.mrb[12].mxu0  ;;  %v705_v10 = vpop.f32.mrb[12].mxu1 }
 0x10e   :  { %v556_v11 = vadd.f32 %v689_v9, %v842_v24  ;;  %v572_v12 = vadd.f32 %v705_v10, %v842_v24  ;;  %v357_v13 = vpop.f32.mrb[13].mxu0  ;;  %v421_v14 = vpop.f32.mrb[13].mxu1 }
 0x10f   :  { %v554_v15 = vadd.f32 %v842_v24, %v357_v13  ;;  %v570_v16 = vadd.f32 %v842_v24, %v421_v14  ;;  %v690_v17 = vpop.f32.mrb[14].mxu0  ;;  %v706_v18 = vpop.f32.mrb[14].mxu1 }
 0x110   :  { %588 = vst [vmem:[%s975_s3 + $0x70] sm:$0xff] %v556_v11  ;;  %604 = vst [vmem:[%s975_s3 + $0xf0] sm:$0xff] %v572_v12  ;;  %v557_v19 = vadd.f32 %v690_v17, %v842_v24  ;;  %v573_v20 = vadd.f32 %v706_v18, %v842_v24  ;;  %v360_v21 = vpop.f32.mrb[15].mxu0  ;;  %v424_v22 = vpop.f32.mrb[15].mxu1 }
 0x111   :  { %586 = vst [vmem:[%s975_s3 + $0x60] sm:$0xff] %v554_v15  ;;  %602 = vst [vmem:[%s975_s3 + $0xe0] sm:$0xff] %v570_v16  ;;  %v555_v23 = vadd.f32 %v842_v24, %v360_v21  ;;  %v571_v25 = vadd.f32 %v842_v24, %v424_v22 }
 0x112   :  { %589 = vst [vmem:[%s975_s3 + $0x78] sm:$0xff] %v557_v19  ;;  %605 = vst [vmem:[%s975_s3 + $0xf8] sm:$0xff] %v573_v20 }
 0x113   :  { %587 = vst [vmem:[%s975_s3 + $0x68] sm:$0xff] %v555_v23  ;;  %603 = vst [vmem:[%s975_s3 + $0xe8] sm:$0xff] %v571_v25 }

// kernel: _lambda_.24
= control target key start
LH: loop header
LB: loop body
LE: loop exit
PB: predicated region body
PF: predicated region fallthrough
CT: control target
= control target key end

     0   :  { %s1172_s1 = inlined_call_operand.vmem [shape: bf16[128,128], index: 1, kind: input, shape index: {}]   ;;  %s1173_s0 = inlined_call_operand.vmem [shape: bf16[256,128], index: 0, kind: input, shape index: {}]   ;;  %s1174_s2 = inlined_call_operand.vmem [shape: f32[1,128], index: 2, kind: input, shape index: {}]   ;;  %s1175_s3 = inlined_call_operand.vmem [shape: f32[256,128], index: 3, kind: input, shape index: {}]   ;;  %s1176_s4 = inlined_call_operand.vmem [shape: f32[256,128], index: 4, kind: output, shape index: {}]  }
   0x1   :  { %v822_v0 = vld [vmem:[%s1172_s1] sm:$0xff]   ;;  %v823_v1 = vld [vmem:[%s1172_s1 + $0x8] sm:$0xff]   ;;  %v824_v2 = vld [vmem:[%s1172_s1 + $0x10] sm:$0xff]  }
   0x2   :  { %758 = vmatprep.subr.bf16.mxu0 %v822_v0  ;;  %806 = vmatprep.subr.bf16.mxu1 %v822_v0  ;;  %v825_v3 = vld [vmem:[%s1172_s1 + $0x18] sm:$0xff]   ;;  %v830_v4 = vld [vmem:[%s1173_s0] sm:$0xff]   ;;  %v827_v7 = vld [vmem:[%s1172_s1 + $0x28] sm:$0xff]  }
   0x3   :  { %759 = vmatpush3.bf16.msra.mxu0 %v822_v0  ;;  %814 = vmatpush3.bf16.msra.mxu1 %v822_v0  ;;  %v831_v5 = vld [vmem:[%s1173_s0 + $0x40] sm:$0xff]   ;;  %v828_v8 = vld [vmem:[%s1172_s1 + $0x30] sm:$0xff]   ;;  %v829_v9 = vld [vmem:[%s1172_s1 + $0x38] sm:$0xff]  }
   0x4   :  { %760 = vmatprep.subr.bf16.mxu0 %v823_v1  ;;  %807 = vmatprep.subr.bf16.mxu1 %v823_v1  ;;  %v826_v6 = vld [vmem:[%s1172_s1 + $0x20] sm:$0xff]   ;;  %v832_v10 = vld [vmem:[%s1173_s0 + $0x8] sm:$0xff]   ;;  %v834_v12 = vld [vmem:[%s1173_s0 + $0x10] sm:$0xff]  }
   0x5   :  { %774 = vmatprep.mubr.bf16.mxu0 %v830_v4  ;;  %790 = vmatprep.mubr.bf16.mxu1 %v831_v5  ;;  %v833_v11 = vld [vmem:[%s1173_s0 + $0x48] sm:$0xff]   ;;  %v835_v13 = vld [vmem:[%s1173_s0 + $0x50] sm:$0xff]   ;;  %v836_v14 = vld [vmem:[%s1173_s0 + $0x18] sm:$0xff]  }
   0x6   :  { %v837_v15 = vld [vmem:[%s1173_s0 + $0x58] sm:$0xff]   ;;  %v838_v16 = vld [vmem:[%s1173_s0 + $0x20] sm:$0xff]   ;;  %v840_v18 = vld [vmem:[%s1173_s0 + $0x28] sm:$0xff]  }
   0x7   :  { %761 = vmatpush3.bf16.msra.mxu0 %v823_v1  ;;  %815 = vmatpush3.bf16.msra.mxu1 %v823_v1  ;;  %v839_v17 = vld [vmem:[%s1173_s0 + $0x60] sm:$0xff]   ;;  %v841_v19 = vld [vmem:[%s1173_s0 + $0x68] sm:$0xff]   ;;  %v842_v20 = vld [vmem:[%s1173_s0 + $0x30] sm:$0xff]  }
   0x8   :  { %762 = vmatprep.subr.bf16.mxu0 %v824_v2  ;;  %808 = vmatprep.subr.bf16.mxu1 %v824_v2  ;;  %v843_v21 = vld [vmem:[%s1173_s0 + $0x70] sm:$0xff]   ;;  %v844_v22 = vld [vmem:[%s1173_s0 + $0x38] sm:$0xff]   ;;  %v946_v24 = vld [vmem:[%s1174_s2] ss:$0 sm:$0xff] }
   0x9   :  { %v845_v23 = vld [vmem:[%s1173_s0 + $0x78] sm:$0xff]   ;;  %v579_v26 = vld [vmem:[%s1175_s3 + $0x10] sm:$0xff]  ;;  %v577_v32 = vld [vmem:[%s1175_s3] sm:$0xff] }
   0xa   :  { %v595_v28 = vld [vmem:[%s1175_s3 + $0x90] sm:$0xff]  ;;  %v593_v34 = vld [vmem:[%s1175_s3 + $0x80] sm:$0xff]  ;;  %v580_v38 = vld [vmem:[%s1175_s3 + $0x18] sm:$0xff] }
   0xb   :  { %763 = vmatpush3.bf16.msra.mxu0 %v824_v2  ;;  %816 = vmatpush3.bf16.msra.mxu1 %v824_v2  ;;  %v596_v40 = vld [vmem:[%s1175_s3 + $0x98] sm:$0xff]  ;;  %v578_v46 = vld [vmem:[%s1175_s3 + $0x8] sm:$0xff]  ;;  %v583_v2 = vld [vmem:[%s1175_s3 + $0x30] sm:$0xff] }
   0xc   :  { %764 = vmatprep.subr.bf16.mxu0 %v825_v3  ;;  %809 = vmatprep.subr.bf16.mxu1 %v825_v3  ;;  %v594_v48 = vld [vmem:[%s1175_s3 + $0x88] sm:$0xff]  ;;  %v599_v4 = vld [vmem:[%s1175_s3 + $0xb0] sm:$0xff] }
   0xf   :  { %765 = vmatpush3.bf16.msra.mxu0 %v825_v3  ;;  %817 = vmatpush3.bf16.msra.mxu1 %v825_v3 }
  0x10   :  { %766 = vmatprep.subr.bf16.mxu0 %v826_v6  ;;  %810 = vmatprep.subr.bf16.mxu1 %v826_v6 }
  0x13   :  { %767 = vmatpush3.bf16.msra.mxu0 %v826_v6  ;;  %818 = vmatpush3.bf16.msra.mxu1 %v826_v6 }
  0x14   :  { %768 = vmatprep.subr.bf16.mxu0 %v827_v7  ;;  %811 = vmatprep.subr.bf16.mxu1 %v827_v7 }
  0x17   :  { %769 = vmatpush3.bf16.msra.mxu0 %v827_v7  ;;  %819 = vmatpush3.bf16.msra.mxu1 %v827_v7 }
  0x18   :  { %770 = vmatprep.subr.bf16.mxu0 %v828_v8  ;;  %812 = vmatprep.subr.bf16.mxu1 %v828_v8 }
  0x1b   :  { %771 = vmatpush3.bf16.msra.mxu0 %v828_v8  ;;  %820 = vmatpush3.bf16.msra.mxu1 %v828_v8  ;;  %v581_v8 = vld [vmem:[%s1175_s3 + $0x20] sm:$0xff] }
  0x1c   :  { %772 = vmatprep.subr.bf16.mxu0 %v829_v9  ;;  %813 = vmatprep.subr.bf16.mxu1 %v829_v9 }
  0x1f   :  { %773 = vmatpush3.bf16.msra.mxu0 %v829_v9  ;;  %821 = vmatpush3.bf16.msra.mxu1 %v829_v9 }
  0x22   :  { %775 = vmatmul.mubr.bf16.vlgmr.msra.gmra.mrb[0].mxu0 %v832_v10  ;;  %791 = vmatmul.mubr.bf16.vlgmr.msra.gmra.mrb[0].mxu1 %v833_v11  ;;  %v597_v10 = vld [vmem:[%s1175_s3 + $0xa0] sm:$0xff] }
  0x23   :  { %778 = vmatprep.mubr.bf16.mxu0 %v834_v12  ;;  %794 = vmatprep.mubr.bf16.mxu1 %v835_v13 }
  0x2a   :  { %779 = vmatmul.mubr.bf16.gmra.mrb[4].mxu0 %v836_v14  ;;  %795 = vmatmul.mubr.bf16.gmra.mrb[4].mxu1 %v837_v15  ;;  %v584_v14 = vld [vmem:[%s1175_s3 + $0x38] sm:$0xff] }
  0x2b   :  { %782 = vmatprep.mubr.bf16.mxu0 %v838_v16  ;;  %798 = vmatprep.mubr.bf16.mxu1 %v839_v17  ;;  %v600_v16 = vld [vmem:[%s1175_s3 + $0xb8] sm:$0xff] }
  0x32   :  { %783 = vmatmul.mubr.bf16.gmra.mrb[8].mxu0 %v840_v18  ;;  %799 = vmatmul.mubr.bf16.gmra.mrb[8].mxu1 %v841_v19 }
  0x33   :  { %786 = vmatprep.mubr.bf16.mxu0 %v842_v20  ;;  %802 = vmatprep.mubr.bf16.mxu1 %v843_v21 }
  0x3a   :  { %787 = vmatmul.mubr.bf16.gmra.mrb[12].mxu0 %v844_v22  ;;  %803 = vmatmul.mubr.bf16.gmra.mrb[12].mxu1 %v845_v23  ;;  %v582_v22 = vld [vmem:[%s1175_s3 + $0x28] sm:$0xff] }
  0xf5   :  { %v776_v25 = vpop.f32.mrb[0].mxu0  ;;  %v792_v27 = vpop.f32.mrb[0].mxu1 }
  0xf6   :  { %v547_v29 = vadd.f32 %v776_v25, %v946_v24  ;;  %v563_v30 = vadd.f32 %v792_v27, %v946_v24  ;;  %v312_v31 = vpop.f32.mrb[1].mxu0  ;;  %v376_v33 = vpop.f32.mrb[1].mxu1  ;;  %v598_v25 = vld [vmem:[%s1175_s3 + $0xa8] sm:$0xff] }
  0xf7   :  { %v545_v35 = vadd.f32 %v946_v24, %v312_v31  ;;  %v561_v36 = vadd.f32 %v946_v24, %v376_v33  ;;  %v777_v37 = vpop.f32.mrb[2].mxu0  ;;  %v793_v39 = vpop.f32.mrb[2].mxu1 }
  0xf8   :  { %v611_v41 = vadd.f32 %v579_v26, %v547_v29  ;;  %v627_v42 = vadd.f32 %v595_v28, %v563_v30  ;;  %v548_v43 = vadd.f32 %v777_v37, %v946_v24  ;;  %v564_v44 = vadd.f32 %v793_v39, %v946_v24  ;;  %v315_v45 = vpop.f32.mrb[3].mxu0  ;;  %v379_v47 = vpop.f32.mrb[3].mxu1 }
  0xf9   :  { %v609_v49 = vadd.f32 %v577_v32, %v545_v35  ;;  %v625_v50 = vadd.f32 %v593_v34, %v561_v36  ;;  %v546_v51 = vadd.f32 %v946_v24, %v315_v45  ;;  %v562_v52 = vadd.f32 %v946_v24, %v379_v47  ;;  %v603_v45 = vld [vmem:[%s1175_s3 + $0xd0] sm:$0xff] }
  0xfa   :  { %v643_v53 = vmax.f32 %v611_v41, 0.0  ;;  %v659_v54 = vmax.f32 %v627_v42, 0.0  ;;  %v612_v55 = vadd.f32 %v580_v38, %v548_v43  ;;  %v628_v56 = vadd.f32 %v596_v40, %v564_v44  ;;  %v587_v43 = vld [vmem:[%s1175_s3 + $0x50] sm:$0xff] }
  0xfb   :  { %v641_v57 = vmax.f32 %v609_v49, 0.0  ;;  %v657_v58 = vmax.f32 %v625_v50, 0.0  ;;  %v610_v59 = vadd.f32 %v578_v46, %v546_v51  ;;  %v626_v60 = vadd.f32 %v594_v48, %v562_v52  ;;  %v585_v49 = vld [vmem:[%s1175_s3 + $0x40] sm:$0xff] }
  0xfc   :  { %675 = vst [vmem:[%s1176_s4 + $0x10] sm:$0xff] %v643_v53  ;;  %691 = vst [vmem:[%s1176_s4 + $0x90] sm:$0xff] %v659_v54  ;;  %v644_v61 = vmax.f32 %v612_v55, 0.0  ;;  %v660_v62 = vmax.f32 %v628_v56, 0.0  ;;  %v601_v51 = vld [vmem:[%s1175_s3 + $0xc0] sm:$0xff]  ;;  %v588_v55 = vld [vmem:[%s1175_s3 + $0x58] sm:$0xff] }
  0xfd   :  { %673 = vst [vmem:[%s1176_s4] sm:$0xff] %v641_v57  ;;  %689 = vst [vmem:[%s1176_s4 + $0x80] sm:$0xff] %v657_v58  ;;  %v642_v63 = vmax.f32 %v610_v59, 0.0  ;;  %v658_v0 = vmax.f32 %v626_v60, 0.0  ;;  %v780_v1 = vpop.f32.mrb[4].mxu0  ;;  %v796_v3 = vpop.f32.mrb[4].mxu1  ;;  %v604_v57 = vld [vmem:[%s1175_s3 + $0xd8] sm:$0xff] }
  0xfe   :  { %676 = vst [vmem:[%s1176_s4 + $0x18] sm:$0xff] %v644_v61  ;;  %692 = vst [vmem:[%s1176_s4 + $0x98] sm:$0xff] %v660_v62  ;;  %v551_v5 = vadd.f32 %v780_v1, %v946_v24  ;;  %v567_v6 = vadd.f32 %v796_v3, %v946_v24  ;;  %v328_v7 = vpop.f32.mrb[5].mxu0  ;;  %v392_v9 = vpop.f32.mrb[5].mxu1  ;;  %v602_v1 = vld [vmem:[%s1175_s3 + $0xc8] sm:$0xff] }
  0xff   :  { %674 = vst [vmem:[%s1176_s4 + $0x8] sm:$0xff] %v642_v63  ;;  %690 = vst [vmem:[%s1176_s4 + $0x88] sm:$0xff] %v658_v0  ;;  %v549_v11 = vadd.f32 %v946_v24, %v328_v7  ;;  %v565_v12 = vadd.f32 %v946_v24, %v392_v9  ;;  %v781_v13 = vpop.f32.mrb[6].mxu0  ;;  %v797_v15 = vpop.f32.mrb[6].mxu1  ;;  %v586_v63 = vld [vmem:[%s1175_s3 + $0x48] sm:$0xff] }
 0x100   :  { %v615_v17 = vadd.f32 %v583_v2, %v551_v5  ;;  %v631_v18 = vadd.f32 %v599_v4, %v567_v6  ;;  %v552_v19 = vadd.f32 %v781_v13, %v946_v24  ;;  %v568_v20 = vadd.f32 %v797_v15, %v946_v24  ;;  %v331_v21 = vpop.f32.mrb[7].mxu0  ;;  %v395_v23 = vpop.f32.mrb[7].mxu1 }
 0x101   :  { %v613_v26 = vadd.f32 %v581_v8, %v549_v11  ;;  %v629_v27 = vadd.f32 %v597_v10, %v565_v12  ;;  %v550_v28 = vadd.f32 %v946_v24, %v331_v21  ;;  %v566_v29 = vadd.f32 %v946_v24, %v395_v23  ;;  %v607_v21 = vld [vmem:[%s1175_s3 + $0xf0] sm:$0xff] }
 0x102   :  { %v647_v30 = vmax.f32 %v615_v17, 0.0  ;;  %v663_v31 = vmax.f32 %v631_v18, 0.0  ;;  %v616_v32 = vadd.f32 %v584_v14, %v552_v19  ;;  %v632_v33 = vadd.f32 %v600_v16, %v568_v20  ;;  %v591_v19 = vld [vmem:[%s1175_s3 + $0x70] sm:$0xff] }
 0x103   :  { %v645_v34 = vmax.f32 %v613_v26, 0.0  ;;  %v661_v35 = vmax.f32 %v629_v27, 0.0  ;;  %v614_v36 = vadd.f32 %v582_v22, %v550_v28  ;;  %v630_v37 = vadd.f32 %v598_v25, %v566_v29  ;;  %v589_v26 = vld [vmem:[%s1175_s3 + $0x60] sm:$0xff] }
 0x104   :  { %679 = vst [vmem:[%s1176_s4 + $0x30] sm:$0xff] %v647_v30  ;;  %695 = vst [vmem:[%s1176_s4 + $0xb0] sm:$0xff] %v663_v31  ;;  %v648_v38 = vmax.f32 %v616_v32, 0.0  ;;  %v664_v39 = vmax.f32 %v632_v33, 0.0  ;;  %v605_v28 = vld [vmem:[%s1175_s3 + $0xe0] sm:$0xff]  ;;  %v592_v32 = vld [vmem:[%s1175_s3 + $0x78] sm:$0xff] }
 0x105   :  { %677 = vst [vmem:[%s1176_s4 + $0x20] sm:$0xff] %v645_v34  ;;  %693 = vst [vmem:[%s1176_s4 + $0xa0] sm:$0xff] %v661_v35  ;;  %v646_v40 = vmax.f32 %v614_v36, 0.0  ;;  %v662_v41 = vmax.f32 %v630_v37, 0.0  ;;  %v784_v42 = vpop.f32.mrb[8].mxu0  ;;  %v800_v44 = vpop.f32.mrb[8].mxu1 }
 0x106   :  { %680 = vst [vmem:[%s1176_s4 + $0x38] sm:$0xff] %v648_v38  ;;  %696 = vst [vmem:[%s1176_s4 + $0xb8] sm:$0xff] %v664_v39  ;;  %v555_v46 = vadd.f32 %v784_v42, %v946_v24  ;;  %v571_v47 = vadd.f32 %v800_v44, %v946_v24  ;;  %v344_v48 = vpop.f32.mrb[9].mxu0  ;;  %v408_v50 = vpop.f32.mrb[9].mxu1  ;;  %v608_v34 = vld [vmem:[%s1175_s3 + $0xf8] sm:$0xff]  ;;  %v606_v42 = vld [vmem:[%s1175_s3 + $0xe8] sm:$0xff] }
 0x107   :  { %678 = vst [vmem:[%s1176_s4 + $0x28] sm:$0xff] %v646_v40  ;;  %694 = vst [vmem:[%s1176_s4 + $0xa8] sm:$0xff] %v662_v41  ;;  %v553_v52 = vadd.f32 %v946_v24, %v344_v48  ;;  %v569_v53 = vadd.f32 %v946_v24, %v408_v50  ;;  %v785_v54 = vpop.f32.mrb[10].mxu0  ;;  %v801_v56 = vpop.f32.mrb[10].mxu1  ;;  %v590_v40 = vld [vmem:[%s1175_s3 + $0x68] sm:$0xff] }
 0x108   :  { %v619_v58 = vadd.f32 %v587_v43, %v555_v46  ;;  %v635_v59 = vadd.f32 %v603_v45, %v571_v47  ;;  %v556_v60 = vadd.f32 %v785_v54, %v946_v24  ;;  %v572_v61 = vadd.f32 %v801_v56, %v946_v24  ;;  %v347_v62 = vpop.f32.mrb[11].mxu0  ;;  %v411_v0 = vpop.f32.mrb[11].mxu1 }
 0x109   :  { %v617_v2 = vadd.f32 %v585_v49, %v553_v52  ;;  %v633_v3 = vadd.f32 %v601_v51, %v569_v53  ;;  %v554_v4 = vadd.f32 %v946_v24, %v347_v62  ;;  %v570_v5 = vadd.f32 %v946_v24, %v411_v0 }
 0x10a   :  { %v651_v6 = vmax.f32 %v619_v58, 0.0  ;;  %v667_v7 = vmax.f32 %v635_v59, 0.0  ;;  %v620_v8 = vadd.f32 %v588_v55, %v556_v60  ;;  %v636_v9 = vadd.f32 %v604_v57, %v572_v61 }
 0x10b   :  { %v649_v10 = vmax.f32 %v617_v2, 0.0  ;;  %v665_v11 = vmax.f32 %v633_v3, 0.0  ;;  %v618_v12 = vadd.f32 %v586_v63, %v554_v4  ;;  %v634_v13 = vadd.f32 %v602_v1, %v570_v5 }
 0x10c   :  { %683 = vst [vmem:[%s1176_s4 + $0x50] sm:$0xff] %v651_v6  ;;  %699 = vst [vmem:[%s1176_s4 + $0xd0] sm:$0xff] %v667_v7  ;;  %v652_v14 = vmax.f32 %v620_v8, 0.0  ;;  %v668_v15 = vmax.f32 %v636_v9, 0.0 }
 0x10d   :  { %681 = vst [vmem:[%s1176_s4 + $0x40] sm:$0xff] %v649_v10  ;;  %697 = vst [vmem:[%s1176_s4 + $0xc0] sm:$0xff] %v665_v11  ;;  %v650_v16 = vmax.f32 %v618_v12, 0.0  ;;  %v666_v17 = vmax.f32 %v634_v13, 0.0  ;;  %v788_v18 = vpop.f32.mrb[12].mxu0  ;;  %v804_v20 = vpop.f32.mrb[12].mxu1 }
 0x10e   :  { %684 = vst [vmem:[%s1176_s4 + $0x58] sm:$0xff] %v652_v14  ;;  %700 = vst [vmem:[%s1176_s4 + $0xd8] sm:$0xff] %v668_v15  ;;  %v559_v22 = vadd.f32 %v788_v18, %v946_v24  ;;  %v575_v23 = vadd.f32 %v804_v20, %v946_v24  ;;  %v360_v25 = vpop.f32.mrb[13].mxu0  ;;  %v424_v27 = vpop.f32.mrb[13].mxu1 }
 0x10f   :  { %682 = vst [vmem:[%s1176_s4 + $0x48] sm:$0xff] %v650_v16  ;;  %698 = vst [vmem:[%s1176_s4 + $0xc8] sm:$0xff] %v666_v17  ;;  %v557_v29 = vadd.f32 %v946_v24, %v360_v25  ;;  %v573_v30 = vadd.f32 %v946_v24, %v424_v27  ;;  %v789_v31 = vpop.f32.mrb[14].mxu0  ;;  %v805_v33 = vpop.f32.mrb[14].mxu1 }
 0x110   :  { %v623_v35 = vadd.f32 %v591_v19, %v559_v22  ;;  %v639_v36 = vadd.f32 %v607_v21, %v575_v23  ;;  %v560_v37 = vadd.f32 %v789_v31, %v946_v24  ;;  %v576_v38 = vadd.f32 %v805_v33, %v946_v24  ;;  %v363_v39 = vpop.f32.mrb[15].mxu0  ;;  %v427_v41 = vpop.f32.mrb[15].mxu1 }
 0x111   :  { %v621_v43 = vadd.f32 %v589_v26, %v557_v29  ;;  %v637_v44 = vadd.f32 %v605_v28, %v573_v30  ;;  %v558_v45 = vadd.f32 %v946_v24, %v363_v39  ;;  %v574_v46 = vadd.f32 %v946_v24, %v427_v41 }
 0x112   :  { %v655_v47 = vmax.f32 %v623_v35, 0.0  ;;  %v671_v48 = vmax.f32 %v639_v36, 0.0  ;;  %v624_v49 = vadd.f32 %v592_v32, %v560_v37  ;;  %v640_v50 = vadd.f32 %v608_v34, %v576_v38 }
 0x113   :  { %v653_v51 = vmax.f32 %v621_v43, 0.0  ;;  %v669_v52 = vmax.f32 %v637_v44, 0.0  ;;  %v622_v53 = vadd.f32 %v590_v40, %v558_v45  ;;  %v638_v54 = vadd.f32 %v606_v42, %v574_v46 }
 0x114   :  { %687 = vst [vmem:[%s1176_s4 + $0x70] sm:$0xff] %v655_v47  ;;  %703 = vst [vmem:[%s1176_s4 + $0xf0] sm:$0xff] %v671_v48  ;;  %v656_v55 = vmax.f32 %v624_v49, 0.0  ;;  %v672_v56 = vmax.f32 %v640_v50, 0.0 }
 0x115   :  { %685 = vst [vmem:[%s1176_s4 + $0x60] sm:$0xff] %v653_v51  ;;  %701 = vst [vmem:[%s1176_s4 + $0xe0] sm:$0xff] %v669_v52  ;;  %v654_v24 = vmax.f32 %v622_v53, 0.0  ;;  %v670_v57 = vmax.f32 %v638_v54, 0.0 }
 0x116   :  { %688 = vst [vmem:[%s1176_s4 + $0x78] sm:$0xff] %v656_v55  ;;  %704 = vst [vmem:[%s1176_s4 + $0xf8] sm:$0xff] %v672_v56 }
 0x117   :  { %686 = vst [vmem:[%s1176_s4 + $0x68] sm:$0xff] %v654_v24  ;;  %702 = vst [vmem:[%s1176_s4 + $0xe8] sm:$0xff] %v670_v57 }

// kernel: _lambda_.26
= control target key start
LH: loop header
LB: loop body
LE: loop exit
PB: predicated region body
PF: predicated region fallthrough
CT: control target
= control target key end

     0   :  { %s566_s1 = inlined_call_operand.vmem [shape: bf16[256,128], index: 1, kind: input, shape index: {}]   ;;  %s567_s0 = inlined_call_operand.vmem [shape: bf16[64,256], index: 0, kind: input, shape index: {}]   ;;  %s568_s2 = inlined_call_operand.vmem [shape: f32[1,128], index: 2, kind: input, shape index: {}]   ;;  %s569_s3 = inlined_call_operand.vmem [shape: f32[64,128], index: 3, kind: output, shape index: {}]  }
   0x1   :  { %v419_v0 = vld [vmem:[%s566_s1 + $0x40] sm:$0xff]   ;;  %v421_v2 = vld [vmem:[%s566_s1 + $0x48] sm:$0xff]   ;;  %v423_v4 = vld [vmem:[%s566_s1 + $0x50] sm:$0xff]  }
   0x2   :  { %v420_v1 = vld [vmem:[%s566_s1] sm:$0xff]   ;;  %363 = vmatprep.subr.bf16.mxu0 %v419_v0  ;;  %403 = vmatprep.subr.bf16.mxu1 %v419_v0  ;;  %v422_v3 = vld [vmem:[%s566_s1 + $0x8] sm:$0xff]   ;;  %v424_v5 = vld [vmem:[%s566_s1 + $0x10] sm:$0xff]  }
   0x3   :  { %364 = vmatpush3.bf16.msra.mxu0 %v420_v1  ;;  %411 = vmatpush3.bf16.msra.mxu1 %v420_v1  ;;  %v425_v6 = vld [vmem:[%s566_s1 + $0x58] sm:$0xff]   ;;  %v427_v8 = vld [vmem:[%s566_s1 + $0x60] sm:$0xff]   ;;  %v429_v10 = vld [vmem:[%s566_s1 + $0x68] sm:$0xff]  }
   0x4   :  { %365 = vmatprep.subr.bf16.mxu0 %v421_v2  ;;  %404 = vmatprep.subr.bf16.mxu1 %v421_v2  ;;  %v426_v7 = vld [vmem:[%s566_s1 + $0x18] sm:$0xff]   ;;  %v428_v9 = vld [vmem:[%s566_s1 + $0x20] sm:$0xff]   ;;  %v430_v13 = vld [vmem:[%s566_s1 + $0x28] sm:$0xff]  }
   0x5   :  { %v437_v11 = vld [vmem:[%s567_s0 + $0x4] ss:$8 sps:$4 sm:$0xff]   ;;  %v431_v14 = vld [vmem:[%s566_s1 + $0x70] sm:$0xff]   ;;  %v433_v16 = vld [vmem:[%s566_s1 + $0x78] sm:$0xff]  }
   0x6   :  { %v440_v12 = vld [vmem:[%s567_s0 + $0x24] ss:$8 sps:$4 sm:$0xff]   ;;  %243 = vmatprep.mubr.bf16.mxu0 %v437_v11  ;;  %v432_v15 = vld [vmem:[%s566_s1 + $0x30] sm:$0xff]   ;;  %v434_v17 = vld [vmem:[%s566_s1 + $0x38] sm:$0xff]  }
   0x7   :  { %366 = vmatpush3.bf16.msra.mxu0 %v422_v3  ;;  %412 = vmatpush3.bf16.msra.mxu1 %v422_v3  ;;  %v435_v18 = vld [vmem:[%s567_s0] ss:$8 sps:$4 sm:$0xff]   ;;  %v441_v20 = vld [vmem:[%s567_s0 + $0x14] ss:$8 sps:$4 sm:$0xff]   ;;  %v445_v22 = vld [vmem:[%s567_s0 + $0x10] ss:$8 sps:$4 sm:$0xff]  }
   0x8   :  { %367 = vmatprep.subr.bf16.mxu0 %v423_v4  ;;  %405 = vmatprep.subr.bf16.mxu1 %v423_v4  ;;  %v438_v19 = vld [vmem:[%s567_s0 + $0x20] ss:$8 sps:$4 sm:$0xff]   ;;  %v443_v21 = vld [vmem:[%s567_s0 + $0x34] ss:$8 sps:$4 sm:$0xff]   ;;  %v446_v23 = vld [vmem:[%s567_s0 + $0x30] ss:$8 sps:$4 sm:$0xff]  }
   0x9   :  { %259 = vmatprep.mubr.bf16.mxu1 %v440_v12  ;;  %v362_v27 = vld [vmem:[%s568_s2] ss:$0 sm:$0xff] }
   0xb   :  { %368 = vmatpush3.bf16.msra.mxu0 %v424_v5  ;;  %413 = vmatpush3.bf16.msra.mxu1 %v424_v5 }
   0xc   :  { %369 = vmatprep.subr.bf16.mxu0 %v425_v6  ;;  %406 = vmatprep.subr.bf16.mxu1 %v425_v6 }
   0xf   :  { %370 = vmatpush3.bf16.msra.mxu0 %v426_v7  ;;  %414 = vmatpush3.bf16.msra.mxu1 %v426_v7 }
  0x10   :  { %371 = vmatprep.subr.bf16.mxu0 %v427_v8  ;;  %407 = vmatprep.subr.bf16.mxu1 %v427_v8 }
  0x13   :  { %372 = vmatpush3.bf16.msra.mxu0 %v428_v9  ;;  %415 = vmatpush3.bf16.msra.mxu1 %v428_v9 }
  0x14   :  { %373 = vmatprep.subr.bf16.mxu0 %v429_v10  ;;  %408 = vmatprep.subr.bf16.mxu1 %v429_v10 }
  0x17   :  { %374 = vmatpush3.bf16.msra.mxu0 %v430_v13  ;;  %416 = vmatpush3.bf16.msra.mxu1 %v430_v13 }
  0x18   :  { %375 = vmatprep.subr.bf16.mxu0 %v431_v14  ;;  %409 = vmatprep.subr.bf16.mxu1 %v431_v14 }
  0x1b   :  { %376 = vmatpush3.bf16.msra.mxu0 %v432_v15  ;;  %417 = vmatpush3.bf16.msra.mxu1 %v432_v15 }
  0x1c   :  { %377 = vmatprep.subr.bf16.mxu0 %v433_v16  ;;  %410 = vmatprep.subr.bf16.mxu1 %v433_v16 }
  0x1f   :  { %378 = vmatpush3.bf16.msra.mxu0 %v434_v17  ;;  %418 = vmatpush3.bf16.msra.mxu1 %v434_v17 }
  0x22   :  { %244 = vmatmul.mubr.bf16.vlgmr.msra.gmra.mrb[0].mxu0 %v435_v18  ;;  %260 = vmatmul.mubr.bf16.vlgmr.msra.gmra.mrb[0].mxu1 %v438_v19 }
  0x23   :  { %251 = vmatprep.mubr.bf16.mxu0 %v441_v20  ;;  %267 = vmatprep.mubr.bf16.mxu1 %v443_v21 }
  0x2a   :  { %252 = vmatmul.mubr.bf16.gmra.mrb[4].mxu0 %v445_v22  ;;  %268 = vmatmul.mubr.bf16.gmra.mrb[4].mxu1 %v446_v23 }
  0xf5   :  { %v379_v24 = vpop.f32.mrb[0].mxu0  ;;  %v391_v25 = vpop.f32.mrb[0].mxu1 }
  0xf6   :  { %v380_v26 = vpop.f32.mrb[1].mxu0  ;;  %v392_v28 = vpop.f32.mrb[1].mxu1 }
  0xf7   :  { %v381_v29 = vadd.f32 %v380_v26, %v379_v24  ;;  %v393_v30 = vadd.f32 %v392_v28, %v391_v25  ;;  %v382_v31 = vpop.f32.mrb[2].mxu0  ;;  %v394_v32 = vpop.f32.mrb[2].mxu1 }
  0xf8   :  { %v383_v33 = vpop.f32.mrb[3].mxu0  ;;  %v395_v34 = vpop.f32.mrb[3].mxu1 }
  0xf9   :  { %v310_v35 = vadd.f32 %v381_v29, %v362_v27  ;;  %v314_v36 = vadd.f32 %v393_v30, %v362_v27  ;;  %v384_v37 = vadd.f32 %v383_v33, %v382_v31  ;;  %v396_v38 = vadd.f32 %v395_v34, %v394_v32 }
  0xfb   :  { %v318_v39 = vmax.f32 %v310_v35, 0.0  ;;  %v322_v40 = vmax.f32 %v314_v36, 0.0  ;;  %v311_v41 = vadd.f32 %v384_v37, %v362_v27  ;;  %v315_v42 = vadd.f32 %v396_v38, %v362_v27 }
  0xfd   :  { %326 = vst [vmem:[%s569_s3] sm:$0xff] %v318_v39  ;;  %330 = vst [vmem:[%s569_s3 + $0x20] sm:$0xff] %v322_v40  ;;  %v319_v43 = vmax.f32 %v311_v41, 0.0  ;;  %v323_v44 = vmax.f32 %v315_v42, 0.0  ;;  %v385_v45 = vpop.f32.mrb[4].mxu0  ;;  %v397_v46 = vpop.f32.mrb[4].mxu1 }
  0xfe   :  { %v386_v47 = vpop.f32.mrb[5].mxu0  ;;  %v398_v48 = vpop.f32.mrb[5].mxu1 }
  0xff   :  { %327 = vst [vmem:[%s569_s3 + $0x8] sm:$0xff] %v319_v43  ;;  %331 = vst [vmem:[%s569_s3 + $0x28] sm:$0xff] %v323_v44  ;;  %v387_v49 = vadd.f32 %v386_v47, %v385_v45  ;;  %v399_v50 = vadd.f32 %v398_v48, %v397_v46  ;;  %v388_v51 = vpop.f32.mrb[6].mxu0  ;;  %v400_v52 = vpop.f32.mrb[6].mxu1 }
 0x100   :  { %v389_v53 = vpop.f32.mrb[7].mxu0  ;;  %v401_v54 = vpop.f32.mrb[7].mxu1 }
 0x101   :  { %v312_v55 = vadd.f32 %v387_v49, %v362_v27  ;;  %v316_v56 = vadd.f32 %v399_v50, %v362_v27  ;;  %v390_v57 = vadd.f32 %v389_v53, %v388_v51  ;;  %v402_v58 = vadd.f32 %v401_v54, %v400_v52 }
 0x103   :  { %v320_v59 = vmax.f32 %v312_v55, 0.0  ;;  %v324_v60 = vmax.f32 %v316_v56, 0.0  ;;  %v313_v61 = vadd.f32 %v390_v57, %v362_v27  ;;  %v317_v62 = vadd.f32 %v402_v58, %v362_v27 }
 0x105   :  { %328 = vst [vmem:[%s569_s3 + $0x10] sm:$0xff] %v320_v59  ;;  %332 = vst [vmem:[%s569_s3 + $0x30] sm:$0xff] %v324_v60  ;;  %v321_v63 = vmax.f32 %v313_v61, 0.0  ;;  %v325_v0 = vmax.f32 %v317_v62, 0.0 }
 0x107   :  { %329 = vst [vmem:[%s569_s3 + $0x18] sm:$0xff] %v321_v63  ;;  %333 = vst [vmem:[%s569_s3 + $0x38] sm:$0xff] %v325_v0 }

// kernel: _lambda_.27
= control target key start
LH: loop header
LB: loop body
LE: loop exit
PB: predicated region body
PF: predicated region fallthrough
CT: control target
= control target key end

     0   :  { %s410_s1 = inlined_call_operand.vmem [shape: bf16[128,128], index: 1, kind: input, shape index: {}]   ;;  %s411_s0 = inlined_call_operand.vmem [shape: bf16[64,128], index: 0, kind: input, shape index: {}]   ;;  %s412_s2 = inlined_call_operand.vmem [shape: f32[1,128], index: 2, kind: input, shape index: {}]   ;;  %s413_s3 = inlined_call_operand.vmem [shape: f32[64,128], index: 3, kind: output, shape index: {}]  }
   0x1   :  { %v315_v0 = vld [vmem:[%s410_s1] sm:$0xff]   ;;  %v316_v1 = vld [vmem:[%s410_s1 + $0x8] sm:$0xff]   ;;  %v317_v2 = vld [vmem:[%s410_s1 + $0x10] sm:$0xff]  }
   0x2   :  { %275 = vmatprep.subr.bf16.mxu0 %v315_v0  ;;  %299 = vmatprep.subr.bf16.mxu1 %v315_v0  ;;  %v318_v3 = vld [vmem:[%s410_s1 + $0x18] sm:$0xff]   ;;  %v323_v4 = vld [vmem:[%s411_s0] sm:$0xff]   ;;  %v324_v5 = vld [vmem:[%s411_s0 + $0x10] sm:$0xff]  }
   0x3   :  { %276 = vmatpush3.bf16.msra.mxu0 %v315_v0  ;;  %307 = vmatpush3.bf16.msra.mxu1 %v315_v0  ;;  %v319_v6 = vld [vmem:[%s410_s1 + $0x20] sm:$0xff]   ;;  %v320_v7 = vld [vmem:[%s410_s1 + $0x28] sm:$0xff]   ;;  %v321_v8 = vld [vmem:[%s410_s1 + $0x30] sm:$0xff]  }
   0x4   :  { %277 = vmatprep.subr.bf16.mxu0 %v316_v1  ;;  %300 = vmatprep.subr.bf16.mxu1 %v316_v1  ;;  %v322_v9 = vld [vmem:[%s410_s1 + $0x38] sm:$0xff]   ;;  %v325_v10 = vld [vmem:[%s411_s0 + $0x8] sm:$0xff]   ;;  %v262_v12 = vld [vmem:[%s412_s2] ss:$0 sm:$0xff] }
   0x5   :  { %291 = vmatprep.mubr.bf16.mxu0 %v323_v4  ;;  %295 = vmatprep.mubr.bf16.mxu1 %v324_v5  ;;  %v326_v11 = vld [vmem:[%s411_s0 + $0x18] sm:$0xff]  }
   0x7   :  { %278 = vmatpush3.bf16.msra.mxu0 %v316_v1  ;;  %308 = vmatpush3.bf16.msra.mxu1 %v316_v1 }
   0x8   :  { %279 = vmatprep.subr.bf16.mxu0 %v317_v2  ;;  %301 = vmatprep.subr.bf16.mxu1 %v317_v2 }
   0xb   :  { %280 = vmatpush3.bf16.msra.mxu0 %v317_v2  ;;  %309 = vmatpush3.bf16.msra.mxu1 %v317_v2 }
   0xc   :  { %281 = vmatprep.subr.bf16.mxu0 %v318_v3  ;;  %302 = vmatprep.subr.bf16.mxu1 %v318_v3 }
   0xf   :  { %282 = vmatpush3.bf16.msra.mxu0 %v318_v3  ;;  %310 = vmatpush3.bf16.msra.mxu1 %v318_v3 }
  0x10   :  { %283 = vmatprep.subr.bf16.mxu0 %v319_v6  ;;  %303 = vmatprep.subr.bf16.mxu1 %v319_v6 }
  0x13   :  { %284 = vmatpush3.bf16.msra.mxu0 %v319_v6  ;;  %311 = vmatpush3.bf16.msra.mxu1 %v319_v6 }
  0x14   :  { %285 = vmatprep.subr.bf16.mxu0 %v320_v7  ;;  %304 = vmatprep.subr.bf16.mxu1 %v320_v7 }
  0x17   :  { %286 = vmatpush3.bf16.msra.mxu0 %v320_v7  ;;  %312 = vmatpush3.bf16.msra.mxu1 %v320_v7 }
  0x18   :  { %287 = vmatprep.subr.bf16.mxu0 %v321_v8  ;;  %305 = vmatprep.subr.bf16.mxu1 %v321_v8 }
  0x1b   :  { %288 = vmatpush3.bf16.msra.mxu0 %v321_v8  ;;  %313 = vmatpush3.bf16.msra.mxu1 %v321_v8 }
  0x1c   :  { %289 = vmatprep.subr.bf16.mxu0 %v322_v9  ;;  %306 = vmatprep.subr.bf16.mxu1 %v322_v9 }
  0x1f   :  { %290 = vmatpush3.bf16.msra.mxu0 %v322_v9  ;;  %314 = vmatpush3.bf16.msra.mxu1 %v322_v9 }
  0x22   :  { %292 = vmatmul.mubr.bf16.vlgmr.msra.gmra.mrb[0].mxu0 %v325_v10  ;;  %296 = vmatmul.mubr.bf16.vlgmr.msra.gmra.mrb[0].mxu1 %v326_v11 }
  0xf5   :  { %v293_v13 = vpop.f32.mrb[0].mxu0  ;;  %v297_v14 = vpop.f32.mrb[0].mxu1 }
  0xf6   :  { %v232_v15 = vadd.f32 %v293_v13, %v262_v12  ;;  %v236_v16 = vadd.f32 %v297_v14, %v262_v12  ;;  %v165_v17 = vpop.f32.mrb[1].mxu0  ;;  %v181_v18 = vpop.f32.mrb[1].mxu1 }
  0xf7   :  { %v230_v19 = vadd.f32 %v262_v12, %v165_v17  ;;  %v234_v20 = vadd.f32 %v262_v12, %v181_v18  ;;  %v294_v21 = vpop.f32.mrb[2].mxu0  ;;  %v298_v22 = vpop.f32.mrb[2].mxu1 }
  0xf8   :  { %240 = vst [vmem:[%s413_s3 + $0x10] sm:$0xff] %v232_v15  ;;  %244 = vst [vmem:[%s413_s3 + $0x30] sm:$0xff] %v236_v16  ;;  %v233_v23 = vadd.f32 %v294_v21, %v262_v12  ;;  %v237_v24 = vadd.f32 %v298_v22, %v262_v12  ;;  %v168_v25 = vpop.f32.mrb[3].mxu0  ;;  %v184_v26 = vpop.f32.mrb[3].mxu1 }
  0xf9   :  { %238 = vst [vmem:[%s413_s3] sm:$0xff] %v230_v19  ;;  %242 = vst [vmem:[%s413_s3 + $0x20] sm:$0xff] %v234_v20  ;;  %v231_v27 = vadd.f32 %v262_v12, %v168_v25  ;;  %v235_v28 = vadd.f32 %v262_v12, %v184_v26 }
  0xfa   :  { %241 = vst [vmem:[%s413_s3 + $0x18] sm:$0xff] %v233_v23  ;;  %245 = vst [vmem:[%s413_s3 + $0x38] sm:$0xff] %v237_v24 }
  0xfb   :  { %239 = vst [vmem:[%s413_s3 + $0x8] sm:$0xff] %v231_v27  ;;  %243 = vst [vmem:[%s413_s3 + $0x28] sm:$0xff] %v235_v28 }

// kernel: _lambda_.28
= control target key start
LH: loop header
LB: loop body
LE: loop exit
PB: predicated region body
PF: predicated region fallthrough
CT: control target
= control target key end

     0   :  { %s466_s1 = inlined_call_operand.vmem [shape: bf16[128,128], index: 1, kind: input, shape index: {}]   ;;  %s467_s0 = inlined_call_operand.vmem [shape: bf16[64,128], index: 0, kind: input, shape index: {}]   ;;  %s468_s2 = inlined_call_operand.vmem [shape: f32[1,128], index: 2, kind: input, shape index: {}]   ;;  %s469_s3 = inlined_call_operand.vmem [shape: f32[64,128], index: 3, kind: input, shape index: {}]   ;;  %s470_s4 = inlined_call_operand.vmem [shape: f32[64,128], index: 4, kind: output, shape index: {}]  }
   0x1   :  { %v342_v0 = vld [vmem:[%s466_s1] sm:$0xff]   ;;  %v343_v1 = vld [vmem:[%s466_s1 + $0x8] sm:$0xff]   ;;  %v344_v2 = vld [vmem:[%s466_s1 + $0x10] sm:$0xff]  }
   0x2   :  { %302 = vmatprep.subr.bf16.mxu0 %v342_v0  ;;  %326 = vmatprep.subr.bf16.mxu1 %v342_v0  ;;  %v345_v3 = vld [vmem:[%s466_s1 + $0x18] sm:$0xff]   ;;  %v350_v4 = vld [vmem:[%s467_s0] sm:$0xff]   ;;  %v351_v5 = vld [vmem:[%s467_s0 + $0x10] sm:$0xff]  }
   0x3   :  { %303 = vmatpush3.bf16.msra.mxu0 %v342_v0  ;;  %334 = vmatpush3.bf16.msra.mxu1 %v342_v0  ;;  %v346_v6 = vld [vmem:[%s466_s1 + $0x20] sm:$0xff]   ;;  %v347_v7 = vld [vmem:[%s466_s1 + $0x28] sm:$0xff]   ;;  %v348_v8 = vld [vmem:[%s466_s1 + $0x30] sm:$0xff]  }
   0x4   :  { %304 = vmatprep.subr.bf16.mxu0 %v343_v1  ;;  %327 = vmatprep.subr.bf16.mxu1 %v343_v1  ;;  %v349_v9 = vld [vmem:[%s466_s1 + $0x38] sm:$0xff]   ;;  %v352_v10 = vld [vmem:[%s467_s0 + $0x8] sm:$0xff]   ;;  %v289_v12 = vld [vmem:[%s468_s2] ss:$0 sm:$0xff] }
   0x5   :  { %318 = vmatprep.mubr.bf16.mxu0 %v350_v4  ;;  %322 = vmatprep.mubr.bf16.mxu1 %v351_v5  ;;  %v353_v11 = vld [vmem:[%s467_s0 + $0x18] sm:$0xff]   ;;  %v243_v14 = vld [vmem:[%s469_s3 + $0x10] sm:$0xff]  ;;  %v241_v20 = vld [vmem:[%s469_s3] sm:$0xff] }
   0x6   :  { %v247_v16 = vld [vmem:[%s469_s3 + $0x30] sm:$0xff]  ;;  %v245_v22 = vld [vmem:[%s469_s3 + $0x20] sm:$0xff]  ;;  %v244_v26 = vld [vmem:[%s469_s3 + $0x18] sm:$0xff] }
   0x7   :  { %305 = vmatpush3.bf16.msra.mxu0 %v343_v1  ;;  %335 = vmatpush3.bf16.msra.mxu1 %v343_v1  ;;  %v248_v28 = vld [vmem:[%s469_s3 + $0x38] sm:$0xff]  ;;  %v242_v34 = vld [vmem:[%s469_s3 + $0x8] sm:$0xff] }
   0x8   :  { %306 = vmatprep.subr.bf16.mxu0 %v344_v2  ;;  %328 = vmatprep.subr.bf16.mxu1 %v344_v2  ;;  %v246_v36 = vld [vmem:[%s469_s3 + $0x28] sm:$0xff] }
   0xb   :  { %307 = vmatpush3.bf16.msra.mxu0 %v344_v2  ;;  %336 = vmatpush3.bf16.msra.mxu1 %v344_v2 }
   0xc   :  { %308 = vmatprep.subr.bf16.mxu0 %v345_v3  ;;  %329 = vmatprep.subr.bf16.mxu1 %v345_v3 }
   0xf   :  { %309 = vmatpush3.bf16.msra.mxu0 %v345_v3  ;;  %337 = vmatpush3.bf16.msra.mxu1 %v345_v3 }
  0x10   :  { %310 = vmatprep.subr.bf16.mxu0 %v346_v6  ;;  %330 = vmatprep.subr.bf16.mxu1 %v346_v6 }
  0x13   :  { %311 = vmatpush3.bf16.msra.mxu0 %v346_v6  ;;  %338 = vmatpush3.bf16.msra.mxu1 %v346_v6 }
  0x14   :  { %312 = vmatprep.subr.bf16.mxu0 %v347_v7  ;;  %331 = vmatprep.subr.bf16.mxu1 %v347_v7 }
  0x17   :  { %313 = vmatpush3.bf16.msra.mxu0 %v347_v7  ;;  %339 = vmatpush3.bf16.msra.mxu1 %v347_v7 }
  0x18   :  { %314 = vmatprep.subr.bf16.mxu0 %v348_v8  ;;  %332 = vmatprep.subr.bf16.mxu1 %v348_v8 }
  0x1b   :  { %315 = vmatpush3.bf16.msra.mxu0 %v348_v8  ;;  %340 = vmatpush3.bf16.msra.mxu1 %v348_v8 }
  0x1c   :  { %316 = vmatprep.subr.bf16.mxu0 %v349_v9  ;;  %333 = vmatprep.subr.bf16.mxu1 %v349_v9 }
  0x1f   :  { %317 = vmatpush3.bf16.msra.mxu0 %v349_v9  ;;  %341 = vmatpush3.bf16.msra.mxu1 %v349_v9 }
  0x22   :  { %319 = vmatmul.mubr.bf16.vlgmr.msra.gmra.mrb[0].mxu0 %v352_v10  ;;  %323 = vmatmul.mubr.bf16.vlgmr.msra.gmra.mrb[0].mxu1 %v353_v11 }
  0xf5   :  { %v320_v13 = vpop.f32.mrb[0].mxu0  ;;  %v324_v15 = vpop.f32.mrb[0].mxu1 }
  0xf6   :  { %v235_v17 = vadd.f32 %v320_v13, %v289_v12  ;;  %v239_v18 = vadd.f32 %v324_v15, %v289_v12  ;;  %v168_v19 = vpop.f32.mrb[1].mxu0  ;;  %v184_v21 = vpop.f32.mrb[1].mxu1 }
  0xf7   :  { %v233_v23 = vadd.f32 %v289_v12, %v168_v19  ;;  %v237_v24 = vadd.f32 %v289_v12, %v184_v21  ;;  %v321_v25 = vpop.f32.mrb[2].mxu0  ;;  %v325_v27 = vpop.f32.mrb[2].mxu1 }
  0xf8   :  { %v251_v29 = vadd.f32 %v243_v14, %v235_v17  ;;  %v255_v30 = vadd.f32 %v247_v16, %v239_v18  ;;  %v236_v31 = vadd.f32 %v321_v25, %v289_v12  ;;  %v240_v32 = vadd.f32 %v325_v27, %v289_v12  ;;  %v171_v33 = vpop.f32.mrb[3].mxu0  ;;  %v187_v35 = vpop.f32.mrb[3].mxu1 }
  0xf9   :  { %v249_v37 = vadd.f32 %v241_v20, %v233_v23  ;;  %v253_v38 = vadd.f32 %v245_v22, %v237_v24  ;;  %v234_v39 = vadd.f32 %v289_v12, %v171_v33  ;;  %v238_v40 = vadd.f32 %v289_v12, %v187_v35 }
  0xfa   :  { %v259_v41 = vmax.f32 %v251_v29, 0.0  ;;  %v263_v42 = vmax.f32 %v255_v30, 0.0  ;;  %v252_v43 = vadd.f32 %v244_v26, %v236_v31  ;;  %v256_v44 = vadd.f32 %v248_v28, %v240_v32 }
  0xfb   :  { %v257_v45 = vmax.f32 %v249_v37, 0.0  ;;  %v261_v46 = vmax.f32 %v253_v38, 0.0  ;;  %v250_v47 = vadd.f32 %v242_v34, %v234_v39  ;;  %v254_v48 = vadd.f32 %v246_v36, %v238_v40 }
  0xfc   :  { %267 = vst [vmem:[%s470_s4 + $0x10] sm:$0xff] %v259_v41  ;;  %271 = vst [vmem:[%s470_s4 + $0x30] sm:$0xff] %v263_v42  ;;  %v260_v49 = vmax.f32 %v252_v43, 0.0  ;;  %v264_v50 = vmax.f32 %v256_v44, 0.0 }
  0xfd   :  { %265 = vst [vmem:[%s470_s4] sm:$0xff] %v257_v45  ;;  %269 = vst [vmem:[%s470_s4 + $0x20] sm:$0xff] %v261_v46  ;;  %v258_v51 = vmax.f32 %v250_v47, 0.0  ;;  %v262_v52 = vmax.f32 %v254_v48, 0.0 }
  0xfe   :  { %268 = vst [vmem:[%s470_s4 + $0x18] sm:$0xff] %v260_v49  ;;  %272 = vst [vmem:[%s470_s4 + $0x38] sm:$0xff] %v264_v50 }
  0xff   :  { %266 = vst [vmem:[%s470_s4 + $0x8] sm:$0xff] %v258_v51  ;;  %270 = vst [vmem:[%s470_s4 + $0x28] sm:$0xff] %v262_v52 }

// kernel: _lambda_.29
= control target key start
LH: loop header
LB: loop body
LE: loop exit
PB: predicated region body
PF: predicated region fallthrough
CT: control target
= control target key end

     0   :  { %s418_s1 = inlined_call_operand.vmem [shape: bf16[128,128], index: 1, kind: input, shape index: {}]   ;;  %s419_s0 = inlined_call_operand.vmem [shape: bf16[64,128], index: 0, kind: input, shape index: {}]   ;;  %s420_s2 = inlined_call_operand.vmem [shape: f32[1,128], index: 2, kind: input, shape index: {}]   ;;  %s421_s3 = inlined_call_operand.vmem [shape: f32[64,128], index: 3, kind: output, shape index: {}]  }
   0x1   :  { %v323_v0 = vld [vmem:[%s418_s1] sm:$0xff]   ;;  %v324_v1 = vld [vmem:[%s418_s1 + $0x8] sm:$0xff]   ;;  %v325_v2 = vld [vmem:[%s418_s1 + $0x10] sm:$0xff]  }
   0x2   :  { %283 = vmatprep.subr.bf16.mxu0 %v323_v0  ;;  %307 = vmatprep.subr.bf16.mxu1 %v323_v0  ;;  %v326_v3 = vld [vmem:[%s418_s1 + $0x18] sm:$0xff]   ;;  %v331_v4 = vld [vmem:[%s419_s0] sm:$0xff]   ;;  %v332_v5 = vld [vmem:[%s419_s0 + $0x10] sm:$0xff]  }
   0x3   :  { %284 = vmatpush3.bf16.msra.mxu0 %v323_v0  ;;  %315 = vmatpush3.bf16.msra.mxu1 %v323_v0  ;;  %v327_v6 = vld [vmem:[%s418_s1 + $0x20] sm:$0xff]   ;;  %v328_v7 = vld [vmem:[%s418_s1 + $0x28] sm:$0xff]   ;;  %v329_v8 = vld [vmem:[%s418_s1 + $0x30] sm:$0xff]  }
   0x4   :  { %285 = vmatprep.subr.bf16.mxu0 %v324_v1  ;;  %308 = vmatprep.subr.bf16.mxu1 %v324_v1  ;;  %v330_v9 = vld [vmem:[%s418_s1 + $0x38] sm:$0xff]   ;;  %v333_v10 = vld [vmem:[%s419_s0 + $0x8] sm:$0xff]   ;;  %v270_v12 = vld [vmem:[%s420_s2] ss:$0 sm:$0xff] }
   0x5   :  { %299 = vmatprep.mubr.bf16.mxu0 %v331_v4  ;;  %303 = vmatprep.mubr.bf16.mxu1 %v332_v5  ;;  %v334_v11 = vld [vmem:[%s419_s0 + $0x18] sm:$0xff]  }
   0x7   :  { %286 = vmatpush3.bf16.msra.mxu0 %v324_v1  ;;  %316 = vmatpush3.bf16.msra.mxu1 %v324_v1 }
   0x8   :  { %287 = vmatprep.subr.bf16.mxu0 %v325_v2  ;;  %309 = vmatprep.subr.bf16.mxu1 %v325_v2 }
   0xb   :  { %288 = vmatpush3.bf16.msra.mxu0 %v325_v2  ;;  %317 = vmatpush3.bf16.msra.mxu1 %v325_v2 }
   0xc   :  { %289 = vmatprep.subr.bf16.mxu0 %v326_v3  ;;  %310 = vmatprep.subr.bf16.mxu1 %v326_v3 }
   0xf   :  { %290 = vmatpush3.bf16.msra.mxu0 %v326_v3  ;;  %318 = vmatpush3.bf16.msra.mxu1 %v326_v3 }
  0x10   :  { %291 = vmatprep.subr.bf16.mxu0 %v327_v6  ;;  %311 = vmatprep.subr.bf16.mxu1 %v327_v6 }
  0x13   :  { %292 = vmatpush3.bf16.msra.mxu0 %v327_v6  ;;  %319 = vmatpush3.bf16.msra.mxu1 %v327_v6 }
  0x14   :  { %293 = vmatprep.subr.bf16.mxu0 %v328_v7  ;;  %312 = vmatprep.subr.bf16.mxu1 %v328_v7 }
  0x17   :  { %294 = vmatpush3.bf16.msra.mxu0 %v328_v7  ;;  %320 = vmatpush3.bf16.msra.mxu1 %v328_v7 }
  0x18   :  { %295 = vmatprep.subr.bf16.mxu0 %v329_v8  ;;  %313 = vmatprep.subr.bf16.mxu1 %v329_v8 }
  0x1b   :  { %296 = vmatpush3.bf16.msra.mxu0 %v329_v8  ;;  %321 = vmatpush3.bf16.msra.mxu1 %v329_v8 }
  0x1c   :  { %297 = vmatprep.subr.bf16.mxu0 %v330_v9  ;;  %314 = vmatprep.subr.bf16.mxu1 %v330_v9 }
  0x1f   :  { %298 = vmatpush3.bf16.msra.mxu0 %v330_v9  ;;  %322 = vmatpush3.bf16.msra.mxu1 %v330_v9 }
  0x22   :  { %300 = vmatmul.mubr.bf16.vlgmr.msra.gmra.mrb[0].mxu0 %v333_v10  ;;  %304 = vmatmul.mubr.bf16.vlgmr.msra.gmra.mrb[0].mxu1 %v334_v11 }
  0xf5   :  { %v301_v13 = vpop.f32.mrb[0].mxu0  ;;  %v305_v14 = vpop.f32.mrb[0].mxu1 }
  0xf6   :  { %v232_v15 = vadd.f32 %v301_v13, %v270_v12  ;;  %v236_v16 = vadd.f32 %v305_v14, %v270_v12  ;;  %v165_v17 = vpop.f32.mrb[1].mxu0  ;;  %v181_v18 = vpop.f32.mrb[1].mxu1 }
  0xf7   :  { %v230_v19 = vadd.f32 %v270_v12, %v165_v17  ;;  %v234_v20 = vadd.f32 %v270_v12, %v181_v18  ;;  %v302_v21 = vpop.f32.mrb[2].mxu0  ;;  %v306_v22 = vpop.f32.mrb[2].mxu1 }
  0xf8   :  { %v240_v23 = vmax.f32 %v232_v15, 0.0  ;;  %v244_v24 = vmax.f32 %v236_v16, 0.0  ;;  %v233_v25 = vadd.f32 %v302_v21, %v270_v12  ;;  %v237_v26 = vadd.f32 %v306_v22, %v270_v12  ;;  %v168_v27 = vpop.f32.mrb[3].mxu0  ;;  %v184_v28 = vpop.f32.mrb[3].mxu1 }
  0xf9   :  { %v238_v29 = vmax.f32 %v230_v19, 0.0  ;;  %v242_v30 = vmax.f32 %v234_v20, 0.0  ;;  %v231_v31 = vadd.f32 %v270_v12, %v168_v27  ;;  %v235_v32 = vadd.f32 %v270_v12, %v184_v28 }
  0xfa   :  { %248 = vst [vmem:[%s421_s3 + $0x10] sm:$0xff] %v240_v23  ;;  %252 = vst [vmem:[%s421_s3 + $0x30] sm:$0xff] %v244_v24  ;;  %v241_v33 = vmax.f32 %v233_v25, 0.0  ;;  %v245_v34 = vmax.f32 %v237_v26, 0.0 }
  0xfb   :  { %246 = vst [vmem:[%s421_s3] sm:$0xff] %v238_v29  ;;  %250 = vst [vmem:[%s421_s3 + $0x20] sm:$0xff] %v242_v30  ;;  %v239_v35 = vmax.f32 %v231_v31, 0.0  ;;  %v243_v36 = vmax.f32 %v235_v32, 0.0 }
  0xfc   :  { %249 = vst [vmem:[%s421_s3 + $0x18] sm:$0xff] %v241_v33  ;;  %253 = vst [vmem:[%s421_s3 + $0x38] sm:$0xff] %v245_v34 }
  0xfd   :  { %247 = vst [vmem:[%s421_s3 + $0x8] sm:$0xff] %v239_v35  ;;  %251 = vst [vmem:[%s421_s3 + $0x28] sm:$0xff] %v243_v36 }

// kernel: _lambda_.31
= control target key start
LH: loop header
LB: loop body
LE: loop exit
PB: predicated region body
PF: predicated region fallthrough
CT: control target
= control target key end

     0   :  { %v210_v0 = vmov 0.0   ;;  %vm211_vm0 = vmmov 0   ;;  %s268_s1 = inlined_call_operand.vmem [shape: bf16[128,128], index: 1, kind: input, shape index: {}]   ;;  %s269_s0 = inlined_call_operand.vmem [shape: bf16[16,128], index: 0, kind: input, shape index: {}]   ;;  %s270_s2 = inlined_call_operand.vmem [shape: f32[1,128], index: 2, kind: input, shape index: {}]   ;;  %s271_s3 = inlined_call_operand.vmem [shape: f32[16,128], index: 3, kind: output, shape index: {}]  }
   0x1   :  { %179 = vmatprep.subr.bf16.mxu0 %v210_v0  ;;  %v201_v1 = vld [vmem:[%s268_s1] sm:$0xff]   ;;  %195 = vmatprep.mubr.msk.bf16.mxu0 %vm211_vm0, %v210_v0  ;;  %v202_v2 = vld [vmem:[%s268_s1 + $0x8] sm:$0xff]   ;;  %v203_v3 = vld [vmem:[%s268_s1 + $0x10] sm:$0xff]  }
   0x2   :  { %180 = vmatpush3.bf16.msra.mxu0 %v201_v1  ;;  %v204_v4 = vld [vmem:[%s268_s1 + $0x18] sm:$0xff]   ;;  %v205_v5 = vld [vmem:[%s268_s1 + $0x20] sm:$0xff]   ;;  %v206_v6 = vld [vmem:[%s268_s1 + $0x28] sm:$0xff]  }
   0x3   :  { %181 = vmatprep.subr.bf16.mxu0 %v210_v0  ;;  %v207_v7 = vld [vmem:[%s268_s1 + $0x30] sm:$0xff]   ;;  %v208_v8 = vld [vmem:[%s268_s1 + $0x38] sm:$0xff]   ;;  %v209_v9 = vld [vmem:[%s269_s0] sm:$0xff]  }
   0x4   :  { %v169_v10 = vld [vmem:[%s270_s2] ss:$0 sm:$0xff] }
   0x6   :  { %182 = vmatpush3.bf16.msra.mxu0 %v202_v2 }
   0x7   :  { %183 = vmatprep.subr.bf16.mxu0 %v210_v0 }
   0xa   :  { %184 = vmatpush3.bf16.msra.mxu0 %v203_v3 }
   0xb   :  { %185 = vmatprep.subr.bf16.mxu0 %v210_v0 }
   0xe   :  { %186 = vmatpush3.bf16.msra.mxu0 %v204_v4 }
   0xf   :  { %187 = vmatprep.subr.bf16.mxu0 %v210_v0 }
  0x12   :  { %188 = vmatpush3.bf16.msra.mxu0 %v205_v5 }
  0x13   :  { %189 = vmatprep.subr.bf16.mxu0 %v210_v0 }
  0x16   :  { %190 = vmatpush3.bf16.msra.mxu0 %v206_v6 }
  0x17   :  { %191 = vmatprep.subr.bf16.mxu0 %v210_v0 }
  0x1a   :  { %192 = vmatpush3.bf16.msra.mxu0 %v207_v7 }
  0x1b   :  { %193 = vmatprep.subr.bf16.mxu0 %v210_v0 }
  0x1e   :  { %194 = vmatpush3.bf16.msra.mxu0 %v208_v8 }
  0x21   :  { %196 = vmatmul.mubr.bf16.vlgmr.msra.gmra.mrb[0].mxu0 %v209_v9 }
  0xf4   :  { %v129_v11 = vpop.f32.mrb[0].mxu0 }
  0xf5   :  { %v152_v12 = vadd.f32 %v169_v10, %v129_v11  ;;  %v197_v13 = vpop.f32.mrb[1].mxu0 }
  0xf6   :  { %v132_v14 = vpop.f32.mrb[2].mxu0 }
  0xf7   :  { %154 = vst [vmem:[%s271_s3] sm:$0xff] %v152_v12  ;;  %v153_v15 = vadd.f32 %v169_v10, %v132_v14  ;;  %v198_v16 = vpop.f32.mrb[3].mxu0 }
  0xf9   :  { %155 = vst [vmem:[%s271_s3 + $0x8] sm:$0xff] %v153_v15 }

// kernel: _lambda_.30
= control target key start
LH: loop header
LB: loop body
LE: loop exit
PB: predicated region body
PF: predicated region fallthrough
CT: control target
= control target key end

     0   :  { %v452_v1 = vmov 0.0   ;;  %vm453_vm0 = vmmov 0   ;;  %s564_s1 = inlined_call_operand.vmem [shape: bf16[384,128], index: 1, kind: input, shape index: {}]   ;;  %s565_s0 = inlined_call_operand.vmem [shape: bf16[16,384], index: 0, kind: input, shape index: {}]   ;;  %s566_s2 = inlined_call_operand.vmem [shape: f32[1,128], index: 2, kind: input, shape index: {}]   ;;  %s567_s3 = inlined_call_operand.vmem [shape: f32[16,128], index: 3, kind: output, shape index: {}]  }
   0x1   :  { %v424_v0 = vld [vmem:[%s564_s1 + $0x40] sm:$0xff]   ;;  %402 = vmatprep.subr.bf16.mxu1 %v452_v1  ;;  %418 = vmatprep.mubr.msk.bf16.mxu1 %vm453_vm0, %v452_v1  ;;  %v427_v4 = vld [vmem:[%s564_s1 + $0x48] sm:$0xff]   ;;  %v430_v7 = vld [vmem:[%s564_s1 + $0x50] sm:$0xff]  }
   0x2   :  { %v425_v2 = vld [vmem:[%s564_s1] sm:$0xff]   ;;  %371 = vmatprep.subr.bf16.mxu0 %v424_v0  ;;  %v428_v5 = vld [vmem:[%s564_s1 + $0x8] sm:$0xff]   ;;  %v431_v8 = vld [vmem:[%s564_s1 + $0x10] sm:$0xff]  }
   0x3   :  { %v426_v3 = vld [vmem:[%s564_s1 + $0x80] sm:$0xff]   ;;  %372 = vmatpush3.bf16.msra.mxu0 %v425_v2  ;;  %v429_v6 = vld [vmem:[%s564_s1 + $0x88] sm:$0xff]   ;;  %v432_v9 = vld [vmem:[%s564_s1 + $0x90] sm:$0xff]  }
   0x4   :  { %403 = vmatpush3.bf16.msra.mxu1 %v426_v3  ;;  %373 = vmatprep.subr.bf16.mxu0 %v427_v4  ;;  %v433_v10 = vld [vmem:[%s564_s1 + $0x58] sm:$0xff]   ;;  %v436_v13 = vld [vmem:[%s564_s1 + $0x60] sm:$0xff]   ;;  %v439_v16 = vld [vmem:[%s564_s1 + $0x68] sm:$0xff]  }
   0x5   :  { %404 = vmatprep.subr.bf16.mxu1 %v452_v1  ;;  %v434_v11 = vld [vmem:[%s564_s1 + $0x18] sm:$0xff]   ;;  %v437_v14 = vld [vmem:[%s564_s1 + $0x20] sm:$0xff]   ;;  %v440_v17 = vld [vmem:[%s564_s1 + $0x28] sm:$0xff]  }
   0x6   :  { %v435_v12 = vld [vmem:[%s564_s1 + $0x98] sm:$0xff]   ;;  %v438_v15 = vld [vmem:[%s564_s1 + $0xa0] sm:$0xff]   ;;  %v441_v18 = vld [vmem:[%s564_s1 + $0xa8] sm:$0xff]  }
   0x7   :  { %374 = vmatpush3.bf16.msra.mxu0 %v428_v5  ;;  %v442_v19 = vld [vmem:[%s564_s1 + $0x70] sm:$0xff]   ;;  %v445_v22 = vld [vmem:[%s564_s1 + $0x78] sm:$0xff]   ;;  %v448_v26 = vld [vmem:[%s565_s0] ss:$12 sps:$4 sm:$0xff]  }
   0x8   :  { %405 = vmatpush3.bf16.msra.mxu1 %v429_v6  ;;  %375 = vmatprep.subr.bf16.mxu0 %v430_v7  ;;  %v443_v20 = vld [vmem:[%s564_s1 + $0x30] sm:$0xff]   ;;  %v446_v24 = vld [vmem:[%s564_s1 + $0x38] sm:$0xff]   ;;  %v370_v34 = vld [vmem:[%s566_s2] ss:$0 sm:$0xff] }
   0x9   :  { %406 = vmatprep.subr.bf16.mxu1 %v452_v1  ;;  %v444_v21 = vld [vmem:[%s564_s1 + $0xb0] sm:$0xff]   ;;  %v447_v25 = vld [vmem:[%s564_s1 + $0xb8] sm:$0xff]  }
   0xa   :  { %v450_v23 = vld [vmem:[%s565_s0 + $0x4] ss:$12 sps:$4 sm:$0xff]   ;;  %v451_v27 = vld [vmem:[%s565_s0 + $0x8] ss:$12 sps:$4 sm:$0xff]  }
   0xb   :  { %376 = vmatpush3.bf16.msra.mxu0 %v431_v8  ;;  %267 = vmatprep.mubr.bf16.mxu0 %v450_v23 }
   0xc   :  { %407 = vmatpush3.bf16.msra.mxu1 %v432_v9  ;;  %377 = vmatprep.subr.bf16.mxu0 %v433_v10 }
   0xd   :  { %408 = vmatprep.subr.bf16.mxu1 %v452_v1 }
   0xf   :  { %378 = vmatpush3.bf16.msra.mxu0 %v434_v11 }
  0x10   :  { %409 = vmatpush3.bf16.msra.mxu1 %v435_v12  ;;  %379 = vmatprep.subr.bf16.mxu0 %v436_v13 }
  0x11   :  { %410 = vmatprep.subr.bf16.mxu1 %v452_v1 }
  0x13   :  { %380 = vmatpush3.bf16.msra.mxu0 %v437_v14 }
  0x14   :  { %411 = vmatpush3.bf16.msra.mxu1 %v438_v15  ;;  %381 = vmatprep.subr.bf16.mxu0 %v439_v16 }
  0x15   :  { %412 = vmatprep.subr.bf16.mxu1 %v452_v1 }
  0x17   :  { %382 = vmatpush3.bf16.msra.mxu0 %v440_v17 }
  0x18   :  { %413 = vmatpush3.bf16.msra.mxu1 %v441_v18  ;;  %383 = vmatprep.subr.bf16.mxu0 %v442_v19 }
  0x19   :  { %414 = vmatprep.subr.bf16.mxu1 %v452_v1 }
  0x1b   :  { %384 = vmatpush3.bf16.msra.mxu0 %v443_v20 }
  0x1c   :  { %415 = vmatpush3.bf16.msra.mxu1 %v444_v21  ;;  %385 = vmatprep.subr.bf16.mxu0 %v445_v22 }
  0x1d   :  { %416 = vmatprep.subr.bf16.mxu1 %v452_v1 }
  0x1f   :  { %386 = vmatpush3.bf16.msra.mxu0 %v446_v24 }
  0x20   :  { %417 = vmatpush3.bf16.msra.mxu1 %v447_v25 }
  0x22   :  { %268 = vmatmul.mubr.bf16.vlgmr.msra.gmra.mrb[0].mxu0 %v448_v26 }
  0x23   :  { %419 = vmatmul.mubr.bf16.vlgmr.msra.gmra.mrb[0].mxu1 %v451_v27 }
  0xf5   :  { %v387_v28 = vpop.f32.mrb[0].mxu0 }
  0xf6   :  { %v310_v29 = vpop.f32.mrb[0].mxu1  ;;  %v388_v30 = vpop.f32.mrb[1].mxu0 }
  0xf7   :  { %v389_v31 = vadd.f32 %v388_v30, %v387_v28  ;;  %v420_v32 = vpop.f32.mrb[1].mxu1  ;;  %v390_v33 = vpop.f32.mrb[2].mxu0 }
  0xf8   :  { %v313_v35 = vpop.f32.mrb[2].mxu1  ;;  %v391_v36 = vpop.f32.mrb[3].mxu0 }
  0xf9   :  { %v311_v37 = vadd.f32 %v389_v31, %v310_v29  ;;  %v392_v38 = vadd.f32 %v391_v36, %v390_v33  ;;  %v421_v39 = vpop.f32.mrb[3].mxu1 }
  0xfb   :  { %v333_v40 = vadd.f32 %v370_v34, %v311_v37  ;;  %v314_v41 = vadd.f32 %v392_v38, %v313_v35 }
  0xfd   :  { %v335_v42 = vmax.f32 %v333_v40, 0.0  ;;  %v334_v43 = vadd.f32 %v370_v34, %v314_v41 }
  0xff   :  { %337 = vst [vmem:[%s567_s3] sm:$0xff] %v335_v42  ;;  %v336_v44 = vmax.f32 %v334_v43, 0.0 }
 0x101   :  { %338 = vst [vmem:[%s567_s3 + $0x8] sm:$0xff] %v336_v44 }

// kernel: _lambda_.32
= control target key start
LH: loop header
LB: loop body
LE: loop exit
PB: predicated region body
PF: predicated region fallthrough
CT: control target
= control target key end

     0   :  { %v219_v0 = vmov 0.0   ;;  %vm220_vm0 = vmmov 0   ;;  %s288_s1 = inlined_call_operand.vmem [shape: bf16[128,128], index: 1, kind: input, shape index: {}]   ;;  %s289_s0 = inlined_call_operand.vmem [shape: bf16[16,128], index: 0, kind: input, shape index: {}]   ;;  %s290_s2 = inlined_call_operand.vmem [shape: f32[1,128], index: 2, kind: input, shape index: {}]   ;;  %s291_s3 = inlined_call_operand.vmem [shape: f32[16,128], index: 3, kind: input, shape index: {}]   ;;  %s292_s4 = inlined_call_operand.vmem [shape: f32[16,128], index: 4, kind: output, shape index: {}]  }
   0x1   :  { %188 = vmatprep.subr.bf16.mxu0 %v219_v0  ;;  %v210_v1 = vld [vmem:[%s288_s1] sm:$0xff]   ;;  %204 = vmatprep.mubr.msk.bf16.mxu0 %vm220_vm0, %v219_v0  ;;  %v211_v2 = vld [vmem:[%s288_s1 + $0x8] sm:$0xff]   ;;  %v212_v3 = vld [vmem:[%s288_s1 + $0x10] sm:$0xff]  }
   0x2   :  { %189 = vmatpush3.bf16.msra.mxu0 %v210_v1  ;;  %v213_v4 = vld [vmem:[%s288_s1 + $0x18] sm:$0xff]   ;;  %v214_v5 = vld [vmem:[%s288_s1 + $0x20] sm:$0xff]   ;;  %v215_v6 = vld [vmem:[%s288_s1 + $0x28] sm:$0xff]  }
   0x3   :  { %190 = vmatprep.subr.bf16.mxu0 %v219_v0  ;;  %v216_v7 = vld [vmem:[%s288_s1 + $0x30] sm:$0xff]   ;;  %v217_v8 = vld [vmem:[%s288_s1 + $0x38] sm:$0xff]   ;;  %v218_v9 = vld [vmem:[%s289_s0] sm:$0xff]  }
   0x4   :  { %v178_v10 = vld [vmem:[%s290_s2] ss:$0 sm:$0xff]  ;;  %v158_v16 = vld [vmem:[%s291_s3 + $0x8] sm:$0xff] }
   0x5   :  { %v157_v12 = vld [vmem:[%s291_s3] sm:$0xff] }
   0x6   :  { %191 = vmatpush3.bf16.msra.mxu0 %v211_v2 }
   0x7   :  { %192 = vmatprep.subr.bf16.mxu0 %v219_v0 }
   0xa   :  { %193 = vmatpush3.bf16.msra.mxu0 %v212_v3 }
   0xb   :  { %194 = vmatprep.subr.bf16.mxu0 %v219_v0 }
   0xe   :  { %195 = vmatpush3.bf16.msra.mxu0 %v213_v4 }
   0xf   :  { %196 = vmatprep.subr.bf16.mxu0 %v219_v0 }
  0x12   :  { %197 = vmatpush3.bf16.msra.mxu0 %v214_v5 }
  0x13   :  { %198 = vmatprep.subr.bf16.mxu0 %v219_v0 }
  0x16   :  { %199 = vmatpush3.bf16.msra.mxu0 %v215_v6 }
  0x17   :  { %200 = vmatprep.subr.bf16.mxu0 %v219_v0 }
  0x1a   :  { %201 = vmatpush3.bf16.msra.mxu0 %v216_v7 }
  0x1b   :  { %202 = vmatprep.subr.bf16.mxu0 %v219_v0 }
  0x1e   :  { %203 = vmatpush3.bf16.msra.mxu0 %v217_v8 }
  0x21   :  { %205 = vmatmul.mubr.bf16.vlgmr.msra.gmra.mrb[0].mxu0 %v218_v9 }
  0xf4   :  { %v132_v11 = vpop.f32.mrb[0].mxu0 }
  0xf5   :  { %v155_v13 = vadd.f32 %v178_v10, %v132_v11  ;;  %v206_v14 = vpop.f32.mrb[1].mxu0 }
  0xf6   :  { %v135_v15 = vpop.f32.mrb[2].mxu0 }
  0xf7   :  { %v159_v17 = vadd.f32 %v157_v12, %v155_v13  ;;  %v156_v18 = vadd.f32 %v178_v10, %v135_v15  ;;  %v207_v19 = vpop.f32.mrb[3].mxu0 }
  0xf9   :  { %v161_v20 = vmax.f32 %v159_v17, 0.0  ;;  %v160_v21 = vadd.f32 %v158_v16, %v156_v18 }
  0xfb   :  { %163 = vst [vmem:[%s292_s4] sm:$0xff] %v161_v20  ;;  %v162_v22 = vmax.f32 %v160_v21, 0.0 }
  0xfd   :  { %164 = vst [vmem:[%s292_s4 + $0x8] sm:$0xff] %v162_v22 }

// kernel: _lambda_.33
= control target key start
LH: loop header
LB: loop body
LE: loop exit
PB: predicated region body
PF: predicated region fallthrough
CT: control target
= control target key end

     0   :  { %v205_v0 = vmov 0.0   ;;  %vm206_vm0 = vmmov 0   ;;  %s266_s1 = inlined_call_operand.vmem [shape: bf16[128,128], index: 1, kind: input, shape index: {}]   ;;  %s267_s0 = inlined_call_operand.vmem [shape: f32[16,128], index: 0, kind: input, shape index: {}]   ;;  %s268_s2 = inlined_call_operand.vmem [shape: f32[1,128], index: 2, kind: input, shape index: {}]   ;;  %s269_s3 = inlined_call_operand.vmem [shape: f32[16,128], index: 3, kind: output, shape index: {}]  }
   0x1   :  { %175 = vmatprep.subr.bf16.mxu0 %v205_v0  ;;  %v197_v1 = vld [vmem:[%s266_s1] sm:$0xff]   ;;  %191 = vmatprep.mubr.msk.bf16.mxu0 %vm206_vm0, %v205_v0  ;;  %v198_v2 = vld [vmem:[%s266_s1 + $0x8] sm:$0xff]   ;;  %v199_v3 = vld [vmem:[%s266_s1 + $0x10] sm:$0xff]  }
   0x2   :  { %176 = vmatpush3.bf16.msra.mxu0 %v197_v1  ;;  %v200_v4 = vld [vmem:[%s266_s1 + $0x18] sm:$0xff]   ;;  %v201_v5 = vld [vmem:[%s266_s1 + $0x20] sm:$0xff]   ;;  %v202_v6 = vld [vmem:[%s266_s1 + $0x28] sm:$0xff]  }
   0x3   :  { %177 = vmatprep.subr.bf16.mxu0 %v205_v0  ;;  %v203_v7 = vld [vmem:[%s266_s1 + $0x30] sm:$0xff]   ;;  %v204_v8 = vld [vmem:[%s266_s1 + $0x38] sm:$0xff]   ;;  %v23_v9 = vld [vmem:[%s267_s0] sm:$0xff] }
   0x4   :  { %v24_v10 = vld [vmem:[%s267_s0 + $0x8] sm:$0xff]  ;;  %v165_v12 = vld [vmem:[%s268_s2] ss:$0 sm:$0xff] }
   0x5   :  { %v25_v11 = vpack.c.bf16 %v24_v10, %v23_v9 }
   0x6   :  { %178 = vmatpush3.bf16.msra.mxu0 %v198_v2 }
   0x7   :  { %179 = vmatprep.subr.bf16.mxu0 %v205_v0 }
   0xa   :  { %180 = vmatpush3.bf16.msra.mxu0 %v199_v3 }
   0xb   :  { %181 = vmatprep.subr.bf16.mxu0 %v205_v0 }
   0xe   :  { %182 = vmatpush3.bf16.msra.mxu0 %v200_v4 }
   0xf   :  { %183 = vmatprep.subr.bf16.mxu0 %v205_v0 }
  0x12   :  { %184 = vmatpush3.bf16.msra.mxu0 %v201_v5 }
  0x13   :  { %185 = vmatprep.subr.bf16.mxu0 %v205_v0 }
  0x16   :  { %186 = vmatpush3.bf16.msra.mxu0 %v202_v6 }
  0x17   :  { %187 = vmatprep.subr.bf16.mxu0 %v205_v0 }
  0x1a   :  { %188 = vmatpush3.bf16.msra.mxu0 %v203_v7 }
  0x1b   :  { %189 = vmatprep.subr.bf16.mxu0 %v205_v0 }
  0x1e   :  { %190 = vmatpush3.bf16.msra.mxu0 %v204_v8 }
  0x21   :  { %192 = vmatmul.mubr.bf16.vlgmr.msra.gmra.mrb[0].mxu0 %v25_v11 }
  0xf4   :  { %v124_v13 = vpop.f32.mrb[0].mxu0 }
  0xf5   :  { %v147_v14 = vadd.f32 %v165_v12, %v124_v13  ;;  %v193_v15 = vpop.f32.mrb[1].mxu0 }
  0xf6   :  { %v127_v16 = vpop.f32.mrb[2].mxu0 }
  0xf7   :  { %v149_v17 = vmax.f32 %v147_v14, 0.0  ;;  %v148_v18 = vadd.f32 %v165_v12, %v127_v16  ;;  %v194_v19 = vpop.f32.mrb[3].mxu0 }
  0xf9   :  { %151 = vst [vmem:[%s269_s3] sm:$0xff] %v149_v17  ;;  %v150_v20 = vmax.f32 %v148_v18, 0.0 }
  0xfb   :  { %152 = vst [vmem:[%s269_s3 + $0x8] sm:$0xff] %v150_v20 }

// kernel: _lambda_.35
= control target key start
LH: loop header
LB: loop body
LE: loop exit
PB: predicated region body
PF: predicated region fallthrough
CT: control target
= control target key end

     0   :  { %s796_s12 = smov 0   ;;  %s798_s13 = smov 0   ;;  %s898_s0 = inlined_call_operand.vmem [shape: bf16[16,128], index: 0, kind: input, shape index: {}]   ;;  %s899_s1 = inlined_call_operand.vmem [shape: bf16[128,256], index: 1, kind: input, shape index: {}]   ;;  %s900_s2 = inlined_call_operand.vmem [shape: f32[1,256], index: 2, kind: input, shape index: {}]   ;;  %s901_s3 = inlined_call_operand.vmem [shape: f32[16,256], index: 3, kind: output, shape index: {}]  }
   0x1   :  { %s800_s14 = smov 0   ;;  %s802_s15 = smov 0  }
   0x2   :  { %s804_s16 = smov 0  }
   0x3 LB: > { %s28_s17 = sadd.s32 1, %s768_s15  ;;  %s630_s18 = sadd.s32 4294967295, %s772_s16   ;;  %s772_s16 = sphi %s804_s16, %s13_s16   ;;  %s768_s15 = sphi %s802_s15, %s906_s15   ;;  %s764_s14 = sphi %s800_s14, %s905_s14   ;;  %s760_s13 = sphi %s798_s13, %s904_s13   ;;  %s756_s12 = sphi %s796_s12, %s903_s12  }
   0x4   : > { %p30_p0 = scmp.ge.s32.totalorder %s28_s17, 2  ;;  %p76_p1 = scmp.ne.s32.totalorder %s760_s13, %s756_s12 }
   0x5   : > { %p77_p2 = scmp.eq.s32.totalorder %s772_s16, 0  ;;  %p134_p4 = scmp.eq.s32.totalorder %s630_s18, 1 }
   0x6   : > { %s908_s17 = smov (%p30_p0, %s28_s17), 0  ;;  %s69_s20 = sadd.s32 1, %s760_s13 }
   0x7   : > { %p78_p3 = por %p77_p2, %p76_p1  ;;  %s65_s19 = ssub.s32 %s768_s15, %s908_s17 }
   0x8   : > { %p67_p5 = scmp.eq.s32.totalorder %s65_s19, 0  ;;  %p831_p6 = por %p134_p4, %p76_p1 }
   0x9   : > { %p634_p7 = scmp.ge.s32.totalorder %s772_s16, 2 }
   0xa   : > { %s836_s22 = scalar_select %p67_p5, %s760_s13, %s69_s20  }
   0xb   : > { %168 = sbr.rel (%p634_p7) target bundleno = 32 (0x20), region = 20 }
  0x12   : > { %171 = sbr.rel (!%p78_p3) target bundleno = 32 (0x20), region = 24  ;;  %s173_s23 = sand.u32 (%p78_p3), 1, %s760_s13  }
  0x13   : > { %s636_s24 = sshll.u32 (%p78_p3), %s768_s15, 2  ;;  %s635_s25 = sshll.u32 (%p78_p3), %s173_s23, 6 }
  0x14   : > { %s844_s28 = scalar_lea.vmem (%p78_p3), %s899_s1, %s636_s24  ;;  %s175_s29 = scalar_lea.vmem (%p78_p3), [#allocation3], %s635_s25 }
  0x15   : > { %v196_v0 = vld [vmem:[%s844_s28] sm:$0xf] (%p78_p3)  ;;  %v198_v1 = vld [vmem:[%s844_s28 + $0x8] sm:$0xf] (%p78_p3)  ;;  %v200_v2 = vld [vmem:[%s844_s28 + $0x10] sm:$0xf] (%p78_p3) }
  0x16   : > { %197 = vst [vmem:[%s175_s29] sm:$0xf] (%p78_p3), %v196_v0  ;;  %199 = vst [vmem:[%s175_s29 + $0x4] sm:$0xf] (%p78_p3), %v198_v1  ;;  %v202_v3 = vld [vmem:[%s844_s28 + $0x18] sm:$0xf] (%p78_p3) }
  0x17   : > { %v204_v4 = vld [vmem:[%s844_s28 + $0x20] sm:$0xf] (%p78_p3)  ;;  %201 = vst [vmem:[%s175_s29 + $0x8] sm:$0xf] (%p78_p3), %v200_v2  ;;  %203 = vst [vmem:[%s175_s29 + $0xc] sm:$0xf] (%p78_p3), %v202_v3 }
  0x18   : > { %205 = vst [vmem:[%s175_s29 + $0x10] sm:$0xf] (%p78_p3), %v204_v4  ;;  %v206_v5 = vld [vmem:[%s844_s28 + $0x28] sm:$0xf] (%p78_p3)  ;;  %v208_v6 = vld [vmem:[%s844_s28 + $0x30] sm:$0xf] (%p78_p3) }
  0x19   : > { %v210_v7 = vld [vmem:[%s844_s28 + $0x38] sm:$0xf]  ;;  %207 = vst [vmem:[%s175_s29 + $0x14] sm:$0xf] %v206_v5  ;;  %209 = vst [vmem:[%s175_s29 + $0x18] sm:$0xf] %v208_v6 }
  0x1a   : > { %211 = vst [vmem:[%s175_s29 + $0x1c] sm:$0xf] %v210_v7  ;;  %v212_v8 = vld [vmem:[%s844_s28 + $0x40] sm:$0xf]  ;;  %v214_v9 = vld [vmem:[%s844_s28 + $0x48] sm:$0xf] }
  0x1b   : > { %v216_v10 = vld [vmem:[%s844_s28 + $0x50] sm:$0xf]  ;;  %213 = vst [vmem:[%s175_s29 + $0x20] sm:$0xf] %v212_v8  ;;  %215 = vst [vmem:[%s175_s29 + $0x24] sm:$0xf] %v214_v9 }
  0x1c   : > { %217 = vst [vmem:[%s175_s29 + $0x28] sm:$0xf] %v216_v10  ;;  %v218_v11 = vld [vmem:[%s844_s28 + $0x58] sm:$0xf]  ;;  %v220_v12 = vld [vmem:[%s844_s28 + $0x60] sm:$0xf] }
  0x1d   : > { %v222_v13 = vld [vmem:[%s844_s28 + $0x68] sm:$0xf]  ;;  %219 = vst [vmem:[%s175_s29 + $0x2c] sm:$0xf] %v218_v11  ;;  %221 = vst [vmem:[%s175_s29 + $0x30] sm:$0xf] %v220_v12 }
  0x1e   : > { %223 = vst [vmem:[%s175_s29 + $0x34] sm:$0xf] %v222_v13  ;;  %v224_v14 = vld [vmem:[%s844_s28 + $0x70] sm:$0xf]  ;;  %v226_v15 = vld [vmem:[%s844_s28 + $0x78] sm:$0xf] }
  0x1f   : > { %225 = vst [vmem:[%s175_s29 + $0x38] sm:$0xf] %v224_v14  ;;  %227 = vst [vmem:[%s175_s29 + $0x3c] sm:$0xf] %v226_v15 }
  0x20 PF: > { %p637_p8 = scmp.ge.s32.totalorder %s772_s16, 1  ;;  %p287_p9 = scmp.lt.s32.totalorder %s772_s16, 3 }
  0x22   : > { %p288_p10 = pnand %p637_p8, %p287_p9 }
  0x23   : > { %s294_s30 = sand.u32 (!%p288_p10), 1, %s756_s12   ;;  %v774_v16 = vmov (!%p288_p10), 0.0   ;;  %vm775_vm0 = vmmov (!%p288_p10), 0   ;;  %v733_v25 = vld [vmem:[%s898_s0] sm:$0xff] (!%p288_p10)   ;;  %p337_p11 = scmp.lt.s32.totalorder (!%p288_p10), %s764_s14, 1 }
  0x24   : > { %291 = sbr.rel (%p288_p10) target bundleno = 295 (0x127), region = 69  ;;  %663 = vmatprep.subr.bf16.mxu0 (!%p288_p10), %v774_v16  ;;  %s638_s4 = sshll.u32 (!%p288_p10), %s294_s30, 6  ;;  %679 = vmatprep.mubr.msk.bf16.mxu0 (!%p288_p10), %vm775_vm0, %v774_v16 }
  0x25   : > { %s296_s5 = scalar_lea.vmem (!%p288_p10), [#allocation3], %s638_s4  ;;  %s639_s18 = sshll.u32 (!%p288_p10), %s294_s30, 4 }
  0x26   : > { %v725_v17 = vld [vmem:[%s296_s5] sm:$0xff] (!%p288_p10)   ;;  %v726_v18 = vld [vmem:[%s296_s5 + $0x8] sm:$0xff] (!%p288_p10)   ;;  %v727_v19 = vld [vmem:[%s296_s5 + $0x10] sm:$0xff] (!%p288_p10)   ;;  %s326_s19 = scalar_lea.vmem (!%p288_p10), [#allocation4], %s639_s18 }
  0x27   : > { %664 = vmatpush3.bf16.msra.mxu0 (!%p288_p10), %v725_v17  ;;  %v728_v20 = vld [vmem:[%s296_s5 + $0x18] sm:$0xff] (!%p288_p10)   ;;  %v729_v21 = vld [vmem:[%s296_s5 + $0x20] sm:$0xff] (!%p288_p10)   ;;  %v730_v22 = vld [vmem:[%s296_s5 + $0x28] sm:$0xff] (!%p288_p10)  }
  0x28   : > { %665 = vmatprep.subr.bf16.mxu0 (!%p288_p10), %v774_v16  ;;  %v731_v23 = vld [vmem:[%s296_s5 + $0x30] sm:$0xff] (!%p288_p10)   ;;  %v732_v24 = vld [vmem:[%s296_s5 + $0x38] sm:$0xff] (!%p288_p10)  }
  0x2b   : > { %666 = vmatpush3.bf16.msra.mxu0 %v726_v18  ;;  %s338_s8 = scalar_select %p337_p11, %s764_s14, 1 }
  0x2c   : > { %667 = vmatprep.subr.bf16.mxu0 %v774_v16  ;;  %s651_s20 = sshll.u32 (%p831_p6), %s764_s14, 3 }
  0x2d   : > { %s339_s11 = scalar_lea.vmem %s900_s2, %s338_s8  ;;  %s494_s24 = scalar_lea.vmem (%p831_p6), %s901_s3, %s651_s20 }
  0x2e   : > { %v649_v26 = vld [vmem:[%s339_s11] ss:$0 sm:$0xff] }
  0x2f   : > { %668 = vmatpush3.bf16.msra.mxu0 %v727_v19 }
  0x30   : > { %669 = vmatprep.subr.bf16.mxu0 %v774_v16 }
  0x33   : > { %670 = vmatpush3.bf16.msra.mxu0 %v728_v20 }
  0x34   : > { %671 = vmatprep.subr.bf16.mxu0 %v774_v16 }
  0x37   : > { %672 = vmatpush3.bf16.msra.mxu0 %v729_v21 }
  0x38   : > { %673 = vmatprep.subr.bf16.mxu0 %v774_v16 }
  0x3b   : > { %674 = vmatpush3.bf16.msra.mxu0 %v730_v22 }
  0x3c   : > { %675 = vmatprep.subr.bf16.mxu0 %v774_v16 }
  0x3f   : > { %676 = vmatpush3.bf16.msra.mxu0 %v731_v23 }
  0x40   : > { %677 = vmatprep.subr.bf16.mxu0 %v774_v16 }
  0x43   : > { %678 = vmatpush3.bf16.msra.mxu0 %v732_v24 }
  0x46   : > { %680 = vmatmul.mubr.bf16.vlgmr.msra.gmra.mrb[0].mxu0 %v733_v25 }
 0x118   : > { %489 = sbr.rel (!%p831_p6) target bundleno = 295 (0x127), region = 85 }
 0x119   : > { %v456_v27 = vpop.f32.mrb[0].mxu0 }
 0x11a   : > { %v479_v28 = vadd.f32 %v649_v26, %v456_v27  ;;  %v681_v29 = vpop.f32.mrb[1].mxu0 }
 0x11b   : > { %v459_v30 = vpop.f32.mrb[2].mxu0 }
 0x11c   : > { %481 = vst [vmem:[%s326_s19] sm:$0xff] %v479_v28  ;;  %v480_v31 = vadd.f32 %v649_v26, %v459_v30  ;;  %v682_v32 = vpop.f32.mrb[3].mxu0 }
 0x11e   : > { %482 = vst [vmem:[%s326_s19 + $0x8] sm:$0xff] %v480_v31 }
 0x123   : > { %v524_v33 = vld [vmem:[%s326_s19] sm:$0xff] }
 0x124   : > { %525 = vst [vmem:[%s494_s24] sm:$0xff] %v524_v33 }
 0x125   : > { %v526_v34 = vld [vmem:[%s326_s19 + $0x8] sm:$0xff] }
 0x126   : > { %527 = vst [vmem:[%s494_s24 + $0x10] sm:$0xff] %v526_v34 }
 0x127 PF: > { %s13_s16 = sadd.s32 1, %s772_s16   ;;  %s903_s12 = smov %s760_s13 }
 0x128   : > { %p10_p12 = scmp.ge.s32.totalorder %s13_s16, 4   ;;  %s904_s13 = smov %s836_s22 }
 0x129   : > { %s905_s14 = smov %s768_s15  ;;  %s906_s15 = smov %s908_s17 }
 0x12a   :  { %12 = sbr.rel (!%p10_p12) target bundleno = 3 (0x3), region = 160 }

// kernel: _lambda_.34
= control target key start
LH: loop header
LB: loop body
LE: loop exit
PB: predicated region body
PF: predicated region fallthrough
CT: control target
= control target key end

     0   :  { %v692_v34 = vmov 0.0   ;;  %vm693_vm0 = vmmov 0   ;;  %s858_s1 = inlined_call_operand.vmem [shape: bf16[640,128], index: 1, kind: input, shape index: {}]   ;;  %s859_s0 = inlined_call_operand.vmem [shape: bf16[16,640], index: 0, kind: input, shape index: {}]   ;;  %s860_s2 = inlined_call_operand.vmem [shape: f32[1,128], index: 2, kind: input, shape index: {}]   ;;  %s861_s3 = inlined_call_operand.vmem [shape: f32[16,128], index: 3, kind: output, shape index: {}]  }
   0x1   :  { %v645_v0 = vld [vmem:[%s858_s1 + $0x40] sm:$0xff]   ;;  %v649_v4 = vld [vmem:[%s858_s1 + $0x48] sm:$0xff]   ;;  %v653_v8 = vld [vmem:[%s858_s1 + $0x50] sm:$0xff]  }
   0x2   :  { %v646_v1 = vld [vmem:[%s858_s1 + $0xc0] sm:$0xff]   ;;  %570 = vmatprep.subr.bf16.mxu0 %v645_v0  ;;  %v650_v5 = vld [vmem:[%s858_s1 + $0xc8] sm:$0xff]   ;;  %v654_v9 = vld [vmem:[%s858_s1 + $0xd0] sm:$0xff]  }
   0x3   :  { %v647_v2 = vld [vmem:[%s858_s1] sm:$0xff]   ;;  %592 = vmatprep.subr.bf16.mxu1 %v646_v1  ;;  %v651_v6 = vld [vmem:[%s858_s1 + $0x8] sm:$0xff]   ;;  %v655_v10 = vld [vmem:[%s858_s1 + $0x10] sm:$0xff]  }
   0x4   :  { %v648_v3 = vld [vmem:[%s858_s1 + $0x80] sm:$0xff]   ;;  %571 = vmatpush3.bf16.msra.mxu0 %v647_v2  ;;  %v652_v7 = vld [vmem:[%s858_s1 + $0x88] sm:$0xff]   ;;  %v656_v11 = vld [vmem:[%s858_s1 + $0x90] sm:$0xff]  }
   0x5   :  { %593 = vmatpush3.bf16.msra.mxu1 %v648_v3  ;;  %572 = vmatprep.subr.bf16.mxu0 %v649_v4  ;;  %v657_v12 = vld [vmem:[%s858_s1 + $0x58] sm:$0xff]   ;;  %v661_v16 = vld [vmem:[%s858_s1 + $0x60] sm:$0xff]   ;;  %v665_v20 = vld [vmem:[%s858_s1 + $0x68] sm:$0xff]  }
   0x6   :  { %594 = vmatprep.subr.bf16.mxu1 %v650_v5  ;;  %v658_v13 = vld [vmem:[%s858_s1 + $0xd8] sm:$0xff]   ;;  %v662_v17 = vld [vmem:[%s858_s1 + $0xe0] sm:$0xff]   ;;  %v666_v21 = vld [vmem:[%s858_s1 + $0xe8] sm:$0xff]  }
   0x7   :  { %v659_v14 = vld [vmem:[%s858_s1 + $0x18] sm:$0xff]   ;;  %v663_v18 = vld [vmem:[%s858_s1 + $0x20] sm:$0xff]   ;;  %v667_v22 = vld [vmem:[%s858_s1 + $0x28] sm:$0xff]  }
   0x8   :  { %573 = vmatpush3.bf16.msra.mxu0 %v651_v6  ;;  %v660_v15 = vld [vmem:[%s858_s1 + $0x98] sm:$0xff]   ;;  %v664_v19 = vld [vmem:[%s858_s1 + $0xa0] sm:$0xff]   ;;  %v668_v23 = vld [vmem:[%s858_s1 + $0xa8] sm:$0xff]  }
   0x9   :  { %595 = vmatpush3.bf16.msra.mxu1 %v652_v7  ;;  %574 = vmatprep.subr.bf16.mxu0 %v653_v8  ;;  %v669_v24 = vld [vmem:[%s858_s1 + $0x70] sm:$0xff]   ;;  %v673_v28 = vld [vmem:[%s858_s1 + $0x78] sm:$0xff]   ;;  %v682_v36 = vld [vmem:[%s859_s0 + $0xc] ss:$20 sps:$4 sm:$0xff]  }
   0xa   :  { %596 = vmatprep.subr.bf16.mxu1 %v654_v9  ;;  %v670_v25 = vld [vmem:[%s858_s1 + $0xf0] sm:$0xff]   ;;  %v674_v29 = vld [vmem:[%s858_s1 + $0xf8] sm:$0xff]   ;;  %v683_v37 = vld [vmem:[%s858_s1 + $0x100] sm:$0xff]   ;;  %448 = vmatprep.mubr.bf16.mxu1 %v682_v36 }
   0xb   :  { %v671_v26 = vld [vmem:[%s858_s1 + $0x30] sm:$0xff]   ;;  %v675_v30 = vld [vmem:[%s858_s1 + $0x38] sm:$0xff]   ;;  %v684_v38 = vld [vmem:[%s858_s1 + $0x108] sm:$0xff]  }
   0xc   :  { %575 = vmatpush3.bf16.msra.mxu0 %v655_v10  ;;  %v672_v27 = vld [vmem:[%s858_s1 + $0xb0] sm:$0xff]   ;;  %v676_v31 = vld [vmem:[%s858_s1 + $0xb8] sm:$0xff]   ;;  %v687_v41 = vld [vmem:[%s858_s1 + $0x120] sm:$0xff]  }
   0xd   :  { %597 = vmatpush3.bf16.msra.mxu1 %v656_v11  ;;  %576 = vmatprep.subr.bf16.mxu0 %v657_v12  ;;  %v677_v32 = vld [vmem:[%s859_s0] ss:$20 sps:$4 sm:$0xff]   ;;  %v679_v33 = vld [vmem:[%s859_s0 + $0x4] ss:$20 sps:$4 sm:$0xff]   ;;  %v680_v35 = vld [vmem:[%s859_s0 + $0x8] ss:$20 sps:$4 sm:$0xff]  }
   0xe   :  { %598 = vmatprep.subr.bf16.mxu1 %v658_v13  ;;  %407 = vmatprep.mubr.bf16.mxu0 %v679_v33  ;;  %v685_v39 = vld [vmem:[%s858_s1 + $0x110] sm:$0xff]   ;;  %v686_v40 = vld [vmem:[%s858_s1 + $0x118] sm:$0xff]   ;;  %v688_v42 = vld [vmem:[%s858_s1 + $0x128] sm:$0xff]  }
   0xf   :  { %v689_v43 = vld [vmem:[%s858_s1 + $0x130] sm:$0xff]   ;;  %v690_v44 = vld [vmem:[%s858_s1 + $0x138] sm:$0xff]   ;;  %v569_v61 = vld [vmem:[%s860_s2] ss:$0 sm:$0xff] }
  0x10   :  { %577 = vmatpush3.bf16.msra.mxu0 %v659_v14  ;;  %v691_v45 = vld [vmem:[%s859_s0 + $0x10] ss:$20 sps:$4 sm:$0xff]  }
  0x11   :  { %599 = vmatpush3.bf16.msra.mxu1 %v660_v15  ;;  %578 = vmatprep.subr.bf16.mxu0 %v661_v16 }
  0x12   :  { %600 = vmatprep.subr.bf16.mxu1 %v662_v17 }
  0x14   :  { %579 = vmatpush3.bf16.msra.mxu0 %v663_v18 }
  0x15   :  { %601 = vmatpush3.bf16.msra.mxu1 %v664_v19  ;;  %580 = vmatprep.subr.bf16.mxu0 %v665_v20 }
  0x16   :  { %602 = vmatprep.subr.bf16.mxu1 %v666_v21 }
  0x18   :  { %581 = vmatpush3.bf16.msra.mxu0 %v667_v22 }
  0x19   :  { %603 = vmatpush3.bf16.msra.mxu1 %v668_v23  ;;  %582 = vmatprep.subr.bf16.mxu0 %v669_v24 }
  0x1a   :  { %604 = vmatprep.subr.bf16.mxu1 %v670_v25 }
  0x1c   :  { %583 = vmatpush3.bf16.msra.mxu0 %v671_v26 }
  0x1d   :  { %605 = vmatpush3.bf16.msra.mxu1 %v672_v27  ;;  %584 = vmatprep.subr.bf16.mxu0 %v673_v28 }
  0x1e   :  { %606 = vmatprep.subr.bf16.mxu1 %v674_v29 }
  0x20   :  { %585 = vmatpush3.bf16.msra.mxu0 %v675_v30 }
  0x21   :  { %607 = vmatpush3.bf16.msra.mxu1 %v676_v31  ;;  %623 = vmatprep.subr.bf16.mxu0 %v692_v34 }
  0x23   :  { %408 = vmatmul.mubr.bf16.vlgmr.msra.gmra.mrb[0].mxu0 %v677_v32 }
  0x24   :  { %449 = vmatmul.mubr.bf16.vlgmr.msra.gmra.mrb[0].mxu1 %v680_v35  ;;  %624 = vmatpush3.bf16.msra.mxu0 %v683_v37 }
  0x25   :  { %625 = vmatprep.subr.bf16.mxu0 %v692_v34  ;;  %639 = vmatprep.mubr.msk.bf16.mxu0 %vm693_vm0, %v692_v34 }
  0x28   :  { %626 = vmatpush3.bf16.msra.mxu0 %v684_v38 }
  0x29   :  { %627 = vmatprep.subr.bf16.mxu0 %v692_v34 }
  0x2c   :  { %628 = vmatpush3.bf16.msra.mxu0 %v685_v39 }
  0x2d   :  { %629 = vmatprep.subr.bf16.mxu0 %v692_v34 }
  0x30   :  { %630 = vmatpush3.bf16.msra.mxu0 %v686_v40 }
  0x31   :  { %631 = vmatprep.subr.bf16.mxu0 %v692_v34 }
  0x34   :  { %632 = vmatpush3.bf16.msra.mxu0 %v687_v41 }
  0x35   :  { %633 = vmatprep.subr.bf16.mxu0 %v692_v34 }
  0x38   :  { %634 = vmatpush3.bf16.msra.mxu0 %v688_v42 }
  0x39   :  { %635 = vmatprep.subr.bf16.mxu0 %v692_v34 }
  0x3c   :  { %636 = vmatpush3.bf16.msra.mxu0 %v689_v43 }
  0x3d   :  { %637 = vmatprep.subr.bf16.mxu0 %v692_v34 }
  0x40   :  { %638 = vmatpush3.bf16.msra.mxu0 %v690_v44 }
  0x43   :  { %640 = vmatmul.mubr.bf16.vlgmr.msra.gmra.mrb[4].mxu0 %v691_v45 }
  0xf6   :  { %v586_v46 = vpop.f32.mrb[0].mxu0 }
  0xf7   :  { %v608_v47 = vpop.f32.mrb[0].mxu1  ;;  %v587_v48 = vpop.f32.mrb[1].mxu0 }
  0xf8   :  { %v588_v49 = vadd.f32 %v587_v48, %v586_v46  ;;  %v609_v50 = vpop.f32.mrb[1].mxu1  ;;  %v589_v51 = vpop.f32.mrb[2].mxu0 }
  0xf9   :  { %v610_v52 = vadd.f32 %v609_v50, %v608_v47  ;;  %v611_v53 = vpop.f32.mrb[2].mxu1  ;;  %v590_v54 = vpop.f32.mrb[3].mxu0 }
  0xfa   :  { %v591_v55 = vadd.f32 %v590_v54, %v589_v51  ;;  %v612_v56 = vpop.f32.mrb[3].mxu1 }
  0xfb   :  { %v613_v57 = vadd.f32 %v612_v56, %v611_v53  ;;  %v451_v58 = vadd.f32 %v610_v52, %v588_v49 }
  0xfd   :  { %v454_v59 = vadd.f32 %v613_v57, %v591_v55 }
 0x116   :  { %v491_v60 = vpop.f32.mrb[4].mxu0 }
 0x117   :  { %v492_v62 = vadd.f32 %v491_v60, %v451_v58  ;;  %v641_v63 = vpop.f32.mrb[5].mxu0 }
 0x118   :  { %v494_v0 = vpop.f32.mrb[6].mxu0 }
 0x119   :  { %v514_v1 = vadd.f32 %v569_v61, %v492_v62  ;;  %v495_v2 = vadd.f32 %v494_v0, %v454_v59  ;;  %v642_v3 = vpop.f32.mrb[7].mxu0 }
 0x11b   :  { %v516_v4 = vmax.f32 %v514_v1, 0.0  ;;  %v515_v5 = vadd.f32 %v569_v61, %v495_v2 }
 0x11d   :  { %518 = vst [vmem:[%s861_s3] sm:$0xff] %v516_v4  ;;  %v517_v6 = vmax.f32 %v515_v5, 0.0 }
 0x11f   :  { %519 = vst [vmem:[%s861_s3 + $0x8] sm:$0xff] %v517_v6 }

// kernel: _lambda_.36
= control target key start
LH: loop header
LB: loop body
LE: loop exit
PB: predicated region body
PF: predicated region fallthrough
CT: control target
= control target key end

     0   :  { %s921_s15 = smov 0   ;;  %s923_s16 = smov 0   ;;  %s1036_s0 = inlined_call_operand.vmem [shape: bf16[16,128], index: 0, kind: input, shape index: {}]   ;;  %s1037_s1 = inlined_call_operand.vmem [shape: bf16[128,256], index: 1, kind: input, shape index: {}]   ;;  %s1038_s2 = inlined_call_operand.vmem [shape: f32[1,256], index: 2, kind: input, shape index: {}]   ;;  %s1039_s3 = inlined_call_operand.vmem [shape: f32[16,256], index: 3, kind: input, shape index: {}]   ;;  %s1040_s4 = inlined_call_operand.vmem [shape: f32[16,256], index: 4, kind: output, shape index: {}]  }
   0x1   :  { %s925_s17 = smov 0   ;;  %s927_s18 = smov 0  }
   0x2   :  { %s929_s19 = smov 0  }
   0x3 LB: > { %s29_s20 = sadd.s32 1, %s888_s18  ;;  %s747_s21 = sadd.s32 4294967295, %s892_s19   ;;  %s892_s19 = sphi %s929_s19, %s14_s19   ;;  %s888_s18 = sphi %s927_s18, %s1046_s18   ;;  %s884_s17 = sphi %s925_s17, %s1045_s17   ;;  %s880_s16 = sphi %s923_s16, %s1044_s16   ;;  %s876_s15 = sphi %s921_s15, %s1043_s15  }
   0x4   : > { %p31_p0 = scmp.ge.s32.totalorder %s29_s20, 2  ;;  %p77_p1 = scmp.ne.s32.totalorder %s880_s16, %s876_s15 }
   0x5   : > { %p78_p2 = scmp.eq.s32.totalorder %s892_s19, 0  ;;  %p163_p4 = scmp.eq.s32.totalorder %s747_s21, 1 }
   0x6   : > { %s1048_s20 = smov (%p31_p0, %s29_s20), 0  ;;  %s70_s24 = sadd.s32 1, %s880_s16 }
   0x7   : > { %p953_p3 = por %p78_p2, %p77_p1  ;;  %s66_s23 = ssub.s32 %s888_s18, %s1048_s20 }
   0x8   : > { %p68_p5 = scmp.eq.s32.totalorder %s66_s23, 0  ;;  %p960_p6 = por %p163_p4, %p77_p1 }
   0x9   : > { %p751_p7 = scmp.ge.s32.totalorder %s892_s19, 2 }
   0xa   : > { %s965_s26 = scalar_select %p68_p5, %s880_s16, %s70_s24  }
   0xb   : > { %197 = sbr.rel (%p751_p7) target bundleno = 39 (0x27), region = 20 }
  0x12   : > { %200 = sbr.rel (!%p953_p3) target bundleno = 32 (0x20), region = 24  ;;  %s202_s27 = sand.u32 (%p953_p3), 1, %s880_s16  }
  0x13   : > { %s753_s28 = sshll.u32 (%p953_p3), %s888_s18, 2  ;;  %s752_s29 = sshll.u32 (%p953_p3), %s202_s27, 6 }
  0x14   : > { %s975_s6 = scalar_lea.vmem (%p953_p3), %s1037_s1, %s753_s28  ;;  %s204_s7 = scalar_lea.vmem (%p953_p3), [#allocation3], %s752_s29 }
  0x15   : > { %v225_v0 = vld [vmem:[%s975_s6] sm:$0xf] (%p953_p3)  ;;  %v227_v1 = vld [vmem:[%s975_s6 + $0x8] sm:$0xf] (%p953_p3)  ;;  %v229_v2 = vld [vmem:[%s975_s6 + $0x10] sm:$0xf] (%p953_p3) }
  0x16   : > { %226 = vst [vmem:[%s204_s7] sm:$0xf] (%p953_p3), %v225_v0  ;;  %228 = vst [vmem:[%s204_s7 + $0x4] sm:$0xf] (%p953_p3), %v227_v1  ;;  %v231_v3 = vld [vmem:[%s975_s6 + $0x18] sm:$0xf] (%p953_p3) }
  0x17   : > { %v233_v4 = vld [vmem:[%s975_s6 + $0x20] sm:$0xf] (%p953_p3)  ;;  %230 = vst [vmem:[%s204_s7 + $0x8] sm:$0xf] (%p953_p3), %v229_v2  ;;  %232 = vst [vmem:[%s204_s7 + $0xc] sm:$0xf] (%p953_p3), %v231_v3 }
  0x18   : > { %234 = vst [vmem:[%s204_s7 + $0x10] sm:$0xf] (%p953_p3), %v233_v4  ;;  %v235_v5 = vld [vmem:[%s975_s6 + $0x28] sm:$0xf] (%p953_p3)  ;;  %v237_v6 = vld [vmem:[%s975_s6 + $0x30] sm:$0xf] (%p953_p3) }
  0x19   : > { %v239_v7 = vld [vmem:[%s975_s6 + $0x38] sm:$0xf]  ;;  %236 = vst [vmem:[%s204_s7 + $0x14] sm:$0xf] %v235_v5  ;;  %238 = vst [vmem:[%s204_s7 + $0x18] sm:$0xf] %v237_v6 }
  0x1a   : > { %240 = vst [vmem:[%s204_s7 + $0x1c] sm:$0xf] %v239_v7  ;;  %v241_v8 = vld [vmem:[%s975_s6 + $0x40] sm:$0xf]  ;;  %v243_v9 = vld [vmem:[%s975_s6 + $0x48] sm:$0xf] }
  0x1b   : > { %v245_v10 = vld [vmem:[%s975_s6 + $0x50] sm:$0xf]  ;;  %242 = vst [vmem:[%s204_s7 + $0x20] sm:$0xf] %v241_v8  ;;  %244 = vst [vmem:[%s204_s7 + $0x24] sm:$0xf] %v243_v9 }
  0x1c   : > { %246 = vst [vmem:[%s204_s7 + $0x28] sm:$0xf] %v245_v10  ;;  %v247_v11 = vld [vmem:[%s975_s6 + $0x58] sm:$0xf]  ;;  %v249_v12 = vld [vmem:[%s975_s6 + $0x60] sm:$0xf] }
  0x1d   : > { %v251_v13 = vld [vmem:[%s975_s6 + $0x68] sm:$0xf]  ;;  %248 = vst [vmem:[%s204_s7 + $0x2c] sm:$0xf] %v247_v11  ;;  %250 = vst [vmem:[%s204_s7 + $0x30] sm:$0xf] %v249_v12 }
  0x1e   : > { %252 = vst [vmem:[%s204_s7 + $0x34] sm:$0xf] %v251_v13  ;;  %v253_v14 = vld [vmem:[%s975_s6 + $0x70] sm:$0xf]  ;;  %v255_v15 = vld [vmem:[%s975_s6 + $0x78] sm:$0xf] }
  0x1f   : > { %254 = vst [vmem:[%s204_s7 + $0x38] sm:$0xf] %v253_v14  ;;  %256 = vst [vmem:[%s204_s7 + $0x3c] sm:$0xf] %v255_v15 }
  0x20 PF: > { %317 = sbr.rel (!%p953_p3) target bundleno = 39 (0x27), region = 69  ;;  %s319_s8 = sand.u32 (%p953_p3), 1, %s880_s16  }
  0x21   : > { %s755_s9 = sshll.u32 (%p953_p3), %s888_s18, 3  ;;  %s754_s10 = sshll.u32 (%p953_p3), %s319_s8, 4 }
  0x22   : > { %s326_s13 = scalar_lea.vmem (%p953_p3), %s1039_s3, %s755_s9  ;;  %s321_s14 = scalar_lea.vmem (%p953_p3), [#allocation4], %s754_s10 }
  0x23   : > { %v356_v16 = vld [vmem:[%s326_s13] sm:$0xff] (%p953_p3)  ;;  %v358_v17 = vld [vmem:[%s326_s13 + $0x10] sm:$0xff] (%p953_p3) }
  0x24   : > { %357 = vst [vmem:[%s321_s14] sm:$0xff] (%p953_p3), %v356_v16  ;;  %359 = vst [vmem:[%s321_s14 + $0x8] sm:$0xff] (%p953_p3), %v358_v17 }
  0x27 PF: > { %p756_p8 = scmp.ge.s32.totalorder %s892_s19, 1  ;;  %p364_p9 = scmp.lt.s32.totalorder %s892_s19, 3 }
  0x29   : > { %p365_p10 = pnand %p756_p8, %p364_p9 }
  0x2a   : > { %s371_s21 = sand.u32 (!%p365_p10), 1, %s876_s15   ;;  %v894_v18 = vmov (!%p365_p10), 0.0   ;;  %vm895_vm0 = vmmov (!%p365_p10), 0   ;;  %v853_v27 = vld [vmem:[%s1036_s0] sm:$0xff] (!%p365_p10)   ;;  %p427_p11 = scmp.lt.s32.totalorder (!%p365_p10), %s884_s17, 1 }
  0x2b   : > { %368 = sbr.rel (%p365_p10) target bundleno = 306 (0x132), region = 107  ;;  %783 = vmatprep.subr.bf16.mxu0 (!%p365_p10), %v894_v18  ;;  %s757_s22 = sshll.u32 (!%p365_p10), %s371_s21, 6  ;;  %799 = vmatprep.mubr.msk.bf16.mxu0 (!%p365_p10), %vm895_vm0, %v894_v18 }
  0x2c   : > { %s373_s23 = scalar_lea.vmem (!%p365_p10), [#allocation3], %s757_s22  ;;  %s758_s29 = sshll.u32 (!%p365_p10), %s371_s21, 4 }
  0x2d   : > { %v845_v19 = vld [vmem:[%s373_s23] sm:$0xff] (!%p365_p10)   ;;  %v846_v20 = vld [vmem:[%s373_s23 + $0x8] sm:$0xff] (!%p365_p10)   ;;  %v847_v21 = vld [vmem:[%s373_s23 + $0x10] sm:$0xff] (!%p365_p10)   ;;  %s380_s7 = scalar_lea.vmem (!%p365_p10), [#allocation4], %s758_s29  ;;  %s416_s8 = scalar_lea.vmem (!%p365_p10), [#allocation5], %s758_s29 }
  0x2e   : > { %784 = vmatpush3.bf16.msra.mxu0 (!%p365_p10), %v845_v19  ;;  %v848_v22 = vld [vmem:[%s373_s23 + $0x18] sm:$0xff] (!%p365_p10)   ;;  %v849_v23 = vld [vmem:[%s373_s23 + $0x20] sm:$0xff] (!%p365_p10)   ;;  %v850_v24 = vld [vmem:[%s373_s23 + $0x28] sm:$0xff] (!%p365_p10)  }
  0x2f   : > { %785 = vmatprep.subr.bf16.mxu0 (!%p365_p10), %v894_v18  ;;  %v851_v25 = vld [vmem:[%s373_s23 + $0x30] sm:$0xff] (!%p365_p10)   ;;  %v852_v26 = vld [vmem:[%s373_s23 + $0x38] sm:$0xff] (!%p365_p10)  }
  0x30   : > { %v572_v30 = vld [vmem:[%s380_s7] sm:$0xff] (!%p365_p10)  ;;  %v573_v34 = vld [vmem:[%s380_s7 + $0x8] sm:$0xff] (!%p365_p10) }
  0x32   : > { %786 = vmatpush3.bf16.msra.mxu0 %v846_v20  ;;  %s428_s28 = scalar_select %p427_p11, %s884_s17, 1 }
  0x33   : > { %787 = vmatprep.subr.bf16.mxu0 %v894_v18  ;;  %s771_s15 = sshll.u32 (%p960_p6), %s884_s17, 3 }
  0x34   : > { %s429_s6 = scalar_lea.vmem %s1038_s2, %s428_s28  ;;  %s591_s11 = scalar_lea.vmem (%p960_p6), %s1040_s4, %s771_s15 }
  0x35   : > { %v769_v28 = vld [vmem:[%s429_s6] ss:$0 sm:$0xff] }
  0x36   : > { %788 = vmatpush3.bf16.msra.mxu0 %v847_v21 }
  0x37   : > { %789 = vmatprep.subr.bf16.mxu0 %v894_v18 }
  0x3a   : > { %790 = vmatpush3.bf16.msra.mxu0 %v848_v22 }
  0x3b   : > { %791 = vmatprep.subr.bf16.mxu0 %v894_v18 }
  0x3e   : > { %792 = vmatpush3.bf16.msra.mxu0 %v849_v23 }
  0x3f   : > { %793 = vmatprep.subr.bf16.mxu0 %v894_v18 }
  0x42   : > { %794 = vmatpush3.bf16.msra.mxu0 %v850_v24 }
  0x43   : > { %795 = vmatprep.subr.bf16.mxu0 %v894_v18 }
  0x46   : > { %796 = vmatpush3.bf16.msra.mxu0 %v851_v25 }
  0x47   : > { %797 = vmatprep.subr.bf16.mxu0 %v894_v18 }
  0x4a   : > { %798 = vmatpush3.bf16.msra.mxu0 %v852_v26 }
  0x4d   : > { %800 = vmatmul.mubr.bf16.vlgmr.msra.gmra.mrb[0].mxu0 %v853_v27 }
 0x120   : > { %v547_v29 = vpop.f32.mrb[0].mxu0 }
 0x121   : > { %v570_v31 = vadd.f32 %v769_v28, %v547_v29  ;;  %v801_v32 = vpop.f32.mrb[1].mxu0 }
 0x122   : > { %v550_v33 = vpop.f32.mrb[2].mxu0 }
 0x123   : > { %v574_v35 = vadd.f32 %v572_v30, %v570_v31  ;;  %v571_v36 = vadd.f32 %v769_v28, %v550_v33  ;;  %v802_v37 = vpop.f32.mrb[3].mxu0  ;;  %586 = sbr.rel (!%p960_p6) target bundleno = 306 (0x132), region = 127 }
 0x125   : > { %v576_v38 = vmax.f32 %v574_v35, 0.0  ;;  %v575_v39 = vadd.f32 %v573_v34, %v571_v36 }
 0x127   : > { %578 = vst [vmem:[%s416_s8] sm:$0xff] %v576_v38  ;;  %v577_v40 = vmax.f32 %v575_v39, 0.0 }
 0x129   : > { %579 = vst [vmem:[%s416_s8 + $0x8] sm:$0xff] %v577_v40 }
 0x12e   : > { %v621_v41 = vld [vmem:[%s416_s8] sm:$0xff] }
 0x12f   : > { %622 = vst [vmem:[%s591_s11] sm:$0xff] %v621_v41 }
 0x130   : > { %v623_v42 = vld [vmem:[%s416_s8 + $0x8] sm:$0xff] }
 0x131   : > { %624 = vst [vmem:[%s591_s11 + $0x10] sm:$0xff] %v623_v42 }
 0x132 PF: > { %s14_s19 = sadd.s32 1, %s892_s19   ;;  %s1043_s15 = smov %s880_s16 }
 0x133   : > { %p11_p12 = scmp.ge.s32.totalorder %s14_s19, 4   ;;  %s1044_s16 = smov %s965_s26 }
 0x134   : > { %s1045_s17 = smov %s888_s18  ;;  %s1046_s18 = smov %s1048_s20 }
 0x135   :  { %13 = sbr.rel (!%p11_p12) target bundleno = 3 (0x3), region = 210 }

// kernel: _lambda_.37
= control target key start
LH: loop header
LB: loop body
LE: loop exit
PB: predicated region body
PF: predicated region fallthrough
CT: control target
= control target key end

     0   :  { %vm13_vm0 = vcmask 1043456   ;;  %s122_s0 = inlined_call_operand.vmem [shape: f32[4,256], index: 0, kind: input, shape index: {}]   ;;  %s123_s1 = inlined_call_operand.hbm [shape: f32[1,256], index: 1, kind: output, shape index: {}]  }
   0x1   :  { %v9_v0 = vld [vmem:[%s122_s0] sm:$0xff] }
   0x2   :  { %6 = vsyncpa [#allocation3], 0  ;;  %v11_v1 = vcombine.high %v9_v0, %v9_v0  ;;  %v14_v2 = vsel %vm13_vm0, %v9_v0, 0.0  ;;  %v95_v11 = vmov 1966171168   ;;  %v37_v13 = vlaneseq  ;;  %s96_s0 = smov [#allocation2]  }
   0x3   :  { %v15_v3 = vrot.slane %v14_v2, 4  ;;  %v35_v12 = vunpack.c.l.s4 %v95_v11  ;;  %s60_s8 = sshll.u32 %s96_s0, 4  ;;  %s61_s8 = int_to_ptr.vmem [resolvable:$true] %s60_s8 }
   0x4   :  { %v21_v4 = vsel %vm13_vm0, %v11_v1, 0.0  ;;  %v38_v19 = vshrl.u32 %v37_v13, 7  ;;  %vm51_vm1 = vcmp.lt.s32.totalorder %v37_v13, 256  ;;  %s71_s9 = scalar_lea.vmem %s61_s8, 32  ;;  %p76_p1 = scmp.lt.s32.totalorder %s61_s8, %s61_s8 }
   0x5   :  { %v16_v5 = vadd.f32 %v15_v3, %v14_v2  ;;  %v22_v6 = vrot.slane %v21_v4, 4  ;;  %v36_v18 = vunpack.c.0.s8 %v35_v12  ;;  %p72_p0 = scmp.ne.s32.totalorder %s61_s8, %s71_s9  ;;  %p77_p2 = scmp.lt.s32.totalorder %s71_s9, %s71_s9 }
   0x7   :  { %v17_v7 = vrot.slane %v16_v5, 2  ;;  %v23_v8 = vadd.f32 %v22_v6, %v21_v4  ;;  %v39_v23 = vsub.s32 %v36_v18, %v38_v19  ;;  %p78_p3 = por %p77_p2, %p76_p1 }
   0x9   :  { %v18_v9 = vadd.f32 %v17_v7, %v16_v5  ;;  %v24_v10 = vrot.slane %v23_v8, 2  ;;  %p79_p4 = pnand %p78_p3, %p72_p0 }
   0xb   :  { %v19_v14 = vrot.slane %v18_v9, 1  ;;  %v25_v15 = vadd.f32 %v24_v10, %v23_v8 }
   0xd   :  { %v20_v16 = vadd.f32 %v19_v14, %v18_v9  ;;  %v26_v17 = vrot.slane %v25_v15, 1 }
   0xf   :  { %v27_v20 = vadd.f32 %v26_v17, %v25_v15  ;;  %v29_v21 = vmul.f32 0.25, %v20_v16 }
  0x11   :  { %v30_v22 = vmul.f32 0.25, %v27_v20 }
  0x13   :  { %v33_v24 = vcombine.low %v29_v21, %v30_v22 }
  0x15   :  { %v40_v25 = vrot.slane %v33_v24, %v39_v23 }
  0x17   :  { %v47_v26 = vrot.slane %v40_v25, %v39_v23 }
  0x19   :  { %53 = vst.msk [vmem:[#allocation2] sm:$0x3] %vm51_vm1, %v47_v26 }
  0x1a   :  { %82 = shalt.err (!%p79_p4)
}
  0x1b   :  { %s83_s12 = scalar_lea.hbm %s123_s1, 32 }
  0x1c   :  { %p84_p5 = scmp.ne.s32.totalorder %s123_s1, %s83_s12  ;;  %p87_p6 = scmp.lt.u32.totalorder %s83_s12, %s123_s1 }
  0x1e   :  { %p89_p7 = pnand %p87_p6, %p84_p5 }
  0x20   :  { %92 = shalt.err (!%p89_p7)
}
  0x21   :  { %63 = dma.vmem_to_hbm [thread:$0]  %s61_s8, 32, %s123_s1, [#allocation3]  }
  0x22   :  { %93 = dma.done.wait [#allocation3], 32  }
  0x23   :  { %94 = vsyncadd [#allocation3], 4294967264 }
  0x24   :  { %67 = vsyncpa [#allocation3], 1 }

</bundles_post_ra>
